<compile_context>
chip_gen: v5e
topology: v5e:2x2
jax: 0.10.0
libtpu: 0.0.40
codegen_flags: <defaults>
</compile_context>

<pallas_src>
import functools

import jax
import jax.numpy as jnp
from jax.experimental import pallas as pl
from jax.experimental.pallas import tpu as pltpu


def _fused_classifier_kernel(
    x_ref, w1_ref, b1_ref, w2_ref, b2_ref, w3_ref, b3_ref,   # inputs
    o_ref,                                                    # output (1, 1, n_cls)
    p1_ref, h1_ref, p2_ref,                                   # VMEM scratch
    *, K, mxu_dtype,
):
    H, W = x_ref.shape[2], x_ref.shape[3]
    C1 = w1_ref.shape[0]
    C2 = w2_ref.shape[0]
    Ho1, Wo1 = H - K + 1, W - K + 1          # 14, 14
    Ho2, Wo2 = Ho1 - K + 1, Wo1 - K + 1      # 12, 12

    # ---- conv1 im2col (static slices only): p1[ky*K+kx, y*Wo1+x] = x[y+ky, x+kx]
    for y in range(Ho1):
        for ky in range(K):
            for kx in range(K):
                k = ky * K + kx
                p1_ref[k:k + 1, y * Wo1:(y + 1) * Wo1] = (
                    x_ref[0, 0, y + ky:y + ky + 1, kx:kx + Wo1])

    # ---- conv1 + bias + ReLU on the MXU; channel-major, lane-dense (C1, 196)
    h1 = jnp.dot(w1_ref[...], p1_ref[...].astype(mxu_dtype),
                 preferred_element_type=jnp.float32)
    h1_ref[...] = jnp.maximum(h1 + b1_ref[...], 0.0)

    # ---- conv2 im2col straight off the flattened h1 (contiguous lane slices):
    #      p2[(ky*K+kx)*C1 + c, y*Wo2+x] = h1[c, (y+ky)*Wo1 + (x+kx)]
    for y in range(Ho2):
        for ky in range(K):
            for kx in range(K):
                k = ky * K + kx
                s = (y + ky) * Wo1 + kx
                p2_ref[k * C1:(k + 1) * C1, y * Wo2:(y + 1) * Wo2] = (
                    h1_ref[:, s:s + Wo2])

    # ---- conv2 + bias + ReLU; (C2, 144) is already NCHW-flatten order
    h2 = jnp.dot(w2_ref[...], p2_ref[...].astype(mxu_dtype),
                 preferred_element_type=jnp.float32)
    h2 = jnp.maximum(h2 + b2_ref[...], 0.0)

    # ---- linear: logits[o] = b3[o] + sum_{c,s} h2[c, s] * w3[c*S2 + s, o]
    h2m = h2.astype(mxu_dtype)
    acc = b3_ref[...]                                         # (1, n_cls), f32
    for c in range(C2):
        acc = acc + jnp.dot(h2m[c:c + 1, :], w3_ref[c],
                            preferred_element_type=jnp.float32)
    o_ref[0] = acc.astype(o_ref.dtype)


def image_classifier_forward(x, params, *, mxu_dtype=jnp.bfloat16):
    """Pallas equivalent of ImageClassifier.forward; x is NCHW like PyTorch."""
    w1, b1, w2, b2, w3, b3 = params
    N, Cin, H, W = x.shape
    C1, _, K, _ = w1.shape
    C2 = w2.shape[0]
    Ho1, Wo1 = H - K + 1, W - K + 1
    Ho2, Wo2 = Ho1 - K + 1, Wo1 - K + 1
    n_cls = w3.shape[1]
    assert Cin == 1 and w3.shape[0] == C2 * Ho2 * Wo2

    # Trace-time weight re-layouts (constant-folded; no runtime transposes).
    w1m = w1.reshape(C1, Cin * K * K).astype(mxu_dtype)                            # (8, 9)
    w2m = jnp.transpose(w2, (0, 2, 3, 1)).reshape(C2, K * K * C1).astype(mxu_dtype)  # (16, 72)
    w3r = w3.reshape(C2, Ho2 * Wo2, n_cls).astype(mxu_dtype)                       # (16, 144, 10)
    b1c = b1.reshape(C1, 1).astype(jnp.float32)
    b2c = b2.reshape(C2, 1).astype(jnp.float32)
    b3c = b3.reshape(1, n_cls).astype(jnp.float32)

    kernel = functools.partial(_fused_classifier_kernel, K=K, mxu_dtype=mxu_dtype)

    out = pl.pallas_call(
        kernel,
        out_shape=jax.ShapeDtypeStruct((N, 1, n_cls), jnp.float32),
        grid=(N,),
        in_specs=[
            pl.BlockSpec((1, 1, H, W), lambda b: (b, 0, 0, 0)),          # image b
            pl.BlockSpec((C1, Cin * K * K), lambda b: (0, 0)),           # conv1 weight
            pl.BlockSpec((C1, 1), lambda b: (0, 0)),                     # conv1 bias
            pl.BlockSpec((C2, K * K * C1), lambda b: (0, 0)),            # conv2 weight
            pl.BlockSpec((C2, 1), lambda b: (0, 0)),                     # conv2 bias
            pl.BlockSpec((C2, Ho2 * Wo2, n_cls), lambda b: (0, 0, 0)),   # linear weight
            pl.BlockSpec((1, n_cls), lambda b: (0, 0)),                  # linear bias
        ],
        out_specs=pl.BlockSpec((1, 1, n_cls), lambda b: (b, 0, 0)),
        scratch_shapes=[
            pltpu.VMEM((K * K, Ho1 * Wo1), jnp.float32),        # p1: conv1 patches (9, 196)
            pltpu.VMEM((C1, Ho1 * Wo1), jnp.float32),           # h1 post-ReLU      (8, 196)
            pltpu.VMEM((K * K * C1, Ho2 * Wo2), jnp.float32),   # p2: conv2 patches (72, 144)
        ],
        compiler_params=pltpu.CompilerParams(
            dimension_semantics=("parallel",),
        ),
    )(x, w1m, b1c, w2m, b2c, w3r, b3c)

    return out.reshape(N, n_cls)


def _reference_forward(x, params):
    """Pure-JAX f32 reference matching the PyTorch module exactly."""
    w1, b1, w2, b2, w3, b3 = params
    dn = ("NCHW", "OIHW", "NCHW")
    h1 = jax.lax.conv_general_dilated(x, w1, (1, 1), "VALID", dimension_numbers=dn)
    h1 = jnp.maximum(h1 + b1[None, :, None, None], 0.0)
    h2 = jax.lax.conv_general_dilated(h1, w2, (1, 1), "VALID", dimension_numbers=dn)
    h2 = jnp.maximum(h2 + b2[None, :, None, None], 0.0)
    flat = h2.reshape(h2.shape[0], -1)
    return flat @ w3 + b3


if __name__ == "__main__":
    hidden_channels = 8
    N, Cin, H, W = 2, 1, 16, 16

    key = jax.random.PRNGKey(0)
    k1, k2, k3, k4, k5, k6, kx = jax.random.split(key, 7)

    # Deterministic synthetic parameters (shapes follow the nn.Module __init__).
    w1 = 0.1 * jax.random.normal(k1, (hidden_channels, Cin, 3, 3), jnp.float32)
    b1 = 0.1 * jax.random.normal(k2, (hidden_channels,), jnp.float32)
    w2 = 0.1 * jax.random.normal(k3, (16, hidden_channels, 3, 3), jnp.float32)
    b2 = 0.1 * jax.random.normal(k4, (16,), jnp.float32)
    in_features = 16 * (H - 4) * (W - 4)            # what nn.LazyLinear(10) infers
    w3 = 0.02 * jax.random.normal(k5, (in_features, 10), jnp.float32)
    b3 = 0.02 * jax.random.normal(k6, (10,), jnp.float32)
    params = (w1, b1, w2, b2, w3, b3)

    x = jax.random.normal(kx, (N, Cin, H, W), jnp.float32)

    fwd_bf16 = jax.jit(lambda xx: image_classifier_forward(xx, params))
    fwd_f32 = jax.jit(lambda xx: image_classifier_forward(
        xx, params, mxu_dtype=jnp.float32))

    out = fwd_bf16(x)
    out_f32 = fwd_f32(x)
    jax.block_until_ready((out, out_f32))

    assert out.shape == (N, 10) and out.dtype == jnp.float32

    ref = _reference_forward(x, params)
    err_f32 = float(jnp.max(jnp.abs(out_f32 - ref)))
    assert err_f32 < 2e-3, f"f32 kernel vs reference mismatch: {err_f32}"
    err_bf16 = float(jnp.max(jnp.abs(out - ref)))
    assert err_bf16 < 1e-1, f"bf16 kernel vs reference mismatch: {err_bf16}"

    print("KERNEL_OK")
</pallas_src>

<mosaic_0001>
module attributes {stable_mosaic.version = 11 : i64} {
  func.func @_fused_classifier_kernel(%arg0: i32, %arg1: memref<1x1x16x16xf32, #tpu.memory_space<vmem>>, %arg2: memref<8x9xbf16, #tpu.memory_space<vmem>>, %arg3: memref<8x1xf32, #tpu.memory_space<vmem>>, %arg4: memref<16x72xbf16, #tpu.memory_space<vmem>>, %arg5: memref<16x1xf32, #tpu.memory_space<vmem>>, %arg6: memref<16x144x10xbf16, #tpu.memory_space<vmem>>, %arg7: memref<1x10xf32, #tpu.memory_space<vmem>>, %arg8: memref<1x1x10xf32, #tpu.memory_space<vmem>>, %arg9: memref<9x196xf32, #tpu.memory_space<vmem>>, %arg10: memref<8x196xf32, #tpu.memory_space<vmem>>, %arg11: memref<72x144xf32, #tpu.memory_space<vmem>>) attributes {dimension_semantics = [#tpu.dimension_semantics<parallel>], iteration_bounds = array<i64: 2>, scalar_prefetch = 0 : i64, scratch_operands = 3 : i64, tpu.core_type = #tpu.core_type<tc>, window_params = [{transform_indices = @transform_0, window_bounds = array<i64: 1, 1, 16, 16>}, {pipeline_mode = #tpu.pipeline_mode<synchronous>, transform_indices = @transform_1, window_bounds = array<i64: 8, 9>}, {pipeline_mode = #tpu.pipeline_mode<synchronous>, transform_indices = @transform_2, window_bounds = array<i64: 8, 1>}, {pipeline_mode = #tpu.pipeline_mode<synchronous>, transform_indices = @transform_3, window_bounds = array<i64: 16, 72>}, {pipeline_mode = #tpu.pipeline_mode<synchronous>, transform_indices = @transform_4, window_bounds = array<i64: 16, 1>}, {pipeline_mode = #tpu.pipeline_mode<synchronous>, transform_indices = @transform_5, window_bounds = array<i64: 16, 144, 10>}, {pipeline_mode = #tpu.pipeline_mode<synchronous>, transform_indices = @transform_6, window_bounds = array<i64: 1, 10>}, {transform_indices = @transform_7, window_bounds = array<i64: 1, 1, 10>}]} {
    %c0 = arith.constant 0 : index
    %c0_0 = arith.constant 0 : index
    %c0_1 = arith.constant 0 : index
    %c0_2 = arith.constant 0 : index
    %0 = vector.load %arg1[%c0, %c0_0, %c0_1, %c0_2] : memref<1x1x16x16xf32, #tpu.memory_space<vmem>>, vector<1x1x1x14xf32>
    %1 = vector.shape_cast %0 : vector<1x1x1x14xf32> to vector<1x14xf32>
    %c0_3 = arith.constant 0 : index
    %c0_4 = arith.constant 0 : index
    %2 = vector.load %arg9[%c0_3, %c0_4] : memref<9x196xf32, #tpu.memory_space<vmem>>, vector<1x14xf32>
    tpu.vector_store %arg9[%c0_3, %c0_4], %1 {strides = array<i32>} : memref<9x196xf32, #tpu.memory_space<vmem>>, vector<1x14xf32>,
    %c0_5 = arith.constant 0 : index
    %c0_6 = arith.constant 0 : index
    %c0_7 = arith.constant 0 : index
    %c1 = arith.constant 1 : index
    %3 = vector.load %arg1[%c0_5, %c0_6, %c0_7, %c1] : memref<1x1x16x16xf32, #tpu.memory_space<vmem>>, vector<1x1x1x14xf32>
    %4 = vector.shape_cast %3 : vector<1x1x1x14xf32> to vector<1x14xf32>
    %c1_8 = arith.constant 1 : index
    %c0_9 = arith.constant 0 : index
    %5 = vector.load %arg9[%c1_8, %c0_9] : memref<9x196xf32, #tpu.memory_space<vmem>>, vector<1x14xf32>
    tpu.vector_store %arg9[%c1_8, %c0_9], %4 {strides = array<i32>} : memref<9x196xf32, #tpu.memory_space<vmem>>, vector<1x14xf32>,
    %c0_10 = arith.constant 0 : index
    %c0_11 = arith.constant 0 : index
    %c0_12 = arith.constant 0 : index
    %c2 = arith.constant 2 : index
    %6 = vector.load %arg1[%c0_10, %c0_11, %c0_12, %c2] : memref<1x1x16x16xf32, #tpu.memory_space<vmem>>, vector<1x1x1x14xf32>
    %7 = vector.shape_cast %6 : vector<1x1x1x14xf32> to vector<1x14xf32>
    %c2_13 = arith.constant 2 : index
    %c0_14 = arith.constant 0 : index
    %8 = vector.load %arg9[%c2_13, %c0_14] : memref<9x196xf32, #tpu.memory_space<vmem>>, vector<1x14xf32>
    tpu.vector_store %arg9[%c2_13, %c0_14], %7 {strides = array<i32>} : memref<9x196xf32, #tpu.memory_space<vmem>>, vector<1x14xf32>,
    %c0_15 = arith.constant 0 : index
    %c0_16 = arith.constant 0 : index
    %c1_17 = arith.constant 1 : index
    %c0_18 = arith.constant 0 : index
    %9 = vector.load %arg1[%c0_15, %c0_16, %c1_17, %c0_18] : memref<1x1x16x16xf32, #tpu.memory_space<vmem>>, vector<1x1x1x14xf32>
    %10 = vector.shape_cast %9 : vector<1x1x1x14xf32> to vector<1x14xf32>
    %c3 = arith.constant 3 : index
    %c0_19 = arith.constant 0 : index
    %11 = vector.load %arg9[%c3, %c0_19] : memref<9x196xf32, #tpu.memory_space<vmem>>, vector<1x14xf32>
    tpu.vector_store %arg9[%c3, %c0_19], %10 {strides = array<i32>} : memref<9x196xf32, #tpu.memory_space<vmem>>, vector<1x14xf32>,
    %c0_20 = arith.constant 0 : index
    %c0_21 = arith.constant 0 : index
    %c1_22 = arith.constant 1 : index
    %c1_23 = arith.constant 1 : index
    %12 = vector.load %arg1[%c0_20, %c0_21, %c1_22, %c1_23] : memref<1x1x16x16xf32, #tpu.memory_space<vmem>>, vector<1x1x1x14xf32>
    %13 = vector.shape_cast %12 : vector<1x1x1x14xf32> to vector<1x14xf32>
    %c4 = arith.constant 4 : index
    %c0_24 = arith.constant 0 : index
    %14 = vector.load %arg9[%c4, %c0_24] : memref<9x196xf32, #tpu.memory_space<vmem>>, vector<1x14xf32>
    tpu.vector_store %arg9[%c4, %c0_24], %13 {strides = array<i32>} : memref<9x196xf32, #tpu.memory_space<vmem>>, vector<1x14xf32>,
    %c0_25 = arith.constant 0 : index
    %c0_26 = arith.constant 0 : index
    %c1_27 = arith.constant 1 : index
    %c2_28 = arith.constant 2 : index
    %15 = vector.load %arg1[%c0_25, %c0_26, %c1_27, %c2_28] : memref<1x1x16x16xf32, #tpu.memory_space<vmem>>, vector<1x1x1x14xf32>
    %16 = vector.shape_cast %15 : vector<1x1x1x14xf32> to vector<1x14xf32>
    %c5 = arith.constant 5 : index
    %c0_29 = arith.constant 0 : index
    %17 = vector.load %arg9[%c5, %c0_29] : memref<9x196xf32, #tpu.memory_space<vmem>>, vector<1x14xf32>
    tpu.vector_store %arg9[%c5, %c0_29], %16 {strides = array<i32>} : memref<9x196xf32, #tpu.memory_space<vmem>>, vector<1x14xf32>,
    %c0_30 = arith.constant 0 : index
    %c0_31 = arith.constant 0 : index
    %c2_32 = arith.constant 2 : index
    %c0_33 = arith.constant 0 : index
    %18 = vector.load %arg1[%c0_30, %c0_31, %c2_32, %c0_33] : memref<1x1x16x16xf32, #tpu.memory_space<vmem>>, vector<1x1x1x14xf32>
    %19 = vector.shape_cast %18 : vector<1x1x1x14xf32> to vector<1x14xf32>
    %c6 = arith.constant 6 : index
    %c0_34 = arith.constant 0 : index
    %20 = vector.load %arg9[%c6, %c0_34] : memref<9x196xf32, #tpu.memory_space<vmem>>, vector<1x14xf32>
    tpu.vector_store %arg9[%c6, %c0_34], %19 {strides = array<i32>} : memref<9x196xf32, #tpu.memory_space<vmem>>, vector<1x14xf32>,
    %c0_35 = arith.constant 0 : index
    %c0_36 = arith.constant 0 : index
    %c2_37 = arith.constant 2 : index
    %c1_38 = arith.constant 1 : index
    %21 = vector.load %arg1[%c0_35, %c0_36, %c2_37, %c1_38] : memref<1x1x16x16xf32, #tpu.memory_space<vmem>>, vector<1x1x1x14xf32>
    %22 = vector.shape_cast %21 : vector<1x1x1x14xf32> to vector<1x14xf32>
    %c7 = arith.constant 7 : index
    %c0_39 = arith.constant 0 : index
    %23 = vector.load %arg9[%c7, %c0_39] : memref<9x196xf32, #tpu.memory_space<vmem>>, vector<1x14xf32>
    tpu.vector_store %arg9[%c7, %c0_39], %22 {strides = array<i32>} : memref<9x196xf32, #tpu.memory_space<vmem>>, vector<1x14xf32>,
    %c0_40 = arith.constant 0 : index
    %c0_41 = arith.constant 0 : index
    %c2_42 = arith.constant 2 : index
    %c2_43 = arith.constant 2 : index
    %24 = vector.load %arg1[%c0_40, %c0_41, %c2_42, %c2_43] : memref<1x1x16x16xf32, #tpu.memory_space<vmem>>, vector<1x1x1x14xf32>
    %25 = vector.shape_cast %24 : vector<1x1x1x14xf32> to vector<1x14xf32>
    %c8 = arith.constant 8 : index
    %c0_44 = arith.constant 0 : index
    %26 = vector.load %arg9[%c8, %c0_44] : memref<9x196xf32, #tpu.memory_space<vmem>>, vector<1x14xf32>
    tpu.vector_store %arg9[%c8, %c0_44], %25 {strides = array<i32>} : memref<9x196xf32, #tpu.memory_space<vmem>>, vector<1x14xf32>,
    %c0_45 = arith.constant 0 : index
    %c0_46 = arith.constant 0 : index
    %c1_47 = arith.constant 1 : index
    %c0_48 = arith.constant 0 : index
    %27 = vector.load %arg1[%c0_45, %c0_46, %c1_47, %c0_48] : memref<1x1x16x16xf32, #tpu.memory_space<vmem>>, vector<1x1x1x14xf32>
    %28 = vector.shape_cast %27 : vector<1x1x1x14xf32> to vector<1x14xf32>
    %c0_49 = arith.constant 0 : index
    %c14 = arith.constant 14 : index
    %29 = vector.load %arg9[%c0_49, %c14] : memref<9x196xf32, #tpu.memory_space<vmem>>, vector<1x14xf32>
    tpu.vector_store %arg9[%c0_49, %c14], %28 {strides = array<i32>} : memref<9x196xf32, #tpu.memory_space<vmem>>, vector<1x14xf32>,
    %c0_50 = arith.constant 0 : index
    %c0_51 = arith.constant 0 : index
    %c1_52 = arith.constant 1 : index
    %c1_53 = arith.constant 1 : index
    %30 = vector.load %arg1[%c0_50, %c0_51, %c1_52, %c1_53] : memref<1x1x16x16xf32, #tpu.memory_space<vmem>>, vector<1x1x1x14xf32>
    %31 = vector.shape_cast %30 : vector<1x1x1x14xf32> to vector<1x14xf32>
    %c1_54 = arith.constant 1 : index
    %c14_55 = arith.constant 14 : index
    %32 = vector.load %arg9[%c1_54, %c14_55] : memref<9x196xf32, #tpu.memory_space<vmem>>, vector<1x14xf32>
    tpu.vector_store %arg9[%c1_54, %c14_55], %31 {strides = array<i32>} : memref<9x196xf32, #tpu.memory_space<vmem>>, vector<1x14xf32>,
    %c0_56 = arith.constant 0 : index
    %c0_57 = arith.constant 0 : index
    %c1_58 = arith.constant 1 : index
    %c2_59 = arith.constant 2 : index
    %33 = vector.load %arg1[%c0_56, %c0_57, %c1_58, %c2_59] : memref<1x1x16x16xf32, #tpu.memory_space<vmem>>, vector<1x1x1x14xf32>
    %34 = vector.shape_cast %33 : vector<1x1x1x14xf32> to vector<1x14xf32>
    %c2_60 = arith.constant 2 : index
    %c14_61 = arith.constant 14 : index
    %35 = vector.load %arg9[%c2_60, %c14_61] : memref<9x196xf32, #tpu.memory_space<vmem>>, vector<1x14xf32>
    tpu.vector_store %arg9[%c2_60, %c14_61], %34 {strides = array<i32>} : memref<9x196xf32, #tpu.memory_space<vmem>>, vector<1x14xf32>,
    %c0_62 = arith.constant 0 : index
    %c0_63 = arith.constant 0 : index
    %c2_64 = arith.constant 2 : index
    %c0_65 = arith.constant 0 : index
    %36 = vector.load %arg1[%c0_62, %c0_63, %c2_64, %c0_65] : memref<1x1x16x16xf32, #tpu.memory_space<vmem>>, vector<1x1x1x14xf32>
    %37 = vector.shape_cast %36 : vector<1x1x1x14xf32> to vector<1x14xf32>
    %c3_66 = arith.constant 3 : index
    %c14_67 = arith.constant 14 : index
    %38 = vector.load %arg9[%c3_66, %c14_67] : memref<9x196xf32, #tpu.memory_space<vmem>>, vector<1x14xf32>
    tpu.vector_store %arg9[%c3_66, %c14_67], %37 {strides = array<i32>} : memref<9x196xf32, #tpu.memory_space<vmem>>, vector<1x14xf32>,
    %c0_68 = arith.constant 0 : index
    %c0_69 = arith.constant 0 : index
    %c2_70 = arith.constant 2 : index
    %c1_71 = arith.constant 1 : index
    %39 = vector.load %arg1[%c0_68, %c0_69, %c2_70, %c1_71] : memref<1x1x16x16xf32, #tpu.memory_space<vmem>>, vector<1x1x1x14xf32>
    %40 = vector.shape_cast %39 : vector<1x1x1x14xf32> to vector<1x14xf32>
    %c4_72 = arith.constant 4 : index
    %c14_73 = arith.constant 14 : index
    %41 = vector.load %arg9[%c4_72, %c14_73] : memref<9x196xf32, #tpu.memory_space<vmem>>, vector<1x14xf32>
    tpu.vector_store %arg9[%c4_72, %c14_73], %40 {strides = array<i32>} : memref<9x196xf32, #tpu.memory_space<vmem>>, vector<1x14xf32>,
    %c0_74 = arith.constant 0 : index
    %c0_75 = arith.constant 0 : index
    %c2_76 = arith.constant 2 : index
    %c2_77 = arith.constant 2 : index
    %42 = vector.load %arg1[%c0_74, %c0_75, %c2_76, %c2_77] : memref<1x1x16x16xf32, #tpu.memory_space<vmem>>, vector<1x1x1x14xf32>
    %43 = vector.shape_cast %42 : vector<1x1x1x14xf32> to vector<1x14xf32>
    %c5_78 = arith.constant 5 : index
    %c14_79 = arith.constant 14 : index
    %44 = vector.load %arg9[%c5_78, %c14_79] : memref<9x196xf32, #tpu.memory_space<vmem>>, vector<1x14xf32>
    tpu.vector_store %arg9[%c5_78, %c14_79], %43 {strides = array<i32>} : memref<9x196xf32, #tpu.memory_space<vmem>>, vector<1x14xf32>,
    %c0_80 = arith.constant 0 : index
    %c0_81 = arith.constant 0 : index
    %c3_82 = arith.constant 3 : index
    %c0_83 = arith.constant 0 : index
    %45 = vector.load %arg1[%c0_80, %c0_81, %c3_82, %c0_83] : memref<1x1x16x16xf32, #tpu.memory_space<vmem>>, vector<1x1x1x14xf32>
    %46 = vector.shape_cast %45 : vector<1x1x1x14xf32> to vector<1x14xf32>
    %c6_84 = arith.constant 6 : index
    %c14_85 = arith.constant 14 : index
    %47 = vector.load %arg9[%c6_84, %c14_85] : memref<9x196xf32, #tpu.memory_space<vmem>>, vector<1x14xf32>
    tpu.vector_store %arg9[%c6_84, %c14_85], %46 {strides = array<i32>} : memref<9x196xf32, #tpu.memory_space<vmem>>, vector<1x14xf32>,
    %c0_86 = arith.constant 0 : index
    %c0_87 = arith.constant 0 : index
    %c3_88 = arith.constant 3 : index
    %c1_89 = arith.constant 1 : index
    %48 = vector.load %arg1[%c0_86, %c0_87, %c3_88, %c1_89] : memref<1x1x16x16xf32, #tpu.memory_space<vmem>>, vector<1x1x1x14xf32>
    %49 = vector.shape_cast %48 : vector<1x1x1x14xf32> to vector<1x14xf32>
    %c7_90 = arith.constant 7 : index
    %c14_91 = arith.constant 14 : index
    %50 = vector.load %arg9[%c7_90, %c14_91] : memref<9x196xf32, #tpu.memory_space<vmem>>, vector<1x14xf32>
    tpu.vector_store %arg9[%c7_90, %c14_91], %49 {strides = array<i32>} : memref<9x196xf32, #tpu.memory_space<vmem>>, vector<1x14xf32>,
    %c0_92 = arith.constant 0 : index
    %c0_93 = arith.constant 0 : index
    %c3_94 = arith.constant 3 : index
    %c2_95 = arith.constant 2 : index
    %51 = vector.load %arg1[%c0_92, %c0_93, %c3_94, %c2_95] : memref<1x1x16x16xf32, #tpu.memory_space<vmem>>, vector<1x1x1x14xf32>
    %52 = vector.shape_cast %51 : vector<1x1x1x14xf32> to vector<1x14xf32>
    %c8_96 = arith.constant 8 : index
    %c14_97 = arith.constant 14 : index
    %53 = vector.load %arg9[%c8_96, %c14_97] : memref<9x196xf32, #tpu.memory_space<vmem>>, vector<1x14xf32>
    tpu.vector_store %arg9[%c8_96, %c14_97], %52 {strides = array<i32>} : memref<9x196xf32, #tpu.memory_space<vmem>>, vector<1x14xf32>,
    %c0_98 = arith.constant 0 : index
    %c0_99 = arith.constant 0 : index
    %c2_100 = arith.constant 2 : index
    %c0_101 = arith.constant 0 : index
    %54 = vector.load %arg1[%c0_98, %c0_99, %c2_100, %c0_101] : memref<1x1x16x16xf32, #tpu.memory_space<vmem>>, vector<1x1x1x14xf32>
    %55 = vector.shape_cast %54 : vector<1x1x1x14xf32> to vector<1x14xf32>
    %c0_102 = arith.constant 0 : index
    %c28 = arith.constant 28 : index
    %56 = vector.load %arg9[%c0_102, %c28] : memref<9x196xf32, #tpu.memory_space<vmem>>, vector<1x14xf32>
    tpu.vector_store %arg9[%c0_102, %c28], %55 {strides = array<i32>} : memref<9x196xf32, #tpu.memory_space<vmem>>, vector<1x14xf32>,
    %c0_103 = arith.constant 0 : index
    %c0_104 = arith.constant 0 : index
    %c2_105 = arith.constant 2 : index
    %c1_106 = arith.constant 1 : index
    %57 = vector.load %arg1[%c0_103, %c0_104, %c2_105, %c1_106] : memref<1x1x16x16xf32, #tpu.memory_space<vmem>>, vector<1x1x1x14xf32>
    %58 = vector.shape_cast %57 : vector<1x1x1x14xf32> to vector<1x14xf32>
    %c1_107 = arith.constant 1 : index
    %c28_108 = arith.constant 28 : index
    %59 = vector.load %arg9[%c1_107, %c28_108] : memref<9x196xf32, #tpu.memory_space<vmem>>, vector<1x14xf32>
    tpu.vector_store %arg9[%c1_107, %c28_108], %58 {strides = array<i32>} : memref<9x196xf32, #tpu.memory_space<vmem>>, vector<1x14xf32>,
    %c0_109 = arith.constant 0 : index
    %c0_110 = arith.constant 0 : index
    %c2_111 = arith.constant 2 : index
    %c2_112 = arith.constant 2 : index
    %60 = vector.load %arg1[%c0_109, %c0_110, %c2_111, %c2_112] : memref<1x1x16x16xf32, #tpu.memory_space<vmem>>, vector<1x1x1x14xf32>
    %61 = vector.shape_cast %60 : vector<1x1x1x14xf32> to vector<1x14xf32>
    %c2_113 = arith.constant 2 : index
    %c28_114 = arith.constant 28 : index
    %62 = vector.load %arg9[%c2_113, %c28_114] : memref<9x196xf32, #tpu.memory_space<vmem>>, vector<1x14xf32>
    tpu.vector_store %arg9[%c2_113, %c28_114], %61 {strides = array<i32>} : memref<9x196xf32, #tpu.memory_space<vmem>>, vector<1x14xf32>,
    %c0_115 = arith.constant 0 : index
    %c0_116 = arith.constant 0 : index
    %c3_117 = arith.constant 3 : index
    %c0_118 = arith.constant 0 : index
    %63 = vector.load %arg1[%c0_115, %c0_116, %c3_117, %c0_118] : memref<1x1x16x16xf32, #tpu.memory_space<vmem>>, vector<1x1x1x14xf32>
    %64 = vector.shape_cast %63 : vector<1x1x1x14xf32> to vector<1x14xf32>
    %c3_119 = arith.constant 3 : index
    %c28_120 = arith.constant 28 : index
    %65 = vector.load %arg9[%c3_119, %c28_120] : memref<9x196xf32, #tpu.memory_space<vmem>>, vector<1x14xf32>
    tpu.vector_store %arg9[%c3_119, %c28_120], %64 {strides = array<i32>} : memref<9x196xf32, #tpu.memory_space<vmem>>, vector<1x14xf32>,
    %c0_121 = arith.constant 0 : index
    %c0_122 = arith.constant 0 : index
    %c3_123 = arith.constant 3 : index
    %c1_124 = arith.constant 1 : index
    %66 = vector.load %arg1[%c0_121, %c0_122, %c3_123, %c1_124] : memref<1x1x16x16xf32, #tpu.memory_space<vmem>>, vector<1x1x1x14xf32>
    %67 = vector.shape_cast %66 : vector<1x1x1x14xf32> to vector<1x14xf32>
    %c4_125 = arith.constant 4 : index
    %c28_126 = arith.constant 28 : index
    %68 = vector.load %arg9[%c4_125, %c28_126] : memref<9x196xf32, #tpu.memory_space<vmem>>, vector<1x14xf32>
    tpu.vector_store %arg9[%c4_125, %c28_126], %67 {strides = array<i32>} : memref<9x196xf32, #tpu.memory_space<vmem>>, vector<1x14xf32>,
    %c0_127 = arith.constant 0 : index
    %c0_128 = arith.constant 0 : index
    %c3_129 = arith.constant 3 : index
    %c2_130 = arith.constant 2 : index
    %69 = vector.load %arg1[%c0_127, %c0_128, %c3_129, %c2_130] : memref<1x1x16x16xf32, #tpu.memory_space<vmem>>, vector<1x1x1x14xf32>
    %70 = vector.shape_cast %69 : vector<1x1x1x14xf32> to vector<1x14xf32>
    %c5_131 = arith.constant 5 : index
    %c28_132 = arith.constant 28 : index
    %71 = vector.load %arg9[%c5_131, %c28_132] : memref<9x196xf32, #tpu.memory_space<vmem>>, vector<1x14xf32>
    tpu.vector_store %arg9[%c5_131, %c28_132], %70 {strides = array<i32>} : memref<9x196xf32, #tpu.memory_space<vmem>>, vector<1x14xf32>,
    %c0_133 = arith.constant 0 : index
    %c0_134 = arith.constant 0 : index
    %c4_135 = arith.constant 4 : index
    %c0_136 = arith.constant 0 : index
    %72 = vector.load %arg1[%c0_133, %c0_134, %c4_135, %c0_136] : memref<1x1x16x16xf32, #tpu.memory_space<vmem>>, vector<1x1x1x14xf32>
    %73 = vector.shape_cast %72 : vector<1x1x1x14xf32> to vector<1x14xf32>
    %c6_137 = arith.constant 6 : index
    %c28_138 = arith.constant 28 : index
    %74 = vector.load %arg9[%c6_137, %c28_138] : memref<9x196xf32, #tpu.memory_space<vmem>>, vector<1x14xf32>
    tpu.vector_store %arg9[%c6_137, %c28_138], %73 {strides = array<i32>} : memref<9x196xf32, #tpu.memory_space<vmem>>, vector<1x14xf32>,
    %c0_139 = arith.constant 0 : index
    %c0_140 = arith.constant 0 : index
    %c4_141 = arith.constant 4 : index
    %c1_142 = arith.constant 1 : index
    %75 = vector.load %arg1[%c0_139, %c0_140, %c4_141, %c1_142] : memref<1x1x16x16xf32, #tpu.memory_space<vmem>>, vector<1x1x1x14xf32>
    %76 = vector.shape_cast %75 : vector<1x1x1x14xf32> to vector<1x14xf32>
    %c7_143 = arith.constant 7 : index
    %c28_144 = arith.constant 28 : index
    %77 = vector.load %arg9[%c7_143, %c28_144] : memref<9x196xf32, #tpu.memory_space<vmem>>, vector<1x14xf32>
    tpu.vector_store %arg9[%c7_143, %c28_144], %76 {strides = array<i32>} : memref<9x196xf32, #tpu.memory_space<vmem>>, vector<1x14xf32>,
    %c0_145 = arith.constant 0 : index
    %c0_146 = arith.constant 0 : index
    %c4_147 = arith.constant 4 : index
    %c2_148 = arith.constant 2 : index
    %78 = vector.load %arg1[%c0_145, %c0_146, %c4_147, %c2_148] : memref<1x1x16x16xf32, #tpu.memory_space<vmem>>, vector<1x1x1x14xf32>
    %79 = vector.shape_cast %78 : vector<1x1x1x14xf32> to vector<1x14xf32>
    %c8_149 = arith.constant 8 : index
    %c28_150 = arith.constant 28 : index
    %80 = vector.load %arg9[%c8_149, %c28_150] : memref<9x196xf32, #tpu.memory_space<vmem>>, vector<1x14xf32>
    tpu.vector_store %arg9[%c8_149, %c28_150], %79 {strides = array<i32>} : memref<9x196xf32, #tpu.memory_space<vmem>>, vector<1x14xf32>,
    %c0_151 = arith.constant 0 : index
    %c0_152 = arith.constant 0 : index
    %c3_153 = arith.constant 3 : index
    %c0_154 = arith.constant 0 : index
    %81 = vector.load %arg1[%c0_151, %c0_152, %c3_153, %c0_154] : memref<1x1x16x16xf32, #tpu.memory_space<vmem>>, vector<1x1x1x14xf32>
    %82 = vector.shape_cast %81 : vector<1x1x1x14xf32> to vector<1x14xf32>
    %c0_155 = arith.constant 0 : index
    %c42 = arith.constant 42 : index
    %83 = vector.load %arg9[%c0_155, %c42] : memref<9x196xf32, #tpu.memory_space<vmem>>, vector<1x14xf32>
    tpu.vector_store %arg9[%c0_155, %c42], %82 {strides = array<i32>} : memref<9x196xf32, #tpu.memory_space<vmem>>, vector<1x14xf32>,
    %c0_156 = arith.constant 0 : index
    %c0_157 = arith.constant 0 : index
    %c3_158 = arith.constant 3 : index
    %c1_159 = arith.constant 1 : index
    %84 = vector.load %arg1[%c0_156, %c0_157, %c3_158, %c1_159] : memref<1x1x16x16xf32, #tpu.memory_space<vmem>>, vector<1x1x1x14xf32>
    %85 = vector.shape_cast %84 : vector<1x1x1x14xf32> to vector<1x14xf32>
    %c1_160 = arith.constant 1 : index
    %c42_161 = arith.constant 42 : index
    %86 = vector.load %arg9[%c1_160, %c42_161] : memref<9x196xf32, #tpu.memory_space<vmem>>, vector<1x14xf32>
    tpu.vector_store %arg9[%c1_160, %c42_161], %85 {strides = array<i32>} : memref<9x196xf32, #tpu.memory_space<vmem>>, vector<1x14xf32>,
    %c0_162 = arith.constant 0 : index
    %c0_163 = arith.constant 0 : index
    %c3_164 = arith.constant 3 : index
    %c2_165 = arith.constant 2 : index
    %87 = vector.load %arg1[%c0_162, %c0_163, %c3_164, %c2_165] : memref<1x1x16x16xf32, #tpu.memory_space<vmem>>, vector<1x1x1x14xf32>
    %88 = vector.shape_cast %87 : vector<1x1x1x14xf32> to vector<1x14xf32>
    %c2_166 = arith.constant 2 : index
    %c42_167 = arith.constant 42 : index
    %89 = vector.load %arg9[%c2_166, %c42_167] : memref<9x196xf32, #tpu.memory_space<vmem>>, vector<1x14xf32>
    tpu.vector_store %arg9[%c2_166, %c42_167], %88 {strides = array<i32>} : memref<9x196xf32, #tpu.memory_space<vmem>>, vector<1x14xf32>,
    %c0_168 = arith.constant 0 : index
    %c0_169 = arith.constant 0 : index
    %c4_170 = arith.constant 4 : index
    %c0_171 = arith.constant 0 : index
    %90 = vector.load %arg1[%c0_168, %c0_169, %c4_170, %c0_171] : memref<1x1x16x16xf32, #tpu.memory_space<vmem>>, vector<1x1x1x14xf32>
    %91 = vector.shape_cast %90 : vector<1x1x1x14xf32> to vector<1x14xf32>
    %c3_172 = arith.constant 3 : index
    %c42_173 = arith.constant 42 : index
    %92 = vector.load %arg9[%c3_172, %c42_173] : memref<9x196xf32, #tpu.memory_space<vmem>>, vector<1x14xf32>
    tpu.vector_store %arg9[%c3_172, %c42_173], %91 {strides = array<i32>} : memref<9x196xf32, #tpu.memory_space<vmem>>, vector<1x14xf32>,
    %c0_174 = arith.constant 0 : index
    %c0_175 = arith.constant 0 : index
    %c4_176 = arith.constant 4 : index
    %c1_177 = arith.constant 1 : index
    %93 = vector.load %arg1[%c0_174, %c0_175, %c4_176, %c1_177] : memref<1x1x16x16xf32, #tpu.memory_space<vmem>>, vector<1x1x1x14xf32>
    %94 = vector.shape_cast %93 : vector<1x1x1x14xf32> to vector<1x14xf32>
    %c4_178 = arith.constant 4 : index
    %c42_179 = arith.constant 42 : index
    %95 = vector.load %arg9[%c4_178, %c42_179] : memref<9x196xf32, #tpu.memory_space<vmem>>, vector<1x14xf32>
    tpu.vector_store %arg9[%c4_178, %c42_179], %94 {strides = array<i32>} : memref<9x196xf32, #tpu.memory_space<vmem>>, vector<1x14xf32>,
    %c0_180 = arith.constant 0 : index
    %c0_181 = arith.constant 0 : index
    %c4_182 = arith.constant 4 : index
    %c2_183 = arith.constant 2 : index
    %96 = vector.load %arg1[%c0_180, %c0_181, %c4_182, %c2_183] : memref<1x1x16x16xf32, #tpu.memory_space<vmem>>, vector<1x1x1x14xf32>
    %97 = vector.shape_cast %96 : vector<1x1x1x14xf32> to vector<1x14xf32>
    %c5_184 = arith.constant 5 : index
    %c42_185 = arith.constant 42 : index
    %98 = vector.load %arg9[%c5_184, %c42_185] : memref<9x196xf32, #tpu.memory_space<vmem>>, vector<1x14xf32>
    tpu.vector_store %arg9[%c5_184, %c42_185], %97 {strides = array<i32>} : memref<9x196xf32, #tpu.memory_space<vmem>>, vector<1x14xf32>,
    %c0_186 = arith.constant 0 : index
    %c0_187 = arith.constant 0 : index
    %c5_188 = arith.constant 5 : index
    %c0_189 = arith.constant 0 : index
    %99 = vector.load %arg1[%c0_186, %c0_187, %c5_188, %c0_189] : memref<1x1x16x16xf32, #tpu.memory_space<vmem>>, vector<1x1x1x14xf32>
    %100 = vector.shape_cast %99 : vector<1x1x1x14xf32> to vector<1x14xf32>
    %c6_190 = arith.constant 6 : index
    %c42_191 = arith.constant 42 : index
    %101 = vector.load %arg9[%c6_190, %c42_191] : memref<9x196xf32, #tpu.memory_space<vmem>>, vector<1x14xf32>
    tpu.vector_store %arg9[%c6_190, %c42_191], %100 {strides = array<i32>} : memref<9x196xf32, #tpu.memory_space<vmem>>, vector<1x14xf32>,
    %c0_192 = arith.constant 0 : index
    %c0_193 = arith.constant 0 : index
    %c5_194 = arith.constant 5 : index
    %c1_195 = arith.constant 1 : index
    %102 = vector.load %arg1[%c0_192, %c0_193, %c5_194, %c1_195] : memref<1x1x16x16xf32, #tpu.memory_space<vmem>>, vector<1x1x1x14xf32>
    %103 = vector.shape_cast %102 : vector<1x1x1x14xf32> to vector<1x14xf32>
    %c7_196 = arith.constant 7 : index
    %c42_197 = arith.constant 42 : index
    %104 = vector.load %arg9[%c7_196, %c42_197] : memref<9x196xf32, #tpu.memory_space<vmem>>, vector<1x14xf32>
    tpu.vector_store %arg9[%c7_196, %c42_197], %103 {strides = array<i32>} : memref<9x196xf32, #tpu.memory_space<vmem>>, vector<1x14xf32>,
    %c0_198 = arith.constant 0 : index
    %c0_199 = arith.constant 0 : index
    %c5_200 = arith.constant 5 : index
    %c2_201 = arith.constant 2 : index
    %105 = vector.load %arg1[%c0_198, %c0_199, %c5_200, %c2_201] : memref<1x1x16x16xf32, #tpu.memory_space<vmem>>, vector<1x1x1x14xf32>
    %106 = vector.shape_cast %105 : vector<1x1x1x14xf32> to vector<1x14xf32>
    %c8_202 = arith.constant 8 : index
    %c42_203 = arith.constant 42 : index
    %107 = vector.load %arg9[%c8_202, %c42_203] : memref<9x196xf32, #tpu.memory_space<vmem>>, vector<1x14xf32>
    tpu.vector_store %arg9[%c8_202, %c42_203], %106 {strides = array<i32>} : memref<9x196xf32, #tpu.memory_space<vmem>>, vector<1x14xf32>,
    %c0_204 = arith.constant 0 : index
    %c0_205 = arith.constant 0 : index
    %c4_206 = arith.constant 4 : index
    %c0_207 = arith.constant 0 : index
    %108 = vector.load %arg1[%c0_204, %c0_205, %c4_206, %c0_207] : memref<1x1x16x16xf32, #tpu.memory_space<vmem>>, vector<1x1x1x14xf32>
    %109 = vector.shape_cast %108 : vector<1x1x1x14xf32> to vector<1x14xf32>
    %c0_208 = arith.constant 0 : index
    %c56 = arith.constant 56 : index
    %110 = vector.load %arg9[%c0_208, %c56] : memref<9x196xf32, #tpu.memory_space<vmem>>, vector<1x14xf32>
    tpu.vector_store %arg9[%c0_208, %c56], %109 {strides = array<i32>} : memref<9x196xf32, #tpu.memory_space<vmem>>, vector<1x14xf32>,
    %c0_209 = arith.constant 0 : index
    %c0_210 = arith.constant 0 : index
    %c4_211 = arith.constant 4 : index
    %c1_212 = arith.constant 1 : index
    %111 = vector.load %arg1[%c0_209, %c0_210, %c4_211, %c1_212] : memref<1x1x16x16xf32, #tpu.memory_space<vmem>>, vector<1x1x1x14xf32>
    %112 = vector.shape_cast %111 : vector<1x1x1x14xf32> to vector<1x14xf32>
    %c1_213 = arith.constant 1 : index
    %c56_214 = arith.constant 56 : index
    %113 = vector.load %arg9[%c1_213, %c56_214] : memref<9x196xf32, #tpu.memory_space<vmem>>, vector<1x14xf32>
    tpu.vector_store %arg9[%c1_213, %c56_214], %112 {strides = array<i32>} : memref<9x196xf32, #tpu.memory_space<vmem>>, vector<1x14xf32>,
    %c0_215 = arith.constant 0 : index
    %c0_216 = arith.constant 0 : index
    %c4_217 = arith.constant 4 : index
    %c2_218 = arith.constant 2 : index
    %114 = vector.load %arg1[%c0_215, %c0_216, %c4_217, %c2_218] : memref<1x1x16x16xf32, #tpu.memory_space<vmem>>, vector<1x1x1x14xf32>
    %115 = vector.shape_cast %114 : vector<1x1x1x14xf32> to vector<1x14xf32>
    %c2_219 = arith.constant 2 : index
    %c56_220 = arith.constant 56 : index
    %116 = vector.load %arg9[%c2_219, %c56_220] : memref<9x196xf32, #tpu.memory_space<vmem>>, vector<1x14xf32>
    tpu.vector_store %arg9[%c2_219, %c56_220], %115 {strides = array<i32>} : memref<9x196xf32, #tpu.memory_space<vmem>>, vector<1x14xf32>,
    %c0_221 = arith.constant 0 : index
    %c0_222 = arith.constant 0 : index
    %c5_223 = arith.constant 5 : index
    %c0_224 = arith.constant 0 : index
    %117 = vector.load %arg1[%c0_221, %c0_222, %c5_223, %c0_224] : memref<1x1x16x16xf32, #tpu.memory_space<vmem>>, vector<1x1x1x14xf32>
    %118 = vector.shape_cast %117 : vector<1x1x1x14xf32> to vector<1x14xf32>
    %c3_225 = arith.constant 3 : index
    %c56_226 = arith.constant 56 : index
    %119 = vector.load %arg9[%c3_225, %c56_226] : memref<9x196xf32, #tpu.memory_space<vmem>>, vector<1x14xf32>
    tpu.vector_store %arg9[%c3_225, %c56_226], %118 {strides = array<i32>} : memref<9x196xf32, #tpu.memory_space<vmem>>, vector<1x14xf32>,
    %c0_227 = arith.constant 0 : index
    %c0_228 = arith.constant 0 : index
    %c5_229 = arith.constant 5 : index
    %c1_230 = arith.constant 1 : index
    %120 = vector.load %arg1[%c0_227, %c0_228, %c5_229, %c1_230] : memref<1x1x16x16xf32, #tpu.memory_space<vmem>>, vector<1x1x1x14xf32>
    %121 = vector.shape_cast %120 : vector<1x1x1x14xf32> to vector<1x14xf32>
    %c4_231 = arith.constant 4 : index
    %c56_232 = arith.constant 56 : index
    %122 = vector.load %arg9[%c4_231, %c56_232] : memref<9x196xf32, #tpu.memory_space<vmem>>, vector<1x14xf32>
    tpu.vector_store %arg9[%c4_231, %c56_232], %121 {strides = array<i32>} : memref<9x196xf32, #tpu.memory_space<vmem>>, vector<1x14xf32>,
    %c0_233 = arith.constant 0 : index
    %c0_234 = arith.constant 0 : index
    %c5_235 = arith.constant 5 : index
    %c2_236 = arith.constant 2 : index
    %123 = vector.load %arg1[%c0_233, %c0_234, %c5_235, %c2_236] : memref<1x1x16x16xf32, #tpu.memory_space<vmem>>, vector<1x1x1x14xf32>
    %124 = vector.shape_cast %123 : vector<1x1x1x14xf32> to vector<1x14xf32>
    %c5_237 = arith.constant 5 : index
    %c56_238 = arith.constant 56 : index
    %125 = vector.load %arg9[%c5_237, %c56_238] : memref<9x196xf32, #tpu.memory_space<vmem>>, vector<1x14xf32>
    tpu.vector_store %arg9[%c5_237, %c56_238], %124 {strides = array<i32>} : memref<9x196xf32, #tpu.memory_space<vmem>>, vector<1x14xf32>,
    %c0_239 = arith.constant 0 : index
    %c0_240 = arith.constant 0 : index
    %c6_241 = arith.constant 6 : index
    %c0_242 = arith.constant 0 : index
    %126 = vector.load %arg1[%c0_239, %c0_240, %c6_241, %c0_242] : memref<1x1x16x16xf32, #tpu.memory_space<vmem>>, vector<1x1x1x14xf32>
    %127 = vector.shape_cast %126 : vector<1x1x1x14xf32> to vector<1x14xf32>
    %c6_243 = arith.constant 6 : index
    %c56_244 = arith.constant 56 : index
    %128 = vector.load %arg9[%c6_243, %c56_244] : memref<9x196xf32, #tpu.memory_space<vmem>>, vector<1x14xf32>
    tpu.vector_store %arg9[%c6_243, %c56_244], %127 {strides = array<i32>} : memref<9x196xf32, #tpu.memory_space<vmem>>, vector<1x14xf32>,
    %c0_245 = arith.constant 0 : index
    %c0_246 = arith.constant 0 : index
    %c6_247 = arith.constant 6 : index
    %c1_248 = arith.constant 1 : index
    %129 = vector.load %arg1[%c0_245, %c0_246, %c6_247, %c1_248] : memref<1x1x16x16xf32, #tpu.memory_space<vmem>>, vector<1x1x1x14xf32>
    %130 = vector.shape_cast %129 : vector<1x1x1x14xf32> to vector<1x14xf32>
    %c7_249 = arith.constant 7 : index
    %c56_250 = arith.constant 56 : index
    %131 = vector.load %arg9[%c7_249, %c56_250] : memref<9x196xf32, #tpu.memory_space<vmem>>, vector<1x14xf32>
    tpu.vector_store %arg9[%c7_249, %c56_250], %130 {strides = array<i32>} : memref<9x196xf32, #tpu.memory_space<vmem>>, vector<1x14xf32>,
    %c0_251 = arith.constant 0 : index
    %c0_252 = arith.constant 0 : index
    %c6_253 = arith.constant 6 : index
    %c2_254 = arith.constant 2 : index
    %132 = vector.load %arg1[%c0_251, %c0_252, %c6_253, %c2_254] : memref<1x1x16x16xf32, #tpu.memory_space<vmem>>, vector<1x1x1x14xf32>
    %133 = vector.shape_cast %132 : vector<1x1x1x14xf32> to vector<1x14xf32>
    %c8_255 = arith.constant 8 : index
    %c56_256 = arith.constant 56 : index
    %134 = vector.load %arg9[%c8_255, %c56_256] : memref<9x196xf32, #tpu.memory_space<vmem>>, vector<1x14xf32>
    tpu.vector_store %arg9[%c8_255, %c56_256], %133 {strides = array<i32>} : memref<9x196xf32, #tpu.memory_space<vmem>>, vector<1x14xf32>,
    %c0_257 = arith.constant 0 : index
    %c0_258 = arith.constant 0 : index
    %c5_259 = arith.constant 5 : index
    %c0_260 = arith.constant 0 : index
    %135 = vector.load %arg1[%c0_257, %c0_258, %c5_259, %c0_260] : memref<1x1x16x16xf32, #tpu.memory_space<vmem>>, vector<1x1x1x14xf32>
    %136 = vector.shape_cast %135 : vector<1x1x1x14xf32> to vector<1x14xf32>
    %c0_261 = arith.constant 0 : index
    %c70 = arith.constant 70 : index
    %137 = vector.load %arg9[%c0_261, %c70] : memref<9x196xf32, #tpu.memory_space<vmem>>, vector<1x14xf32>
    tpu.vector_store %arg9[%c0_261, %c70], %136 {strides = array<i32>} : memref<9x196xf32, #tpu.memory_space<vmem>>, vector<1x14xf32>,
    %c0_262 = arith.constant 0 : index
    %c0_263 = arith.constant 0 : index
    %c5_264 = arith.constant 5 : index
    %c1_265 = arith.constant 1 : index
    %138 = vector.load %arg1[%c0_262, %c0_263, %c5_264, %c1_265] : memref<1x1x16x16xf32, #tpu.memory_space<vmem>>, vector<1x1x1x14xf32>
    %139 = vector.shape_cast %138 : vector<1x1x1x14xf32> to vector<1x14xf32>
    %c1_266 = arith.constant 1 : index
    %c70_267 = arith.constant 70 : index
    %140 = vector.load %arg9[%c1_266, %c70_267] : memref<9x196xf32, #tpu.memory_space<vmem>>, vector<1x14xf32>
    tpu.vector_store %arg9[%c1_266, %c70_267], %139 {strides = array<i32>} : memref<9x196xf32, #tpu.memory_space<vmem>>, vector<1x14xf32>,
    %c0_268 = arith.constant 0 : index
    %c0_269 = arith.constant 0 : index
    %c5_270 = arith.constant 5 : index
    %c2_271 = arith.constant 2 : index
    %141 = vector.load %arg1[%c0_268, %c0_269, %c5_270, %c2_271] : memref<1x1x16x16xf32, #tpu.memory_space<vmem>>, vector<1x1x1x14xf32>
    %142 = vector.shape_cast %141 : vector<1x1x1x14xf32> to vector<1x14xf32>
    %c2_272 = arith.constant 2 : index
    %c70_273 = arith.constant 70 : index
    %143 = vector.load %arg9[%c2_272, %c70_273] : memref<9x196xf32, #tpu.memory_space<vmem>>, vector<1x14xf32>
    tpu.vector_store %arg9[%c2_272, %c70_273], %142 {strides = array<i32>} : memref<9x196xf32, #tpu.memory_space<vmem>>, vector<1x14xf32>,
    %c0_274 = arith.constant 0 : index
    %c0_275 = arith.constant 0 : index
    %c6_276 = arith.constant 6 : index
    %c0_277 = arith.constant 0 : index
    %144 = vector.load %arg1[%c0_274, %c0_275, %c6_276, %c0_277] : memref<1x1x16x16xf32, #tpu.memory_space<vmem>>, vector<1x1x1x14xf32>
    %145 = vector.shape_cast %144 : vector<1x1x1x14xf32> to vector<1x14xf32>
    %c3_278 = arith.constant 3 : index
    %c70_279 = arith.constant 70 : index
    %146 = vector.load %arg9[%c3_278, %c70_279] : memref<9x196xf32, #tpu.memory_space<vmem>>, vector<1x14xf32>
    tpu.vector_store %arg9[%c3_278, %c70_279], %145 {strides = array<i32>} : memref<9x196xf32, #tpu.memory_space<vmem>>, vector<1x14xf32>,
    %c0_280 = arith.constant 0 : index
    %c0_281 = arith.constant 0 : index
    %c6_282 = arith.constant 6 : index
    %c1_283 = arith.constant 1 : index
    %147 = vector.load %arg1[%c0_280, %c0_281, %c6_282, %c1_283] : memref<1x1x16x16xf32, #tpu.memory_space<vmem>>, vector<1x1x1x14xf32>
    %148 = vector.shape_cast %147 : vector<1x1x1x14xf32> to vector<1x14xf32>
    %c4_284 = arith.constant 4 : index
    %c70_285 = arith.constant 70 : index
    %149 = vector.load %arg9[%c4_284, %c70_285] : memref<9x196xf32, #tpu.memory_space<vmem>>, vector<1x14xf32>
    tpu.vector_store %arg9[%c4_284, %c70_285], %148 {strides = array<i32>} : memref<9x196xf32, #tpu.memory_space<vmem>>, vector<1x14xf32>,
    %c0_286 = arith.constant 0 : index
    %c0_287 = arith.constant 0 : index
    %c6_288 = arith.constant 6 : index
    %c2_289 = arith.constant 2 : index
    %150 = vector.load %arg1[%c0_286, %c0_287, %c6_288, %c2_289] : memref<1x1x16x16xf32, #tpu.memory_space<vmem>>, vector<1x1x1x14xf32>
    %151 = vector.shape_cast %150 : vector<1x1x1x14xf32> to vector<1x14xf32>
    %c5_290 = arith.constant 5 : index
    %c70_291 = arith.constant 70 : index
    %152 = vector.load %arg9[%c5_290, %c70_291] : memref<9x196xf32, #tpu.memory_space<vmem>>, vector<1x14xf32>
    tpu.vector_store %arg9[%c5_290, %c70_291], %151 {strides = array<i32>} : memref<9x196xf32, #tpu.memory_space<vmem>>, vector<1x14xf32>,
    %c0_292 = arith.constant 0 : index
    %c0_293 = arith.constant 0 : index
    %c7_294 = arith.constant 7 : index
    %c0_295 = arith.constant 0 : index
    %153 = vector.load %arg1[%c0_292, %c0_293, %c7_294, %c0_295] : memref<1x1x16x16xf32, #tpu.memory_space<vmem>>, vector<1x1x1x14xf32>
    %154 = vector.shape_cast %153 : vector<1x1x1x14xf32> to vector<1x14xf32>
    %c6_296 = arith.constant 6 : index
    %c70_297 = arith.constant 70 : index
    %155 = vector.load %arg9[%c6_296, %c70_297] : memref<9x196xf32, #tpu.memory_space<vmem>>, vector<1x14xf32>
    tpu.vector_store %arg9[%c6_296, %c70_297], %154 {strides = array<i32>} : memref<9x196xf32, #tpu.memory_space<vmem>>, vector<1x14xf32>,
    %c0_298 = arith.constant 0 : index
    %c0_299 = arith.constant 0 : index
    %c7_300 = arith.constant 7 : index
    %c1_301 = arith.constant 1 : index
    %156 = vector.load %arg1[%c0_298, %c0_299, %c7_300, %c1_301] : memref<1x1x16x16xf32, #tpu.memory_space<vmem>>, vector<1x1x1x14xf32>
    %157 = vector.shape_cast %156 : vector<1x1x1x14xf32> to vector<1x14xf32>
    %c7_302 = arith.constant 7 : index
    %c70_303 = arith.constant 70 : index
    %158 = vector.load %arg9[%c7_302, %c70_303] : memref<9x196xf32, #tpu.memory_space<vmem>>, vector<1x14xf32>
    tpu.vector_store %arg9[%c7_302, %c70_303], %157 {strides = array<i32>} : memref<9x196xf32, #tpu.memory_space<vmem>>, vector<1x14xf32>,
    %c0_304 = arith.constant 0 : index
    %c0_305 = arith.constant 0 : index
    %c7_306 = arith.constant 7 : index
    %c2_307 = arith.constant 2 : index
    %159 = vector.load %arg1[%c0_304, %c0_305, %c7_306, %c2_307] : memref<1x1x16x16xf32, #tpu.memory_space<vmem>>, vector<1x1x1x14xf32>
    %160 = vector.shape_cast %159 : vector<1x1x1x14xf32> to vector<1x14xf32>
    %c8_308 = arith.constant 8 : index
    %c70_309 = arith.constant 70 : index
    %161 = vector.load %arg9[%c8_308, %c70_309] : memref<9x196xf32, #tpu.memory_space<vmem>>, vector<1x14xf32>
    tpu.vector_store %arg9[%c8_308, %c70_309], %160 {strides = array<i32>} : memref<9x196xf32, #tpu.memory_space<vmem>>, vector<1x14xf32>,
    %c0_310 = arith.constant 0 : index
    %c0_311 = arith.constant 0 : index
    %c6_312 = arith.constant 6 : index
    %c0_313 = arith.constant 0 : index
    %162 = vector.load %arg1[%c0_310, %c0_311, %c6_312, %c0_313] : memref<1x1x16x16xf32, #tpu.memory_space<vmem>>, vector<1x1x1x14xf32>
    %163 = vector.shape_cast %162 : vector<1x1x1x14xf32> to vector<1x14xf32>
    %c0_314 = arith.constant 0 : index
    %c84 = arith.constant 84 : index
    %164 = vector.load %arg9[%c0_314, %c84] : memref<9x196xf32, #tpu.memory_space<vmem>>, vector<1x14xf32>
    tpu.vector_store %arg9[%c0_314, %c84], %163 {strides = array<i32>} : memref<9x196xf32, #tpu.memory_space<vmem>>, vector<1x14xf32>,
    %c0_315 = arith.constant 0 : index
    %c0_316 = arith.constant 0 : index
    %c6_317 = arith.constant 6 : index
    %c1_318 = arith.constant 1 : index
    %165 = vector.load %arg1[%c0_315, %c0_316, %c6_317, %c1_318] : memref<1x1x16x16xf32, #tpu.memory_space<vmem>>, vector<1x1x1x14xf32>
    %166 = vector.shape_cast %165 : vector<1x1x1x14xf32> to vector<1x14xf32>
    %c1_319 = arith.constant 1 : index
    %c84_320 = arith.constant 84 : index
    %167 = vector.load %arg9[%c1_319, %c84_320] : memref<9x196xf32, #tpu.memory_space<vmem>>, vector<1x14xf32>
    tpu.vector_store %arg9[%c1_319, %c84_320], %166 {strides = array<i32>} : memref<9x196xf32, #tpu.memory_space<vmem>>, vector<1x14xf32>,
    %c0_321 = arith.constant 0 : index
    %c0_322 = arith.constant 0 : index
    %c6_323 = arith.constant 6 : index
    %c2_324 = arith.constant 2 : index
    %168 = vector.load %arg1[%c0_321, %c0_322, %c6_323, %c2_324] : memref<1x1x16x16xf32, #tpu.memory_space<vmem>>, vector<1x1x1x14xf32>
    %169 = vector.shape_cast %168 : vector<1x1x1x14xf32> to vector<1x14xf32>
    %c2_325 = arith.constant 2 : index
    %c84_326 = arith.constant 84 : index
    %170 = vector.load %arg9[%c2_325, %c84_326] : memref<9x196xf32, #tpu.memory_space<vmem>>, vector<1x14xf32>
    tpu.vector_store %arg9[%c2_325, %c84_326], %169 {strides = array<i32>} : memref<9x196xf32, #tpu.memory_space<vmem>>, vector<1x14xf32>,
    %c0_327 = arith.constant 0 : index
    %c0_328 = arith.constant 0 : index
    %c7_329 = arith.constant 7 : index
    %c0_330 = arith.constant 0 : index
    %171 = vector.load %arg1[%c0_327, %c0_328, %c7_329, %c0_330] : memref<1x1x16x16xf32, #tpu.memory_space<vmem>>, vector<1x1x1x14xf32>
    %172 = vector.shape_cast %171 : vector<1x1x1x14xf32> to vector<1x14xf32>
    %c3_331 = arith.constant 3 : index
    %c84_332 = arith.constant 84 : index
    %173 = vector.load %arg9[%c3_331, %c84_332] : memref<9x196xf32, #tpu.memory_space<vmem>>, vector<1x14xf32>
    tpu.vector_store %arg9[%c3_331, %c84_332], %172 {strides = array<i32>} : memref<9x196xf32, #tpu.memory_space<vmem>>, vector<1x14xf32>,
    %c0_333 = arith.constant 0 : index
    %c0_334 = arith.constant 0 : index
    %c7_335 = arith.constant 7 : index
    %c1_336 = arith.constant 1 : index
    %174 = vector.load %arg1[%c0_333, %c0_334, %c7_335, %c1_336] : memref<1x1x16x16xf32, #tpu.memory_space<vmem>>, vector<1x1x1x14xf32>
    %175 = vector.shape_cast %174 : vector<1x1x1x14xf32> to vector<1x14xf32>
    %c4_337 = arith.constant 4 : index
    %c84_338 = arith.constant 84 : index
    %176 = vector.load %arg9[%c4_337, %c84_338] : memref<9x196xf32, #tpu.memory_space<vmem>>, vector<1x14xf32>
    tpu.vector_store %arg9[%c4_337, %c84_338], %175 {strides = array<i32>} : memref<9x196xf32, #tpu.memory_space<vmem>>, vector<1x14xf32>,
    %c0_339 = arith.constant 0 : index
    %c0_340 = arith.constant 0 : index
    %c7_341 = arith.constant 7 : index
    %c2_342 = arith.constant 2 : index
    %177 = vector.load %arg1[%c0_339, %c0_340, %c7_341, %c2_342] : memref<1x1x16x16xf32, #tpu.memory_space<vmem>>, vector<1x1x1x14xf32>
    %178 = vector.shape_cast %177 : vector<1x1x1x14xf32> to vector<1x14xf32>
    %c5_343 = arith.constant 5 : index
    %c84_344 = arith.constant 84 : index
    %179 = vector.load %arg9[%c5_343, %c84_344] : memref<9x196xf32, #tpu.memory_space<vmem>>, vector<1x14xf32>
    tpu.vector_store %arg9[%c5_343, %c84_344], %178 {strides = array<i32>} : memref<9x196xf32, #tpu.memory_space<vmem>>, vector<1x14xf32>,
    %c0_345 = arith.constant 0 : index
    %c0_346 = arith.constant 0 : index
    %c8_347 = arith.constant 8 : index
    %c0_348 = arith.constant 0 : index
    %180 = vector.load %arg1[%c0_345, %c0_346, %c8_347, %c0_348] : memref<1x1x16x16xf32, #tpu.memory_space<vmem>>, vector<1x1x1x14xf32>
    %181 = vector.shape_cast %180 : vector<1x1x1x14xf32> to vector<1x14xf32>
    %c6_349 = arith.constant 6 : index
    %c84_350 = arith.constant 84 : index
    %182 = vector.load %arg9[%c6_349, %c84_350] : memref<9x196xf32, #tpu.memory_space<vmem>>, vector<1x14xf32>
    tpu.vector_store %arg9[%c6_349, %c84_350], %181 {strides = array<i32>} : memref<9x196xf32, #tpu.memory_space<vmem>>, vector<1x14xf32>,
    %c0_351 = arith.constant 0 : index
    %c0_352 = arith.constant 0 : index
    %c8_353 = arith.constant 8 : index
    %c1_354 = arith.constant 1 : index
    %183 = vector.load %arg1[%c0_351, %c0_352, %c8_353, %c1_354] : memref<1x1x16x16xf32, #tpu.memory_space<vmem>>, vector<1x1x1x14xf32>
    %184 = vector.shape_cast %183 : vector<1x1x1x14xf32> to vector<1x14xf32>
    %c7_355 = arith.constant 7 : index
    %c84_356 = arith.constant 84 : index
    %185 = vector.load %arg9[%c7_355, %c84_356] : memref<9x196xf32, #tpu.memory_space<vmem>>, vector<1x14xf32>
    tpu.vector_store %arg9[%c7_355, %c84_356], %184 {strides = array<i32>} : memref<9x196xf32, #tpu.memory_space<vmem>>, vector<1x14xf32>,
    %c0_357 = arith.constant 0 : index
    %c0_358 = arith.constant 0 : index
    %c8_359 = arith.constant 8 : index
    %c2_360 = arith.constant 2 : index
    %186 = vector.load %arg1[%c0_357, %c0_358, %c8_359, %c2_360] : memref<1x1x16x16xf32, #tpu.memory_space<vmem>>, vector<1x1x1x14xf32>
    %187 = vector.shape_cast %186 : vector<1x1x1x14xf32> to vector<1x14xf32>
    %c8_361 = arith.constant 8 : index
    %c84_362 = arith.constant 84 : index
    %188 = vector.load %arg9[%c8_361, %c84_362] : memref<9x196xf32, #tpu.memory_space<vmem>>, vector<1x14xf32>
    tpu.vector_store %arg9[%c8_361, %c84_362], %187 {strides = array<i32>} : memref<9x196xf32, #tpu.memory_space<vmem>>, vector<1x14xf32>,
    %c0_363 = arith.constant 0 : index
    %c0_364 = arith.constant 0 : index
    %c7_365 = arith.constant 7 : index
    %c0_366 = arith.constant 0 : index
    %189 = vector.load %arg1[%c0_363, %c0_364, %c7_365, %c0_366] : memref<1x1x16x16xf32, #tpu.memory_space<vmem>>, vector<1x1x1x14xf32>
    %190 = vector.shape_cast %189 : vector<1x1x1x14xf32> to vector<1x14xf32>
    %c0_367 = arith.constant 0 : index
    %c98 = arith.constant 98 : index
    %191 = vector.load %arg9[%c0_367, %c98] : memref<9x196xf32, #tpu.memory_space<vmem>>, vector<1x14xf32>
    tpu.vector_store %arg9[%c0_367, %c98], %190 {strides = array<i32>} : memref<9x196xf32, #tpu.memory_space<vmem>>, vector<1x14xf32>,
    %c0_368 = arith.constant 0 : index
    %c0_369 = arith.constant 0 : index
    %c7_370 = arith.constant 7 : index
    %c1_371 = arith.constant 1 : index
    %192 = vector.load %arg1[%c0_368, %c0_369, %c7_370, %c1_371] : memref<1x1x16x16xf32, #tpu.memory_space<vmem>>, vector<1x1x1x14xf32>
    %193 = vector.shape_cast %192 : vector<1x1x1x14xf32> to vector<1x14xf32>
    %c1_372 = arith.constant 1 : index
    %c98_373 = arith.constant 98 : index
    %194 = vector.load %arg9[%c1_372, %c98_373] : memref<9x196xf32, #tpu.memory_space<vmem>>, vector<1x14xf32>
    tpu.vector_store %arg9[%c1_372, %c98_373], %193 {strides = array<i32>} : memref<9x196xf32, #tpu.memory_space<vmem>>, vector<1x14xf32>,
    %c0_374 = arith.constant 0 : index
    %c0_375 = arith.constant 0 : index
    %c7_376 = arith.constant 7 : index
    %c2_377 = arith.constant 2 : index
    %195 = vector.load %arg1[%c0_374, %c0_375, %c7_376, %c2_377] : memref<1x1x16x16xf32, #tpu.memory_space<vmem>>, vector<1x1x1x14xf32>
    %196 = vector.shape_cast %195 : vector<1x1x1x14xf32> to vector<1x14xf32>
    %c2_378 = arith.constant 2 : index
    %c98_379 = arith.constant 98 : index
    %197 = vector.load %arg9[%c2_378, %c98_379] : memref<9x196xf32, #tpu.memory_space<vmem>>, vector<1x14xf32>
    tpu.vector_store %arg9[%c2_378, %c98_379], %196 {strides = array<i32>} : memref<9x196xf32, #tpu.memory_space<vmem>>, vector<1x14xf32>,
    %c0_380 = arith.constant 0 : index
    %c0_381 = arith.constant 0 : index
    %c8_382 = arith.constant 8 : index
    %c0_383 = arith.constant 0 : index
    %198 = vector.load %arg1[%c0_380, %c0_381, %c8_382, %c0_383] : memref<1x1x16x16xf32, #tpu.memory_space<vmem>>, vector<1x1x1x14xf32>
    %199 = vector.shape_cast %198 : vector<1x1x1x14xf32> to vector<1x14xf32>
    %c3_384 = arith.constant 3 : index
    %c98_385 = arith.constant 98 : index
    %200 = vector.load %arg9[%c3_384, %c98_385] : memref<9x196xf32, #tpu.memory_space<vmem>>, vector<1x14xf32>
    tpu.vector_store %arg9[%c3_384, %c98_385], %199 {strides = array<i32>} : memref<9x196xf32, #tpu.memory_space<vmem>>, vector<1x14xf32>,
    %c0_386 = arith.constant 0 : index
    %c0_387 = arith.constant 0 : index
    %c8_388 = arith.constant 8 : index
    %c1_389 = arith.constant 1 : index
    %201 = vector.load %arg1[%c0_386, %c0_387, %c8_388, %c1_389] : memref<1x1x16x16xf32, #tpu.memory_space<vmem>>, vector<1x1x1x14xf32>
    %202 = vector.shape_cast %201 : vector<1x1x1x14xf32> to vector<1x14xf32>
    %c4_390 = arith.constant 4 : index
    %c98_391 = arith.constant 98 : index
    %203 = vector.load %arg9[%c4_390, %c98_391] : memref<9x196xf32, #tpu.memory_space<vmem>>, vector<1x14xf32>
    tpu.vector_store %arg9[%c4_390, %c98_391], %202 {strides = array<i32>} : memref<9x196xf32, #tpu.memory_space<vmem>>, vector<1x14xf32>,
    %c0_392 = arith.constant 0 : index
    %c0_393 = arith.constant 0 : index
    %c8_394 = arith.constant 8 : index
    %c2_395 = arith.constant 2 : index
    %204 = vector.load %arg1[%c0_392, %c0_393, %c8_394, %c2_395] : memref<1x1x16x16xf32, #tpu.memory_space<vmem>>, vector<1x1x1x14xf32>
    %205 = vector.shape_cast %204 : vector<1x1x1x14xf32> to vector<1x14xf32>
    %c5_396 = arith.constant 5 : index
    %c98_397 = arith.constant 98 : index
    %206 = vector.load %arg9[%c5_396, %c98_397] : memref<9x196xf32, #tpu.memory_space<vmem>>, vector<1x14xf32>
    tpu.vector_store %arg9[%c5_396, %c98_397], %205 {strides = array<i32>} : memref<9x196xf32, #tpu.memory_space<vmem>>, vector<1x14xf32>,
    %c0_398 = arith.constant 0 : index
    %c0_399 = arith.constant 0 : index
    %c9 = arith.constant 9 : index
    %c0_400 = arith.constant 0 : index
    %207 = vector.load %arg1[%c0_398, %c0_399, %c9, %c0_400] : memref<1x1x16x16xf32, #tpu.memory_space<vmem>>, vector<1x1x1x14xf32>
    %208 = vector.shape_cast %207 : vector<1x1x1x14xf32> to vector<1x14xf32>
    %c6_401 = arith.constant 6 : index
    %c98_402 = arith.constant 98 : index
    %209 = vector.load %arg9[%c6_401, %c98_402] : memref<9x196xf32, #tpu.memory_space<vmem>>, vector<1x14xf32>
    tpu.vector_store %arg9[%c6_401, %c98_402], %208 {strides = array<i32>} : memref<9x196xf32, #tpu.memory_space<vmem>>, vector<1x14xf32>,
    %c0_403 = arith.constant 0 : index
    %c0_404 = arith.constant 0 : index
    %c9_405 = arith.constant 9 : index
    %c1_406 = arith.constant 1 : index
    %210 = vector.load %arg1[%c0_403, %c0_404, %c9_405, %c1_406] : memref<1x1x16x16xf32, #tpu.memory_space<vmem>>, vector<1x1x1x14xf32>
    %211 = vector.shape_cast %210 : vector<1x1x1x14xf32> to vector<1x14xf32>
    %c7_407 = arith.constant 7 : index
    %c98_408 = arith.constant 98 : index
    %212 = vector.load %arg9[%c7_407, %c98_408] : memref<9x196xf32, #tpu.memory_space<vmem>>, vector<1x14xf32>
    tpu.vector_store %arg9[%c7_407, %c98_408], %211 {strides = array<i32>} : memref<9x196xf32, #tpu.memory_space<vmem>>, vector<1x14xf32>,
    %c0_409 = arith.constant 0 : index
    %c0_410 = arith.constant 0 : index
    %c9_411 = arith.constant 9 : index
    %c2_412 = arith.constant 2 : index
    %213 = vector.load %arg1[%c0_409, %c0_410, %c9_411, %c2_412] : memref<1x1x16x16xf32, #tpu.memory_space<vmem>>, vector<1x1x1x14xf32>
    %214 = vector.shape_cast %213 : vector<1x1x1x14xf32> to vector<1x14xf32>
    %c8_413 = arith.constant 8 : index
    %c98_414 = arith.constant 98 : index
    %215 = vector.load %arg9[%c8_413, %c98_414] : memref<9x196xf32, #tpu.memory_space<vmem>>, vector<1x14xf32>
    tpu.vector_store %arg9[%c8_413, %c98_414], %214 {strides = array<i32>} : memref<9x196xf32, #tpu.memory_space<vmem>>, vector<1x14xf32>,
    %c0_415 = arith.constant 0 : index
    %c0_416 = arith.constant 0 : index
    %c8_417 = arith.constant 8 : index
    %c0_418 = arith.constant 0 : index
    %216 = vector.load %arg1[%c0_415, %c0_416, %c8_417, %c0_418] : memref<1x1x16x16xf32, #tpu.memory_space<vmem>>, vector<1x1x1x14xf32>
    %217 = vector.shape_cast %216 : vector<1x1x1x14xf32> to vector<1x14xf32>
    %c0_419 = arith.constant 0 : index
    %c112 = arith.constant 112 : index
    %218 = vector.load %arg9[%c0_419, %c112] : memref<9x196xf32, #tpu.memory_space<vmem>>, vector<1x14xf32>
    tpu.vector_store %arg9[%c0_419, %c112], %217 {strides = array<i32>} : memref<9x196xf32, #tpu.memory_space<vmem>>, vector<1x14xf32>,
    %c0_420 = arith.constant 0 : index
    %c0_421 = arith.constant 0 : index
    %c8_422 = arith.constant 8 : index
    %c1_423 = arith.constant 1 : index
    %219 = vector.load %arg1[%c0_420, %c0_421, %c8_422, %c1_423] : memref<1x1x16x16xf32, #tpu.memory_space<vmem>>, vector<1x1x1x14xf32>
    %220 = vector.shape_cast %219 : vector<1x1x1x14xf32> to vector<1x14xf32>
    %c1_424 = arith.constant 1 : index
    %c112_425 = arith.constant 112 : index
    %221 = vector.load %arg9[%c1_424, %c112_425] : memref<9x196xf32, #tpu.memory_space<vmem>>, vector<1x14xf32>
    tpu.vector_store %arg9[%c1_424, %c112_425], %220 {strides = array<i32>} : memref<9x196xf32, #tpu.memory_space<vmem>>, vector<1x14xf32>,
    %c0_426 = arith.constant 0 : index
    %c0_427 = arith.constant 0 : index
    %c8_428 = arith.constant 8 : index
    %c2_429 = arith.constant 2 : index
    %222 = vector.load %arg1[%c0_426, %c0_427, %c8_428, %c2_429] : memref<1x1x16x16xf32, #tpu.memory_space<vmem>>, vector<1x1x1x14xf32>
    %223 = vector.shape_cast %222 : vector<1x1x1x14xf32> to vector<1x14xf32>
    %c2_430 = arith.constant 2 : index
    %c112_431 = arith.constant 112 : index
    %224 = vector.load %arg9[%c2_430, %c112_431] : memref<9x196xf32, #tpu.memory_space<vmem>>, vector<1x14xf32>
    tpu.vector_store %arg9[%c2_430, %c112_431], %223 {strides = array<i32>} : memref<9x196xf32, #tpu.memory_space<vmem>>, vector<1x14xf32>,
    %c0_432 = arith.constant 0 : index
    %c0_433 = arith.constant 0 : index
    %c9_434 = arith.constant 9 : index
    %c0_435 = arith.constant 0 : index
    %225 = vector.load %arg1[%c0_432, %c0_433, %c9_434, %c0_435] : memref<1x1x16x16xf32, #tpu.memory_space<vmem>>, vector<1x1x1x14xf32>
    %226 = vector.shape_cast %225 : vector<1x1x1x14xf32> to vector<1x14xf32>
    %c3_436 = arith.constant 3 : index
    %c112_437 = arith.constant 112 : index
    %227 = vector.load %arg9[%c3_436, %c112_437] : memref<9x196xf32, #tpu.memory_space<vmem>>, vector<1x14xf32>
    tpu.vector_store %arg9[%c3_436, %c112_437], %226 {strides = array<i32>} : memref<9x196xf32, #tpu.memory_space<vmem>>, vector<1x14xf32>,
    %c0_438 = arith.constant 0 : index
    %c0_439 = arith.constant 0 : index
    %c9_440 = arith.constant 9 : index
    %c1_441 = arith.constant 1 : index
    %228 = vector.load %arg1[%c0_438, %c0_439, %c9_440, %c1_441] : memref<1x1x16x16xf32, #tpu.memory_space<vmem>>, vector<1x1x1x14xf32>
    %229 = vector.shape_cast %228 : vector<1x1x1x14xf32> to vector<1x14xf32>
    %c4_442 = arith.constant 4 : index
    %c112_443 = arith.constant 112 : index
    %230 = vector.load %arg9[%c4_442, %c112_443] : memref<9x196xf32, #tpu.memory_space<vmem>>, vector<1x14xf32>
    tpu.vector_store %arg9[%c4_442, %c112_443], %229 {strides = array<i32>} : memref<9x196xf32, #tpu.memory_space<vmem>>, vector<1x14xf32>,
    %c0_444 = arith.constant 0 : index
    %c0_445 = arith.constant 0 : index
    %c9_446 = arith.constant 9 : index
    %c2_447 = arith.constant 2 : index
    %231 = vector.load %arg1[%c0_444, %c0_445, %c9_446, %c2_447] : memref<1x1x16x16xf32, #tpu.memory_space<vmem>>, vector<1x1x1x14xf32>
    %232 = vector.shape_cast %231 : vector<1x1x1x14xf32> to vector<1x14xf32>
    %c5_448 = arith.constant 5 : index
    %c112_449 = arith.constant 112 : index
    %233 = vector.load %arg9[%c5_448, %c112_449] : memref<9x196xf32, #tpu.memory_space<vmem>>, vector<1x14xf32>
    tpu.vector_store %arg9[%c5_448, %c112_449], %232 {strides = array<i32>} : memref<9x196xf32, #tpu.memory_space<vmem>>, vector<1x14xf32>,
    %c0_450 = arith.constant 0 : index
    %c0_451 = arith.constant 0 : index
    %c10 = arith.constant 10 : index
    %c0_452 = arith.constant 0 : index
    %234 = vector.load %arg1[%c0_450, %c0_451, %c10, %c0_452] : memref<1x1x16x16xf32, #tpu.memory_space<vmem>>, vector<1x1x1x14xf32>
    %235 = vector.shape_cast %234 : vector<1x1x1x14xf32> to vector<1x14xf32>
    %c6_453 = arith.constant 6 : index
    %c112_454 = arith.constant 112 : index
    %236 = vector.load %arg9[%c6_453, %c112_454] : memref<9x196xf32, #tpu.memory_space<vmem>>, vector<1x14xf32>
    tpu.vector_store %arg9[%c6_453, %c112_454], %235 {strides = array<i32>} : memref<9x196xf32, #tpu.memory_space<vmem>>, vector<1x14xf32>,
    %c0_455 = arith.constant 0 : index
    %c0_456 = arith.constant 0 : index
    %c10_457 = arith.constant 10 : index
    %c1_458 = arith.constant 1 : index
    %237 = vector.load %arg1[%c0_455, %c0_456, %c10_457, %c1_458] : memref<1x1x16x16xf32, #tpu.memory_space<vmem>>, vector<1x1x1x14xf32>
    %238 = vector.shape_cast %237 : vector<1x1x1x14xf32> to vector<1x14xf32>
    %c7_459 = arith.constant 7 : index
    %c112_460 = arith.constant 112 : index
    %239 = vector.load %arg9[%c7_459, %c112_460] : memref<9x196xf32, #tpu.memory_space<vmem>>, vector<1x14xf32>
    tpu.vector_store %arg9[%c7_459, %c112_460], %238 {strides = array<i32>} : memref<9x196xf32, #tpu.memory_space<vmem>>, vector<1x14xf32>,
    %c0_461 = arith.constant 0 : index
    %c0_462 = arith.constant 0 : index
    %c10_463 = arith.constant 10 : index
    %c2_464 = arith.constant 2 : index
    %240 = vector.load %arg1[%c0_461, %c0_462, %c10_463, %c2_464] : memref<1x1x16x16xf32, #tpu.memory_space<vmem>>, vector<1x1x1x14xf32>
    %241 = vector.shape_cast %240 : vector<1x1x1x14xf32> to vector<1x14xf32>
    %c8_465 = arith.constant 8 : index
    %c112_466 = arith.constant 112 : index
    %242 = vector.load %arg9[%c8_465, %c112_466] : memref<9x196xf32, #tpu.memory_space<vmem>>, vector<1x14xf32>
    tpu.vector_store %arg9[%c8_465, %c112_466], %241 {strides = array<i32>} : memref<9x196xf32, #tpu.memory_space<vmem>>, vector<1x14xf32>,
    %c0_467 = arith.constant 0 : index
    %c0_468 = arith.constant 0 : index
    %c9_469 = arith.constant 9 : index
    %c0_470 = arith.constant 0 : index
    %243 = vector.load %arg1[%c0_467, %c0_468, %c9_469, %c0_470] : memref<1x1x16x16xf32, #tpu.memory_space<vmem>>, vector<1x1x1x14xf32>
    %244 = vector.shape_cast %243 : vector<1x1x1x14xf32> to vector<1x14xf32>
    %c0_471 = arith.constant 0 : index
    %c126 = arith.constant 126 : index
    %245 = vector.load %arg9[%c0_471, %c126] : memref<9x196xf32, #tpu.memory_space<vmem>>, vector<1x14xf32>
    tpu.vector_store %arg9[%c0_471, %c126], %244 {strides = array<i32>} : memref<9x196xf32, #tpu.memory_space<vmem>>, vector<1x14xf32>,
    %c0_472 = arith.constant 0 : index
    %c0_473 = arith.constant 0 : index
    %c9_474 = arith.constant 9 : index
    %c1_475 = arith.constant 1 : index
    %246 = vector.load %arg1[%c0_472, %c0_473, %c9_474, %c1_475] : memref<1x1x16x16xf32, #tpu.memory_space<vmem>>, vector<1x1x1x14xf32>
    %247 = vector.shape_cast %246 : vector<1x1x1x14xf32> to vector<1x14xf32>
    %c1_476 = arith.constant 1 : index
    %c126_477 = arith.constant 126 : index
    %248 = vector.load %arg9[%c1_476, %c126_477] : memref<9x196xf32, #tpu.memory_space<vmem>>, vector<1x14xf32>
    tpu.vector_store %arg9[%c1_476, %c126_477], %247 {strides = array<i32>} : memref<9x196xf32, #tpu.memory_space<vmem>>, vector<1x14xf32>,
    %c0_478 = arith.constant 0 : index
    %c0_479 = arith.constant 0 : index
    %c9_480 = arith.constant 9 : index
    %c2_481 = arith.constant 2 : index
    %249 = vector.load %arg1[%c0_478, %c0_479, %c9_480, %c2_481] : memref<1x1x16x16xf32, #tpu.memory_space<vmem>>, vector<1x1x1x14xf32>
    %250 = vector.shape_cast %249 : vector<1x1x1x14xf32> to vector<1x14xf32>
    %c2_482 = arith.constant 2 : index
    %c126_483 = arith.constant 126 : index
    %251 = vector.load %arg9[%c2_482, %c126_483] : memref<9x196xf32, #tpu.memory_space<vmem>>, vector<1x14xf32>
    tpu.vector_store %arg9[%c2_482, %c126_483], %250 {strides = array<i32>} : memref<9x196xf32, #tpu.memory_space<vmem>>, vector<1x14xf32>,
    %c0_484 = arith.constant 0 : index
    %c0_485 = arith.constant 0 : index
    %c10_486 = arith.constant 10 : index
    %c0_487 = arith.constant 0 : index
    %252 = vector.load %arg1[%c0_484, %c0_485, %c10_486, %c0_487] : memref<1x1x16x16xf32, #tpu.memory_space<vmem>>, vector<1x1x1x14xf32>
    %253 = vector.shape_cast %252 : vector<1x1x1x14xf32> to vector<1x14xf32>
    %c3_488 = arith.constant 3 : index
    %c126_489 = arith.constant 126 : index
    %254 = vector.load %arg9[%c3_488, %c126_489] : memref<9x196xf32, #tpu.memory_space<vmem>>, vector<1x14xf32>
    tpu.vector_store %arg9[%c3_488, %c126_489], %253 {strides = array<i32>} : memref<9x196xf32, #tpu.memory_space<vmem>>, vector<1x14xf32>,
    %c0_490 = arith.constant 0 : index
    %c0_491 = arith.constant 0 : index
    %c10_492 = arith.constant 10 : index
    %c1_493 = arith.constant 1 : index
    %255 = vector.load %arg1[%c0_490, %c0_491, %c10_492, %c1_493] : memref<1x1x16x16xf32, #tpu.memory_space<vmem>>, vector<1x1x1x14xf32>
    %256 = vector.shape_cast %255 : vector<1x1x1x14xf32> to vector<1x14xf32>
    %c4_494 = arith.constant 4 : index
    %c126_495 = arith.constant 126 : index
    %257 = vector.load %arg9[%c4_494, %c126_495] : memref<9x196xf32, #tpu.memory_space<vmem>>, vector<1x14xf32>
    tpu.vector_store %arg9[%c4_494, %c126_495], %256 {strides = array<i32>} : memref<9x196xf32, #tpu.memory_space<vmem>>, vector<1x14xf32>,
    %c0_496 = arith.constant 0 : index
    %c0_497 = arith.constant 0 : index
    %c10_498 = arith.constant 10 : index
    %c2_499 = arith.constant 2 : index
    %258 = vector.load %arg1[%c0_496, %c0_497, %c10_498, %c2_499] : memref<1x1x16x16xf32, #tpu.memory_space<vmem>>, vector<1x1x1x14xf32>
    %259 = vector.shape_cast %258 : vector<1x1x1x14xf32> to vector<1x14xf32>
    %c5_500 = arith.constant 5 : index
    %c126_501 = arith.constant 126 : index
    %260 = vector.load %arg9[%c5_500, %c126_501] : memref<9x196xf32, #tpu.memory_space<vmem>>, vector<1x14xf32>
    tpu.vector_store %arg9[%c5_500, %c126_501], %259 {strides = array<i32>} : memref<9x196xf32, #tpu.memory_space<vmem>>, vector<1x14xf32>,
    %c0_502 = arith.constant 0 : index
    %c0_503 = arith.constant 0 : index
    %c11 = arith.constant 11 : index
    %c0_504 = arith.constant 0 : index
    %261 = vector.load %arg1[%c0_502, %c0_503, %c11, %c0_504] : memref<1x1x16x16xf32, #tpu.memory_space<vmem>>, vector<1x1x1x14xf32>
    %262 = vector.shape_cast %261 : vector<1x1x1x14xf32> to vector<1x14xf32>
    %c6_505 = arith.constant 6 : index
    %c126_506 = arith.constant 126 : index
    %263 = vector.load %arg9[%c6_505, %c126_506] : memref<9x196xf32, #tpu.memory_space<vmem>>, vector<1x14xf32>
    tpu.vector_store %arg9[%c6_505, %c126_506], %262 {strides = array<i32>} : memref<9x196xf32, #tpu.memory_space<vmem>>, vector<1x14xf32>,
    %c0_507 = arith.constant 0 : index
    %c0_508 = arith.constant 0 : index
    %c11_509 = arith.constant 11 : index
    %c1_510 = arith.constant 1 : index
    %264 = vector.load %arg1[%c0_507, %c0_508, %c11_509, %c1_510] : memref<1x1x16x16xf32, #tpu.memory_space<vmem>>, vector<1x1x1x14xf32>
    %265 = vector.shape_cast %264 : vector<1x1x1x14xf32> to vector<1x14xf32>
    %c7_511 = arith.constant 7 : index
    %c126_512 = arith.constant 126 : index
    %266 = vector.load %arg9[%c7_511, %c126_512] : memref<9x196xf32, #tpu.memory_space<vmem>>, vector<1x14xf32>
    tpu.vector_store %arg9[%c7_511, %c126_512], %265 {strides = array<i32>} : memref<9x196xf32, #tpu.memory_space<vmem>>, vector<1x14xf32>,
    %c0_513 = arith.constant 0 : index
    %c0_514 = arith.constant 0 : index
    %c11_515 = arith.constant 11 : index
    %c2_516 = arith.constant 2 : index
    %267 = vector.load %arg1[%c0_513, %c0_514, %c11_515, %c2_516] : memref<1x1x16x16xf32, #tpu.memory_space<vmem>>, vector<1x1x1x14xf32>
    %268 = vector.shape_cast %267 : vector<1x1x1x14xf32> to vector<1x14xf32>
    %c8_517 = arith.constant 8 : index
    %c126_518 = arith.constant 126 : index
    %269 = vector.load %arg9[%c8_517, %c126_518] : memref<9x196xf32, #tpu.memory_space<vmem>>, vector<1x14xf32>
    tpu.vector_store %arg9[%c8_517, %c126_518], %268 {strides = array<i32>} : memref<9x196xf32, #tpu.memory_space<vmem>>, vector<1x14xf32>,
    %c0_519 = arith.constant 0 : index
    %c0_520 = arith.constant 0 : index
    %c10_521 = arith.constant 10 : index
    %c0_522 = arith.constant 0 : index
    %270 = vector.load %arg1[%c0_519, %c0_520, %c10_521, %c0_522] : memref<1x1x16x16xf32, #tpu.memory_space<vmem>>, vector<1x1x1x14xf32>
    %271 = vector.shape_cast %270 : vector<1x1x1x14xf32> to vector<1x14xf32>
    %c0_523 = arith.constant 0 : index
    %c140 = arith.constant 140 : index
    %272 = vector.load %arg9[%c0_523, %c140] : memref<9x196xf32, #tpu.memory_space<vmem>>, vector<1x14xf32>
    tpu.vector_store %arg9[%c0_523, %c140], %271 {strides = array<i32>} : memref<9x196xf32, #tpu.memory_space<vmem>>, vector<1x14xf32>,
    %c0_524 = arith.constant 0 : index
    %c0_525 = arith.constant 0 : index
    %c10_526 = arith.constant 10 : index
    %c1_527 = arith.constant 1 : index
    %273 = vector.load %arg1[%c0_524, %c0_525, %c10_526, %c1_527] : memref<1x1x16x16xf32, #tpu.memory_space<vmem>>, vector<1x1x1x14xf32>
    %274 = vector.shape_cast %273 : vector<1x1x1x14xf32> to vector<1x14xf32>
    %c1_528 = arith.constant 1 : index
    %c140_529 = arith.constant 140 : index
    %275 = vector.load %arg9[%c1_528, %c140_529] : memref<9x196xf32, #tpu.memory_space<vmem>>, vector<1x14xf32>
    tpu.vector_store %arg9[%c1_528, %c140_529], %274 {strides = array<i32>} : memref<9x196xf32, #tpu.memory_space<vmem>>, vector<1x14xf32>,
    %c0_530 = arith.constant 0 : index
    %c0_531 = arith.constant 0 : index
    %c10_532 = arith.constant 10 : index
    %c2_533 = arith.constant 2 : index
    %276 = vector.load %arg1[%c0_530, %c0_531, %c10_532, %c2_533] : memref<1x1x16x16xf32, #tpu.memory_space<vmem>>, vector<1x1x1x14xf32>
    %277 = vector.shape_cast %276 : vector<1x1x1x14xf32> to vector<1x14xf32>
    %c2_534 = arith.constant 2 : index
    %c140_535 = arith.constant 140 : index
    %278 = vector.load %arg9[%c2_534, %c140_535] : memref<9x196xf32, #tpu.memory_space<vmem>>, vector<1x14xf32>
    tpu.vector_store %arg9[%c2_534, %c140_535], %277 {strides = array<i32>} : memref<9x196xf32, #tpu.memory_space<vmem>>, vector<1x14xf32>,
    %c0_536 = arith.constant 0 : index
    %c0_537 = arith.constant 0 : index
    %c11_538 = arith.constant 11 : index
    %c0_539 = arith.constant 0 : index
    %279 = vector.load %arg1[%c0_536, %c0_537, %c11_538, %c0_539] : memref<1x1x16x16xf32, #tpu.memory_space<vmem>>, vector<1x1x1x14xf32>
    %280 = vector.shape_cast %279 : vector<1x1x1x14xf32> to vector<1x14xf32>
    %c3_540 = arith.constant 3 : index
    %c140_541 = arith.constant 140 : index
    %281 = vector.load %arg9[%c3_540, %c140_541] : memref<9x196xf32, #tpu.memory_space<vmem>>, vector<1x14xf32>
    tpu.vector_store %arg9[%c3_540, %c140_541], %280 {strides = array<i32>} : memref<9x196xf32, #tpu.memory_space<vmem>>, vector<1x14xf32>,
    %c0_542 = arith.constant 0 : index
    %c0_543 = arith.constant 0 : index
    %c11_544 = arith.constant 11 : index
    %c1_545 = arith.constant 1 : index
    %282 = vector.load %arg1[%c0_542, %c0_543, %c11_544, %c1_545] : memref<1x1x16x16xf32, #tpu.memory_space<vmem>>, vector<1x1x1x14xf32>
    %283 = vector.shape_cast %282 : vector<1x1x1x14xf32> to vector<1x14xf32>
    %c4_546 = arith.constant 4 : index
    %c140_547 = arith.constant 140 : index
    %284 = vector.load %arg9[%c4_546, %c140_547] : memref<9x196xf32, #tpu.memory_space<vmem>>, vector<1x14xf32>
    tpu.vector_store %arg9[%c4_546, %c140_547], %283 {strides = array<i32>} : memref<9x196xf32, #tpu.memory_space<vmem>>, vector<1x14xf32>,
    %c0_548 = arith.constant 0 : index
    %c0_549 = arith.constant 0 : index
    %c11_550 = arith.constant 11 : index
    %c2_551 = arith.constant 2 : index
    %285 = vector.load %arg1[%c0_548, %c0_549, %c11_550, %c2_551] : memref<1x1x16x16xf32, #tpu.memory_space<vmem>>, vector<1x1x1x14xf32>
    %286 = vector.shape_cast %285 : vector<1x1x1x14xf32> to vector<1x14xf32>
    %c5_552 = arith.constant 5 : index
    %c140_553 = arith.constant 140 : index
    %287 = vector.load %arg9[%c5_552, %c140_553] : memref<9x196xf32, #tpu.memory_space<vmem>>, vector<1x14xf32>
    tpu.vector_store %arg9[%c5_552, %c140_553], %286 {strides = array<i32>} : memref<9x196xf32, #tpu.memory_space<vmem>>, vector<1x14xf32>,
    %c0_554 = arith.constant 0 : index
    %c0_555 = arith.constant 0 : index
    %c12 = arith.constant 12 : index
    %c0_556 = arith.constant 0 : index
    %288 = vector.load %arg1[%c0_554, %c0_555, %c12, %c0_556] : memref<1x1x16x16xf32, #tpu.memory_space<vmem>>, vector<1x1x1x14xf32>
    %289 = vector.shape_cast %288 : vector<1x1x1x14xf32> to vector<1x14xf32>
    %c6_557 = arith.constant 6 : index
    %c140_558 = arith.constant 140 : index
    %290 = vector.load %arg9[%c6_557, %c140_558] : memref<9x196xf32, #tpu.memory_space<vmem>>, vector<1x14xf32>
    tpu.vector_store %arg9[%c6_557, %c140_558], %289 {strides = array<i32>} : memref<9x196xf32, #tpu.memory_space<vmem>>, vector<1x14xf32>,
    %c0_559 = arith.constant 0 : index
    %c0_560 = arith.constant 0 : index
    %c12_561 = arith.constant 12 : index
    %c1_562 = arith.constant 1 : index
    %291 = vector.load %arg1[%c0_559, %c0_560, %c12_561, %c1_562] : memref<1x1x16x16xf32, #tpu.memory_space<vmem>>, vector<1x1x1x14xf32>
    %292 = vector.shape_cast %291 : vector<1x1x1x14xf32> to vector<1x14xf32>
    %c7_563 = arith.constant 7 : index
    %c140_564 = arith.constant 140 : index
    %293 = vector.load %arg9[%c7_563, %c140_564] : memref<9x196xf32, #tpu.memory_space<vmem>>, vector<1x14xf32>
    tpu.vector_store %arg9[%c7_563, %c140_564], %292 {strides = array<i32>} : memref<9x196xf32, #tpu.memory_space<vmem>>, vector<1x14xf32>,
    %c0_565 = arith.constant 0 : index
    %c0_566 = arith.constant 0 : index
    %c12_567 = arith.constant 12 : index
    %c2_568 = arith.constant 2 : index
    %294 = vector.load %arg1[%c0_565, %c0_566, %c12_567, %c2_568] : memref<1x1x16x16xf32, #tpu.memory_space<vmem>>, vector<1x1x1x14xf32>
    %295 = vector.shape_cast %294 : vector<1x1x1x14xf32> to vector<1x14xf32>
    %c8_569 = arith.constant 8 : index
    %c140_570 = arith.constant 140 : index
    %296 = vector.load %arg9[%c8_569, %c140_570] : memref<9x196xf32, #tpu.memory_space<vmem>>, vector<1x14xf32>
    tpu.vector_store %arg9[%c8_569, %c140_570], %295 {strides = array<i32>} : memref<9x196xf32, #tpu.memory_space<vmem>>, vector<1x14xf32>,
    %c0_571 = arith.constant 0 : index
    %c0_572 = arith.constant 0 : index
    %c11_573 = arith.constant 11 : index
    %c0_574 = arith.constant 0 : index
    %297 = vector.load %arg1[%c0_571, %c0_572, %c11_573, %c0_574] : memref<1x1x16x16xf32, #tpu.memory_space<vmem>>, vector<1x1x1x14xf32>
    %298 = vector.shape_cast %297 : vector<1x1x1x14xf32> to vector<1x14xf32>
    %c0_575 = arith.constant 0 : index
    %c154 = arith.constant 154 : index
    %299 = vector.load %arg9[%c0_575, %c154] : memref<9x196xf32, #tpu.memory_space<vmem>>, vector<1x14xf32>
    tpu.vector_store %arg9[%c0_575, %c154], %298 {strides = array<i32>} : memref<9x196xf32, #tpu.memory_space<vmem>>, vector<1x14xf32>,
    %c0_576 = arith.constant 0 : index
    %c0_577 = arith.constant 0 : index
    %c11_578 = arith.constant 11 : index
    %c1_579 = arith.constant 1 : index
    %300 = vector.load %arg1[%c0_576, %c0_577, %c11_578, %c1_579] : memref<1x1x16x16xf32, #tpu.memory_space<vmem>>, vector<1x1x1x14xf32>
    %301 = vector.shape_cast %300 : vector<1x1x1x14xf32> to vector<1x14xf32>
    %c1_580 = arith.constant 1 : index
    %c154_581 = arith.constant 154 : index
    %302 = vector.load %arg9[%c1_580, %c154_581] : memref<9x196xf32, #tpu.memory_space<vmem>>, vector<1x14xf32>
    tpu.vector_store %arg9[%c1_580, %c154_581], %301 {strides = array<i32>} : memref<9x196xf32, #tpu.memory_space<vmem>>, vector<1x14xf32>,
    %c0_582 = arith.constant 0 : index
    %c0_583 = arith.constant 0 : index
    %c11_584 = arith.constant 11 : index
    %c2_585 = arith.constant 2 : index
    %303 = vector.load %arg1[%c0_582, %c0_583, %c11_584, %c2_585] : memref<1x1x16x16xf32, #tpu.memory_space<vmem>>, vector<1x1x1x14xf32>
    %304 = vector.shape_cast %303 : vector<1x1x1x14xf32> to vector<1x14xf32>
    %c2_586 = arith.constant 2 : index
    %c154_587 = arith.constant 154 : index
    %305 = vector.load %arg9[%c2_586, %c154_587] : memref<9x196xf32, #tpu.memory_space<vmem>>, vector<1x14xf32>
    tpu.vector_store %arg9[%c2_586, %c154_587], %304 {strides = array<i32>} : memref<9x196xf32, #tpu.memory_space<vmem>>, vector<1x14xf32>,
    %c0_588 = arith.constant 0 : index
    %c0_589 = arith.constant 0 : index
    %c12_590 = arith.constant 12 : index
    %c0_591 = arith.constant 0 : index
    %306 = vector.load %arg1[%c0_588, %c0_589, %c12_590, %c0_591] : memref<1x1x16x16xf32, #tpu.memory_space<vmem>>, vector<1x1x1x14xf32>
    %307 = vector.shape_cast %306 : vector<1x1x1x14xf32> to vector<1x14xf32>
    %c3_592 = arith.constant 3 : index
    %c154_593 = arith.constant 154 : index
    %308 = vector.load %arg9[%c3_592, %c154_593] : memref<9x196xf32, #tpu.memory_space<vmem>>, vector<1x14xf32>
    tpu.vector_store %arg9[%c3_592, %c154_593], %307 {strides = array<i32>} : memref<9x196xf32, #tpu.memory_space<vmem>>, vector<1x14xf32>,
    %c0_594 = arith.constant 0 : index
    %c0_595 = arith.constant 0 : index
    %c12_596 = arith.constant 12 : index
    %c1_597 = arith.constant 1 : index
    %309 = vector.load %arg1[%c0_594, %c0_595, %c12_596, %c1_597] : memref<1x1x16x16xf32, #tpu.memory_space<vmem>>, vector<1x1x1x14xf32>
    %310 = vector.shape_cast %309 : vector<1x1x1x14xf32> to vector<1x14xf32>
    %c4_598 = arith.constant 4 : index
    %c154_599 = arith.constant 154 : index
    %311 = vector.load %arg9[%c4_598, %c154_599] : memref<9x196xf32, #tpu.memory_space<vmem>>, vector<1x14xf32>
    tpu.vector_store %arg9[%c4_598, %c154_599], %310 {strides = array<i32>} : memref<9x196xf32, #tpu.memory_space<vmem>>, vector<1x14xf32>,
    %c0_600 = arith.constant 0 : index
    %c0_601 = arith.constant 0 : index
    %c12_602 = arith.constant 12 : index
    %c2_603 = arith.constant 2 : index
    %312 = vector.load %arg1[%c0_600, %c0_601, %c12_602, %c2_603] : memref<1x1x16x16xf32, #tpu.memory_space<vmem>>, vector<1x1x1x14xf32>
    %313 = vector.shape_cast %312 : vector<1x1x1x14xf32> to vector<1x14xf32>
    %c5_604 = arith.constant 5 : index
    %c154_605 = arith.constant 154 : index
    %314 = vector.load %arg9[%c5_604, %c154_605] : memref<9x196xf32, #tpu.memory_space<vmem>>, vector<1x14xf32>
    tpu.vector_store %arg9[%c5_604, %c154_605], %313 {strides = array<i32>} : memref<9x196xf32, #tpu.memory_space<vmem>>, vector<1x14xf32>,
    %c0_606 = arith.constant 0 : index
    %c0_607 = arith.constant 0 : index
    %c13 = arith.constant 13 : index
    %c0_608 = arith.constant 0 : index
    %315 = vector.load %arg1[%c0_606, %c0_607, %c13, %c0_608] : memref<1x1x16x16xf32, #tpu.memory_space<vmem>>, vector<1x1x1x14xf32>
    %316 = vector.shape_cast %315 : vector<1x1x1x14xf32> to vector<1x14xf32>
    %c6_609 = arith.constant 6 : index
    %c154_610 = arith.constant 154 : index
    %317 = vector.load %arg9[%c6_609, %c154_610] : memref<9x196xf32, #tpu.memory_space<vmem>>, vector<1x14xf32>
    tpu.vector_store %arg9[%c6_609, %c154_610], %316 {strides = array<i32>} : memref<9x196xf32, #tpu.memory_space<vmem>>, vector<1x14xf32>,
    %c0_611 = arith.constant 0 : index
    %c0_612 = arith.constant 0 : index
    %c13_613 = arith.constant 13 : index
    %c1_614 = arith.constant 1 : index
    %318 = vector.load %arg1[%c0_611, %c0_612, %c13_613, %c1_614] : memref<1x1x16x16xf32, #tpu.memory_space<vmem>>, vector<1x1x1x14xf32>
    %319 = vector.shape_cast %318 : vector<1x1x1x14xf32> to vector<1x14xf32>
    %c7_615 = arith.constant 7 : index
    %c154_616 = arith.constant 154 : index
    %320 = vector.load %arg9[%c7_615, %c154_616] : memref<9x196xf32, #tpu.memory_space<vmem>>, vector<1x14xf32>
    tpu.vector_store %arg9[%c7_615, %c154_616], %319 {strides = array<i32>} : memref<9x196xf32, #tpu.memory_space<vmem>>, vector<1x14xf32>,
    %c0_617 = arith.constant 0 : index
    %c0_618 = arith.constant 0 : index
    %c13_619 = arith.constant 13 : index
    %c2_620 = arith.constant 2 : index
    %321 = vector.load %arg1[%c0_617, %c0_618, %c13_619, %c2_620] : memref<1x1x16x16xf32, #tpu.memory_space<vmem>>, vector<1x1x1x14xf32>
    %322 = vector.shape_cast %321 : vector<1x1x1x14xf32> to vector<1x14xf32>
    %c8_621 = arith.constant 8 : index
    %c154_622 = arith.constant 154 : index
    %323 = vector.load %arg9[%c8_621, %c154_622] : memref<9x196xf32, #tpu.memory_space<vmem>>, vector<1x14xf32>
    tpu.vector_store %arg9[%c8_621, %c154_622], %322 {strides = array<i32>} : memref<9x196xf32, #tpu.memory_space<vmem>>, vector<1x14xf32>,
    %c0_623 = arith.constant 0 : index
    %c0_624 = arith.constant 0 : index
    %c12_625 = arith.constant 12 : index
    %c0_626 = arith.constant 0 : index
    %324 = vector.load %arg1[%c0_623, %c0_624, %c12_625, %c0_626] : memref<1x1x16x16xf32, #tpu.memory_space<vmem>>, vector<1x1x1x14xf32>
    %325 = vector.shape_cast %324 : vector<1x1x1x14xf32> to vector<1x14xf32>
    %c0_627 = arith.constant 0 : index
    %c168 = arith.constant 168 : index
    %326 = vector.load %arg9[%c0_627, %c168] : memref<9x196xf32, #tpu.memory_space<vmem>>, vector<1x14xf32>
    tpu.vector_store %arg9[%c0_627, %c168], %325 {strides = array<i32>} : memref<9x196xf32, #tpu.memory_space<vmem>>, vector<1x14xf32>,
    %c0_628 = arith.constant 0 : index
    %c0_629 = arith.constant 0 : index
    %c12_630 = arith.constant 12 : index
    %c1_631 = arith.constant 1 : index
    %327 = vector.load %arg1[%c0_628, %c0_629, %c12_630, %c1_631] : memref<1x1x16x16xf32, #tpu.memory_space<vmem>>, vector<1x1x1x14xf32>
    %328 = vector.shape_cast %327 : vector<1x1x1x14xf32> to vector<1x14xf32>
    %c1_632 = arith.constant 1 : index
    %c168_633 = arith.constant 168 : index
    %329 = vector.load %arg9[%c1_632, %c168_633] : memref<9x196xf32, #tpu.memory_space<vmem>>, vector<1x14xf32>
    tpu.vector_store %arg9[%c1_632, %c168_633], %328 {strides = array<i32>} : memref<9x196xf32, #tpu.memory_space<vmem>>, vector<1x14xf32>,
    %c0_634 = arith.constant 0 : index
    %c0_635 = arith.constant 0 : index
    %c12_636 = arith.constant 12 : index
    %c2_637 = arith.constant 2 : index
    %330 = vector.load %arg1[%c0_634, %c0_635, %c12_636, %c2_637] : memref<1x1x16x16xf32, #tpu.memory_space<vmem>>, vector<1x1x1x14xf32>
    %331 = vector.shape_cast %330 : vector<1x1x1x14xf32> to vector<1x14xf32>
    %c2_638 = arith.constant 2 : index
    %c168_639 = arith.constant 168 : index
    %332 = vector.load %arg9[%c2_638, %c168_639] : memref<9x196xf32, #tpu.memory_space<vmem>>, vector<1x14xf32>
    tpu.vector_store %arg9[%c2_638, %c168_639], %331 {strides = array<i32>} : memref<9x196xf32, #tpu.memory_space<vmem>>, vector<1x14xf32>,
    %c0_640 = arith.constant 0 : index
    %c0_641 = arith.constant 0 : index
    %c13_642 = arith.constant 13 : index
    %c0_643 = arith.constant 0 : index
    %333 = vector.load %arg1[%c0_640, %c0_641, %c13_642, %c0_643] : memref<1x1x16x16xf32, #tpu.memory_space<vmem>>, vector<1x1x1x14xf32>
    %334 = vector.shape_cast %333 : vector<1x1x1x14xf32> to vector<1x14xf32>
    %c3_644 = arith.constant 3 : index
    %c168_645 = arith.constant 168 : index
    %335 = vector.load %arg9[%c3_644, %c168_645] : memref<9x196xf32, #tpu.memory_space<vmem>>, vector<1x14xf32>
    tpu.vector_store %arg9[%c3_644, %c168_645], %334 {strides = array<i32>} : memref<9x196xf32, #tpu.memory_space<vmem>>, vector<1x14xf32>,
    %c0_646 = arith.constant 0 : index
    %c0_647 = arith.constant 0 : index
    %c13_648 = arith.constant 13 : index
    %c1_649 = arith.constant 1 : index
    %336 = vector.load %arg1[%c0_646, %c0_647, %c13_648, %c1_649] : memref<1x1x16x16xf32, #tpu.memory_space<vmem>>, vector<1x1x1x14xf32>
    %337 = vector.shape_cast %336 : vector<1x1x1x14xf32> to vector<1x14xf32>
    %c4_650 = arith.constant 4 : index
    %c168_651 = arith.constant 168 : index
    %338 = vector.load %arg9[%c4_650, %c168_651] : memref<9x196xf32, #tpu.memory_space<vmem>>, vector<1x14xf32>
    tpu.vector_store %arg9[%c4_650, %c168_651], %337 {strides = array<i32>} : memref<9x196xf32, #tpu.memory_space<vmem>>, vector<1x14xf32>,
    %c0_652 = arith.constant 0 : index
    %c0_653 = arith.constant 0 : index
    %c13_654 = arith.constant 13 : index
    %c2_655 = arith.constant 2 : index
    %339 = vector.load %arg1[%c0_652, %c0_653, %c13_654, %c2_655] : memref<1x1x16x16xf32, #tpu.memory_space<vmem>>, vector<1x1x1x14xf32>
    %340 = vector.shape_cast %339 : vector<1x1x1x14xf32> to vector<1x14xf32>
    %c5_656 = arith.constant 5 : index
    %c168_657 = arith.constant 168 : index
    %341 = vector.load %arg9[%c5_656, %c168_657] : memref<9x196xf32, #tpu.memory_space<vmem>>, vector<1x14xf32>
    tpu.vector_store %arg9[%c5_656, %c168_657], %340 {strides = array<i32>} : memref<9x196xf32, #tpu.memory_space<vmem>>, vector<1x14xf32>,
    %c0_658 = arith.constant 0 : index
    %c0_659 = arith.constant 0 : index
    %c14_660 = arith.constant 14 : index
    %c0_661 = arith.constant 0 : index
    %342 = vector.load %arg1[%c0_658, %c0_659, %c14_660, %c0_661] : memref<1x1x16x16xf32, #tpu.memory_space<vmem>>, vector<1x1x1x14xf32>
    %343 = vector.shape_cast %342 : vector<1x1x1x14xf32> to vector<1x14xf32>
    %c6_662 = arith.constant 6 : index
    %c168_663 = arith.constant 168 : index
    %344 = vector.load %arg9[%c6_662, %c168_663] : memref<9x196xf32, #tpu.memory_space<vmem>>, vector<1x14xf32>
    tpu.vector_store %arg9[%c6_662, %c168_663], %343 {strides = array<i32>} : memref<9x196xf32, #tpu.memory_space<vmem>>, vector<1x14xf32>,
    %c0_664 = arith.constant 0 : index
    %c0_665 = arith.constant 0 : index
    %c14_666 = arith.constant 14 : index
    %c1_667 = arith.constant 1 : index
    %345 = vector.load %arg1[%c0_664, %c0_665, %c14_666, %c1_667] : memref<1x1x16x16xf32, #tpu.memory_space<vmem>>, vector<1x1x1x14xf32>
    %346 = vector.shape_cast %345 : vector<1x1x1x14xf32> to vector<1x14xf32>
    %c7_668 = arith.constant 7 : index
    %c168_669 = arith.constant 168 : index
    %347 = vector.load %arg9[%c7_668, %c168_669] : memref<9x196xf32, #tpu.memory_space<vmem>>, vector<1x14xf32>
    tpu.vector_store %arg9[%c7_668, %c168_669], %346 {strides = array<i32>} : memref<9x196xf32, #tpu.memory_space<vmem>>, vector<1x14xf32>,
    %c0_670 = arith.constant 0 : index
    %c0_671 = arith.constant 0 : index
    %c14_672 = arith.constant 14 : index
    %c2_673 = arith.constant 2 : index
    %348 = vector.load %arg1[%c0_670, %c0_671, %c14_672, %c2_673] : memref<1x1x16x16xf32, #tpu.memory_space<vmem>>, vector<1x1x1x14xf32>
    %349 = vector.shape_cast %348 : vector<1x1x1x14xf32> to vector<1x14xf32>
    %c8_674 = arith.constant 8 : index
    %c168_675 = arith.constant 168 : index
    %350 = vector.load %arg9[%c8_674, %c168_675] : memref<9x196xf32, #tpu.memory_space<vmem>>, vector<1x14xf32>
    tpu.vector_store %arg9[%c8_674, %c168_675], %349 {strides = array<i32>} : memref<9x196xf32, #tpu.memory_space<vmem>>, vector<1x14xf32>,
    %c0_676 = arith.constant 0 : index
    %c0_677 = arith.constant 0 : index
    %c13_678 = arith.constant 13 : index
    %c0_679 = arith.constant 0 : index
    %351 = vector.load %arg1[%c0_676, %c0_677, %c13_678, %c0_679] : memref<1x1x16x16xf32, #tpu.memory_space<vmem>>, vector<1x1x1x14xf32>
    %352 = vector.shape_cast %351 : vector<1x1x1x14xf32> to vector<1x14xf32>
    %c0_680 = arith.constant 0 : index
    %c182 = arith.constant 182 : index
    %353 = vector.load %arg9[%c0_680, %c182] : memref<9x196xf32, #tpu.memory_space<vmem>>, vector<1x14xf32>
    tpu.vector_store %arg9[%c0_680, %c182], %352 {strides = array<i32>} : memref<9x196xf32, #tpu.memory_space<vmem>>, vector<1x14xf32>,
    %c0_681 = arith.constant 0 : index
    %c0_682 = arith.constant 0 : index
    %c13_683 = arith.constant 13 : index
    %c1_684 = arith.constant 1 : index
    %354 = vector.load %arg1[%c0_681, %c0_682, %c13_683, %c1_684] : memref<1x1x16x16xf32, #tpu.memory_space<vmem>>, vector<1x1x1x14xf32>
    %355 = vector.shape_cast %354 : vector<1x1x1x14xf32> to vector<1x14xf32>
    %c1_685 = arith.constant 1 : index
    %c182_686 = arith.constant 182 : index
    %356 = vector.load %arg9[%c1_685, %c182_686] : memref<9x196xf32, #tpu.memory_space<vmem>>, vector<1x14xf32>
    tpu.vector_store %arg9[%c1_685, %c182_686], %355 {strides = array<i32>} : memref<9x196xf32, #tpu.memory_space<vmem>>, vector<1x14xf32>,
    %c0_687 = arith.constant 0 : index
    %c0_688 = arith.constant 0 : index
    %c13_689 = arith.constant 13 : index
    %c2_690 = arith.constant 2 : index
    %357 = vector.load %arg1[%c0_687, %c0_688, %c13_689, %c2_690] : memref<1x1x16x16xf32, #tpu.memory_space<vmem>>, vector<1x1x1x14xf32>
    %358 = vector.shape_cast %357 : vector<1x1x1x14xf32> to vector<1x14xf32>
    %c2_691 = arith.constant 2 : index
    %c182_692 = arith.constant 182 : index
    %359 = vector.load %arg9[%c2_691, %c182_692] : memref<9x196xf32, #tpu.memory_space<vmem>>, vector<1x14xf32>
    tpu.vector_store %arg9[%c2_691, %c182_692], %358 {strides = array<i32>} : memref<9x196xf32, #tpu.memory_space<vmem>>, vector<1x14xf32>,
    %c0_693 = arith.constant 0 : index
    %c0_694 = arith.constant 0 : index
    %c14_695 = arith.constant 14 : index
    %c0_696 = arith.constant 0 : index
    %360 = vector.load %arg1[%c0_693, %c0_694, %c14_695, %c0_696] : memref<1x1x16x16xf32, #tpu.memory_space<vmem>>, vector<1x1x1x14xf32>
    %361 = vector.shape_cast %360 : vector<1x1x1x14xf32> to vector<1x14xf32>
    %c3_697 = arith.constant 3 : index
    %c182_698 = arith.constant 182 : index
    %362 = vector.load %arg9[%c3_697, %c182_698] : memref<9x196xf32, #tpu.memory_space<vmem>>, vector<1x14xf32>
    tpu.vector_store %arg9[%c3_697, %c182_698], %361 {strides = array<i32>} : memref<9x196xf32, #tpu.memory_space<vmem>>, vector<1x14xf32>,
    %c0_699 = arith.constant 0 : index
    %c0_700 = arith.constant 0 : index
    %c14_701 = arith.constant 14 : index
    %c1_702 = arith.constant 1 : index
    %363 = vector.load %arg1[%c0_699, %c0_700, %c14_701, %c1_702] : memref<1x1x16x16xf32, #tpu.memory_space<vmem>>, vector<1x1x1x14xf32>
    %364 = vector.shape_cast %363 : vector<1x1x1x14xf32> to vector<1x14xf32>
    %c4_703 = arith.constant 4 : index
    %c182_704 = arith.constant 182 : index
    %365 = vector.load %arg9[%c4_703, %c182_704] : memref<9x196xf32, #tpu.memory_space<vmem>>, vector<1x14xf32>
    tpu.vector_store %arg9[%c4_703, %c182_704], %364 {strides = array<i32>} : memref<9x196xf32, #tpu.memory_space<vmem>>, vector<1x14xf32>,
    %c0_705 = arith.constant 0 : index
    %c0_706 = arith.constant 0 : index
    %c14_707 = arith.constant 14 : index
    %c2_708 = arith.constant 2 : index
    %366 = vector.load %arg1[%c0_705, %c0_706, %c14_707, %c2_708] : memref<1x1x16x16xf32, #tpu.memory_space<vmem>>, vector<1x1x1x14xf32>
    %367 = vector.shape_cast %366 : vector<1x1x1x14xf32> to vector<1x14xf32>
    %c5_709 = arith.constant 5 : index
    %c182_710 = arith.constant 182 : index
    %368 = vector.load %arg9[%c5_709, %c182_710] : memref<9x196xf32, #tpu.memory_space<vmem>>, vector<1x14xf32>
    tpu.vector_store %arg9[%c5_709, %c182_710], %367 {strides = array<i32>} : memref<9x196xf32, #tpu.memory_space<vmem>>, vector<1x14xf32>,
    %c0_711 = arith.constant 0 : index
    %c0_712 = arith.constant 0 : index
    %c15 = arith.constant 15 : index
    %c0_713 = arith.constant 0 : index
    %369 = vector.load %arg1[%c0_711, %c0_712, %c15, %c0_713] : memref<1x1x16x16xf32, #tpu.memory_space<vmem>>, vector<1x1x1x14xf32>
    %370 = vector.shape_cast %369 : vector<1x1x1x14xf32> to vector<1x14xf32>
    %c6_714 = arith.constant 6 : index
    %c182_715 = arith.constant 182 : index
    %371 = vector.load %arg9[%c6_714, %c182_715] : memref<9x196xf32, #tpu.memory_space<vmem>>, vector<1x14xf32>
    tpu.vector_store %arg9[%c6_714, %c182_715], %370 {strides = array<i32>} : memref<9x196xf32, #tpu.memory_space<vmem>>, vector<1x14xf32>,
    %c0_716 = arith.constant 0 : index
    %c0_717 = arith.constant 0 : index
    %c15_718 = arith.constant 15 : index
    %c1_719 = arith.constant 1 : index
    %372 = vector.load %arg1[%c0_716, %c0_717, %c15_718, %c1_719] : memref<1x1x16x16xf32, #tpu.memory_space<vmem>>, vector<1x1x1x14xf32>
    %373 = vector.shape_cast %372 : vector<1x1x1x14xf32> to vector<1x14xf32>
    %c7_720 = arith.constant 7 : index
    %c182_721 = arith.constant 182 : index
    %374 = vector.load %arg9[%c7_720, %c182_721] : memref<9x196xf32, #tpu.memory_space<vmem>>, vector<1x14xf32>
    tpu.vector_store %arg9[%c7_720, %c182_721], %373 {strides = array<i32>} : memref<9x196xf32, #tpu.memory_space<vmem>>, vector<1x14xf32>,
    %c0_722 = arith.constant 0 : index
    %c0_723 = arith.constant 0 : index
    %c15_724 = arith.constant 15 : index
    %c2_725 = arith.constant 2 : index
    %375 = vector.load %arg1[%c0_722, %c0_723, %c15_724, %c2_725] : memref<1x1x16x16xf32, #tpu.memory_space<vmem>>, vector<1x1x1x14xf32>
    %376 = vector.shape_cast %375 : vector<1x1x1x14xf32> to vector<1x14xf32>
    %c8_726 = arith.constant 8 : index
    %c182_727 = arith.constant 182 : index
    %377 = vector.load %arg9[%c8_726, %c182_727] : memref<9x196xf32, #tpu.memory_space<vmem>>, vector<1x14xf32>
    tpu.vector_store %arg9[%c8_726, %c182_727], %376 {strides = array<i32>} : memref<9x196xf32, #tpu.memory_space<vmem>>, vector<1x14xf32>,
    %c0_728 = arith.constant 0 : index
    %c0_729 = arith.constant 0 : index
    %378 = vector.load %arg2[%c0_728, %c0_729] : memref<8x9xbf16, #tpu.memory_space<vmem>>, vector<8x9xbf16>
    %c0_730 = arith.constant 0 : index
    %c0_731 = arith.constant 0 : index
    %379 = vector.load %arg9[%c0_730, %c0_731] : memref<9x196xf32, #tpu.memory_space<vmem>>, vector<9x196xf32>
    %380 = arith.truncf %379 : vector<9x196xf32> to vector<9x196xbf16>
    %cst = arith.constant dense<0.000000e+00> : vector<8x196xf32>
    %381 = tpu.matmul %378, %380, %cst {dimension_numbers = #tpu.dot_dimension_numbers<[1], [0], [0], [1], [0, 0, 1, 1], [], []>} : vector<8x9xbf16>, vector<9x196xbf16>, vector<8x196xf32> -> vector<8x196xf32>
    %c0_732 = arith.constant 0 : index
    %c0_733 = arith.constant 0 : index
    %382 = vector.load %arg3[%c0_732, %c0_733] : memref<8x1xf32, #tpu.memory_space<vmem>>, vector<8x1xf32>
    %383 = vector.broadcast %382 : vector<8x1xf32> to vector<8x196xf32>
    %384 = arith.addf %381, %383 : vector<8x196xf32>
    %cst_734 = arith.constant 0.000000e+00 : f32
    %385 = vector.broadcast %cst_734 : f32 to vector<8x196xf32>
    %386 = arith.maximumf %384, %385 : vector<8x196xf32>
    %c0_735 = arith.constant 0 : index
    %c0_736 = arith.constant 0 : index
    %387 = vector.load %arg10[%c0_735, %c0_736] : memref<8x196xf32, #tpu.memory_space<vmem>>, vector<8x196xf32>
    tpu.vector_store %arg10[%c0_735, %c0_736], %386 {strides = array<i32>} : memref<8x196xf32, #tpu.memory_space<vmem>>, vector<8x196xf32>,
    %c0_737 = arith.constant 0 : index
    %c0_738 = arith.constant 0 : index
    %388 = vector.load %arg10[%c0_737, %c0_738] : memref<8x196xf32, #tpu.memory_space<vmem>>, vector<8x12xf32>
    %c0_739 = arith.constant 0 : index
    %c0_740 = arith.constant 0 : index
    %389 = vector.load %arg11[%c0_739, %c0_740] : memref<72x144xf32, #tpu.memory_space<vmem>>, vector<8x12xf32>
    tpu.vector_store %arg11[%c0_739, %c0_740], %388 {strides = array<i32>} : memref<72x144xf32, #tpu.memory_space<vmem>>, vector<8x12xf32>,
    %c0_741 = arith.constant 0 : index
    %c1_742 = arith.constant 1 : index
    %390 = vector.load %arg10[%c0_741, %c1_742] : memref<8x196xf32, #tpu.memory_space<vmem>>, vector<8x12xf32>
    %c8_743 = arith.constant 8 : index
    %c0_744 = arith.constant 0 : index
    %391 = vector.load %arg11[%c8_743, %c0_744] : memref<72x144xf32, #tpu.memory_space<vmem>>, vector<8x12xf32>
    tpu.vector_store %arg11[%c8_743, %c0_744], %390 {strides = array<i32>} : memref<72x144xf32, #tpu.memory_space<vmem>>, vector<8x12xf32>,
    %c0_745 = arith.constant 0 : index
    %c2_746 = arith.constant 2 : index
    %392 = vector.load %arg10[%c0_745, %c2_746] : memref<8x196xf32, #tpu.memory_space<vmem>>, vector<8x12xf32>
    %c16 = arith.constant 16 : index
    %c0_747 = arith.constant 0 : index
    %393 = vector.load %arg11[%c16, %c0_747] : memref<72x144xf32, #tpu.memory_space<vmem>>, vector<8x12xf32>
    tpu.vector_store %arg11[%c16, %c0_747], %392 {strides = array<i32>} : memref<72x144xf32, #tpu.memory_space<vmem>>, vector<8x12xf32>,
    %c0_748 = arith.constant 0 : index
    %c14_749 = arith.constant 14 : index
    %394 = vector.load %arg10[%c0_748, %c14_749] : memref<8x196xf32, #tpu.memory_space<vmem>>, vector<8x12xf32>
    %c24 = arith.constant 24 : index
    %c0_750 = arith.constant 0 : index
    %395 = vector.load %arg11[%c24, %c0_750] : memref<72x144xf32, #tpu.memory_space<vmem>>, vector<8x12xf32>
    tpu.vector_store %arg11[%c24, %c0_750], %394 {strides = array<i32>} : memref<72x144xf32, #tpu.memory_space<vmem>>, vector<8x12xf32>,
    %c0_751 = arith.constant 0 : index
    %c15_752 = arith.constant 15 : index
    %396 = vector.load %arg10[%c0_751, %c15_752] : memref<8x196xf32, #tpu.memory_space<vmem>>, vector<8x12xf32>
    %c32 = arith.constant 32 : index
    %c0_753 = arith.constant 0 : index
    %397 = vector.load %arg11[%c32, %c0_753] : memref<72x144xf32, #tpu.memory_space<vmem>>, vector<8x12xf32>
    tpu.vector_store %arg11[%c32, %c0_753], %396 {strides = array<i32>} : memref<72x144xf32, #tpu.memory_space<vmem>>, vector<8x12xf32>,
    %c0_754 = arith.constant 0 : index
    %c16_755 = arith.constant 16 : index
    %398 = vector.load %arg10[%c0_754, %c16_755] : memref<8x196xf32, #tpu.memory_space<vmem>>, vector<8x12xf32>
    %c40 = arith.constant 40 : index
    %c0_756 = arith.constant 0 : index
    %399 = vector.load %arg11[%c40, %c0_756] : memref<72x144xf32, #tpu.memory_space<vmem>>, vector<8x12xf32>
    tpu.vector_store %arg11[%c40, %c0_756], %398 {strides = array<i32>} : memref<72x144xf32, #tpu.memory_space<vmem>>, vector<8x12xf32>,
    %c0_757 = arith.constant 0 : index
    %c28_758 = arith.constant 28 : index
    %400 = vector.load %arg10[%c0_757, %c28_758] : memref<8x196xf32, #tpu.memory_space<vmem>>, vector<8x12xf32>
    %c48 = arith.constant 48 : index
    %c0_759 = arith.constant 0 : index
    %401 = vector.load %arg11[%c48, %c0_759] : memref<72x144xf32, #tpu.memory_space<vmem>>, vector<8x12xf32>
    tpu.vector_store %arg11[%c48, %c0_759], %400 {strides = array<i32>} : memref<72x144xf32, #tpu.memory_space<vmem>>, vector<8x12xf32>,
    %c0_760 = arith.constant 0 : index
    %c29 = arith.constant 29 : index
    %402 = vector.load %arg10[%c0_760, %c29] : memref<8x196xf32, #tpu.memory_space<vmem>>, vector<8x12xf32>
    %c56_761 = arith.constant 56 : index
    %c0_762 = arith.constant 0 : index
    %403 = vector.load %arg11[%c56_761, %c0_762] : memref<72x144xf32, #tpu.memory_space<vmem>>, vector<8x12xf32>
    tpu.vector_store %arg11[%c56_761, %c0_762], %402 {strides = array<i32>} : memref<72x144xf32, #tpu.memory_space<vmem>>, vector<8x12xf32>,
    %c0_763 = arith.constant 0 : index
    %c30 = arith.constant 30 : index
    %404 = vector.load %arg10[%c0_763, %c30] : memref<8x196xf32, #tpu.memory_space<vmem>>, vector<8x12xf32>
    %c64 = arith.constant 64 : index
    %c0_764 = arith.constant 0 : index
    %405 = vector.load %arg11[%c64, %c0_764] : memref<72x144xf32, #tpu.memory_space<vmem>>, vector<8x12xf32>
    tpu.vector_store %arg11[%c64, %c0_764], %404 {strides = array<i32>} : memref<72x144xf32, #tpu.memory_space<vmem>>, vector<8x12xf32>,
    %c0_765 = arith.constant 0 : index
    %c14_766 = arith.constant 14 : index
    %406 = vector.load %arg10[%c0_765, %c14_766] : memref<8x196xf32, #tpu.memory_space<vmem>>, vector<8x12xf32>
    %c0_767 = arith.constant 0 : index
    %c12_768 = arith.constant 12 : index
    %407 = vector.load %arg11[%c0_767, %c12_768] : memref<72x144xf32, #tpu.memory_space<vmem>>, vector<8x12xf32>
    tpu.vector_store %arg11[%c0_767, %c12_768], %406 {strides = array<i32>} : memref<72x144xf32, #tpu.memory_space<vmem>>, vector<8x12xf32>,
    %c0_769 = arith.constant 0 : index
    %c15_770 = arith.constant 15 : index
    %408 = vector.load %arg10[%c0_769, %c15_770] : memref<8x196xf32, #tpu.memory_space<vmem>>, vector<8x12xf32>
    %c8_771 = arith.constant 8 : index
    %c12_772 = arith.constant 12 : index
    %409 = vector.load %arg11[%c8_771, %c12_772] : memref<72x144xf32, #tpu.memory_space<vmem>>, vector<8x12xf32>
    tpu.vector_store %arg11[%c8_771, %c12_772], %408 {strides = array<i32>} : memref<72x144xf32, #tpu.memory_space<vmem>>, vector<8x12xf32>,
    %c0_773 = arith.constant 0 : index
    %c16_774 = arith.constant 16 : index
    %410 = vector.load %arg10[%c0_773, %c16_774] : memref<8x196xf32, #tpu.memory_space<vmem>>, vector<8x12xf32>
    %c16_775 = arith.constant 16 : index
    %c12_776 = arith.constant 12 : index
    %411 = vector.load %arg11[%c16_775, %c12_776] : memref<72x144xf32, #tpu.memory_space<vmem>>, vector<8x12xf32>
    tpu.vector_store %arg11[%c16_775, %c12_776], %410 {strides = array<i32>} : memref<72x144xf32, #tpu.memory_space<vmem>>, vector<8x12xf32>,
    %c0_777 = arith.constant 0 : index
    %c28_778 = arith.constant 28 : index
    %412 = vector.load %arg10[%c0_777, %c28_778] : memref<8x196xf32, #tpu.memory_space<vmem>>, vector<8x12xf32>
    %c24_779 = arith.constant 24 : index
    %c12_780 = arith.constant 12 : index
    %413 = vector.load %arg11[%c24_779, %c12_780] : memref<72x144xf32, #tpu.memory_space<vmem>>, vector<8x12xf32>
    tpu.vector_store %arg11[%c24_779, %c12_780], %412 {strides = array<i32>} : memref<72x144xf32, #tpu.memory_space<vmem>>, vector<8x12xf32>,
    %c0_781 = arith.constant 0 : index
    %c29_782 = arith.constant 29 : index
    %414 = vector.load %arg10[%c0_781, %c29_782] : memref<8x196xf32, #tpu.memory_space<vmem>>, vector<8x12xf32>
    %c32_783 = arith.constant 32 : index
    %c12_784 = arith.constant 12 : index
    %415 = vector.load %arg11[%c32_783, %c12_784] : memref<72x144xf32, #tpu.memory_space<vmem>>, vector<8x12xf32>
    tpu.vector_store %arg11[%c32_783, %c12_784], %414 {strides = array<i32>} : memref<72x144xf32, #tpu.memory_space<vmem>>, vector<8x12xf32>,
    %c0_785 = arith.constant 0 : index
    %c30_786 = arith.constant 30 : index
    %416 = vector.load %arg10[%c0_785, %c30_786] : memref<8x196xf32, #tpu.memory_space<vmem>>, vector<8x12xf32>
    %c40_787 = arith.constant 40 : index
    %c12_788 = arith.constant 12 : index
    %417 = vector.load %arg11[%c40_787, %c12_788] : memref<72x144xf32, #tpu.memory_space<vmem>>, vector<8x12xf32>
    tpu.vector_store %arg11[%c40_787, %c12_788], %416 {strides = array<i32>} : memref<72x144xf32, #tpu.memory_space<vmem>>, vector<8x12xf32>,
    %c0_789 = arith.constant 0 : index
    %c42_790 = arith.constant 42 : index
    %418 = vector.load %arg10[%c0_789, %c42_790] : memref<8x196xf32, #tpu.memory_space<vmem>>, vector<8x12xf32>
    %c48_791 = arith.constant 48 : index
    %c12_792 = arith.constant 12 : index
    %419 = vector.load %arg11[%c48_791, %c12_792] : memref<72x144xf32, #tpu.memory_space<vmem>>, vector<8x12xf32>
    tpu.vector_store %arg11[%c48_791, %c12_792], %418 {strides = array<i32>} : memref<72x144xf32, #tpu.memory_space<vmem>>, vector<8x12xf32>,
    %c0_793 = arith.constant 0 : index
    %c43 = arith.constant 43 : index
    %420 = vector.load %arg10[%c0_793, %c43] : memref<8x196xf32, #tpu.memory_space<vmem>>, vector<8x12xf32>
    %c56_794 = arith.constant 56 : index
    %c12_795 = arith.constant 12 : index
    %421 = vector.load %arg11[%c56_794, %c12_795] : memref<72x144xf32, #tpu.memory_space<vmem>>, vector<8x12xf32>
    tpu.vector_store %arg11[%c56_794, %c12_795], %420 {strides = array<i32>} : memref<72x144xf32, #tpu.memory_space<vmem>>, vector<8x12xf32>,
    %c0_796 = arith.constant 0 : index
    %c44 = arith.constant 44 : index
    %422 = vector.load %arg10[%c0_796, %c44] : memref<8x196xf32, #tpu.memory_space<vmem>>, vector<8x12xf32>
    %c64_797 = arith.constant 64 : index
    %c12_798 = arith.constant 12 : index
    %423 = vector.load %arg11[%c64_797, %c12_798] : memref<72x144xf32, #tpu.memory_space<vmem>>, vector<8x12xf32>
    tpu.vector_store %arg11[%c64_797, %c12_798], %422 {strides = array<i32>} : memref<72x144xf32, #tpu.memory_space<vmem>>, vector<8x12xf32>,
    %c0_799 = arith.constant 0 : index
    %c28_800 = arith.constant 28 : index
    %424 = vector.load %arg10[%c0_799, %c28_800] : memref<8x196xf32, #tpu.memory_space<vmem>>, vector<8x12xf32>
    %c0_801 = arith.constant 0 : index
    %c24_802 = arith.constant 24 : index
    %425 = vector.load %arg11[%c0_801, %c24_802] : memref<72x144xf32, #tpu.memory_space<vmem>>, vector<8x12xf32>
    tpu.vector_store %arg11[%c0_801, %c24_802], %424 {strides = array<i32>} : memref<72x144xf32, #tpu.memory_space<vmem>>, vector<8x12xf32>,
    %c0_803 = arith.constant 0 : index
    %c29_804 = arith.constant 29 : index
    %426 = vector.load %arg10[%c0_803, %c29_804] : memref<8x196xf32, #tpu.memory_space<vmem>>, vector<8x12xf32>
    %c8_805 = arith.constant 8 : index
    %c24_806 = arith.constant 24 : index
    %427 = vector.load %arg11[%c8_805, %c24_806] : memref<72x144xf32, #tpu.memory_space<vmem>>, vector<8x12xf32>
    tpu.vector_store %arg11[%c8_805, %c24_806], %426 {strides = array<i32>} : memref<72x144xf32, #tpu.memory_space<vmem>>, vector<8x12xf32>,
    %c0_807 = arith.constant 0 : index
    %c30_808 = arith.constant 30 : index
    %428 = vector.load %arg10[%c0_807, %c30_808] : memref<8x196xf32, #tpu.memory_space<vmem>>, vector<8x12xf32>
    %c16_809 = arith.constant 16 : index
    %c24_810 = arith.constant 24 : index
    %429 = vector.load %arg11[%c16_809, %c24_810] : memref<72x144xf32, #tpu.memory_space<vmem>>, vector<8x12xf32>
    tpu.vector_store %arg11[%c16_809, %c24_810], %428 {strides = array<i32>} : memref<72x144xf32, #tpu.memory_space<vmem>>, vector<8x12xf32>,
    %c0_811 = arith.constant 0 : index
    %c42_812 = arith.constant 42 : index
    %430 = vector.load %arg10[%c0_811, %c42_812] : memref<8x196xf32, #tpu.memory_space<vmem>>, vector<8x12xf32>
    %c24_813 = arith.constant 24 : index
    %c24_814 = arith.constant 24 : index
    %431 = vector.load %arg11[%c24_813, %c24_814] : memref<72x144xf32, #tpu.memory_space<vmem>>, vector<8x12xf32>
    tpu.vector_store %arg11[%c24_813, %c24_814], %430 {strides = array<i32>} : memref<72x144xf32, #tpu.memory_space<vmem>>, vector<8x12xf32>,
    %c0_815 = arith.constant 0 : index
    %c43_816 = arith.constant 43 : index
    %432 = vector.load %arg10[%c0_815, %c43_816] : memref<8x196xf32, #tpu.memory_space<vmem>>, vector<8x12xf32>
    %c32_817 = arith.constant 32 : index
    %c24_818 = arith.constant 24 : index
    %433 = vector.load %arg11[%c32_817, %c24_818] : memref<72x144xf32, #tpu.memory_space<vmem>>, vector<8x12xf32>
    tpu.vector_store %arg11[%c32_817, %c24_818], %432 {strides = array<i32>} : memref<72x144xf32, #tpu.memory_space<vmem>>, vector<8x12xf32>,
    %c0_819 = arith.constant 0 : index
    %c44_820 = arith.constant 44 : index
    %434 = vector.load %arg10[%c0_819, %c44_820] : memref<8x196xf32, #tpu.memory_space<vmem>>, vector<8x12xf32>
    %c40_821 = arith.constant 40 : index
    %c24_822 = arith.constant 24 : index
    %435 = vector.load %arg11[%c40_821, %c24_822] : memref<72x144xf32, #tpu.memory_space<vmem>>, vector<8x12xf32>
    tpu.vector_store %arg11[%c40_821, %c24_822], %434 {strides = array<i32>} : memref<72x144xf32, #tpu.memory_space<vmem>>, vector<8x12xf32>,
    %c0_823 = arith.constant 0 : index
    %c56_824 = arith.constant 56 : index
    %436 = vector.load %arg10[%c0_823, %c56_824] : memref<8x196xf32, #tpu.memory_space<vmem>>, vector<8x12xf32>
    %c48_825 = arith.constant 48 : index
    %c24_826 = arith.constant 24 : index
    %437 = vector.load %arg11[%c48_825, %c24_826] : memref<72x144xf32, #tpu.memory_space<vmem>>, vector<8x12xf32>
    tpu.vector_store %arg11[%c48_825, %c24_826], %436 {strides = array<i32>} : memref<72x144xf32, #tpu.memory_space<vmem>>, vector<8x12xf32>,
    %c0_827 = arith.constant 0 : index
    %c57 = arith.constant 57 : index
    %438 = vector.load %arg10[%c0_827, %c57] : memref<8x196xf32, #tpu.memory_space<vmem>>, vector<8x12xf32>
    %c56_828 = arith.constant 56 : index
    %c24_829 = arith.constant 24 : index
    %439 = vector.load %arg11[%c56_828, %c24_829] : memref<72x144xf32, #tpu.memory_space<vmem>>, vector<8x12xf32>
    tpu.vector_store %arg11[%c56_828, %c24_829], %438 {strides = array<i32>} : memref<72x144xf32, #tpu.memory_space<vmem>>, vector<8x12xf32>,
    %c0_830 = arith.constant 0 : index
    %c58 = arith.constant 58 : index
    %440 = vector.load %arg10[%c0_830, %c58] : memref<8x196xf32, #tpu.memory_space<vmem>>, vector<8x12xf32>
    %c64_831 = arith.constant 64 : index
    %c24_832 = arith.constant 24 : index
    %441 = vector.load %arg11[%c64_831, %c24_832] : memref<72x144xf32, #tpu.memory_space<vmem>>, vector<8x12xf32>
    tpu.vector_store %arg11[%c64_831, %c24_832], %440 {strides = array<i32>} : memref<72x144xf32, #tpu.memory_space<vmem>>, vector<8x12xf32>,
    %c0_833 = arith.constant 0 : index
    %c42_834 = arith.constant 42 : index
    %442 = vector.load %arg10[%c0_833, %c42_834] : memref<8x196xf32, #tpu.memory_space<vmem>>, vector<8x12xf32>
    %c0_835 = arith.constant 0 : index
    %c36 = arith.constant 36 : index
    %443 = vector.load %arg11[%c0_835, %c36] : memref<72x144xf32, #tpu.memory_space<vmem>>, vector<8x12xf32>
    tpu.vector_store %arg11[%c0_835, %c36], %442 {strides = array<i32>} : memref<72x144xf32, #tpu.memory_space<vmem>>, vector<8x12xf32>,
    %c0_836 = arith.constant 0 : index
    %c43_837 = arith.constant 43 : index
    %444 = vector.load %arg10[%c0_836, %c43_837] : memref<8x196xf32, #tpu.memory_space<vmem>>, vector<8x12xf32>
    %c8_838 = arith.constant 8 : index
    %c36_839 = arith.constant 36 : index
    %445 = vector.load %arg11[%c8_838, %c36_839] : memref<72x144xf32, #tpu.memory_space<vmem>>, vector<8x12xf32>
    tpu.vector_store %arg11[%c8_838, %c36_839], %444 {strides = array<i32>} : memref<72x144xf32, #tpu.memory_space<vmem>>, vector<8x12xf32>,
    %c0_840 = arith.constant 0 : index
    %c44_841 = arith.constant 44 : index
    %446 = vector.load %arg10[%c0_840, %c44_841] : memref<8x196xf32, #tpu.memory_space<vmem>>, vector<8x12xf32>
    %c16_842 = arith.constant 16 : index
    %c36_843 = arith.constant 36 : index
    %447 = vector.load %arg11[%c16_842, %c36_843] : memref<72x144xf32, #tpu.memory_space<vmem>>, vector<8x12xf32>
    tpu.vector_store %arg11[%c16_842, %c36_843], %446 {strides = array<i32>} : memref<72x144xf32, #tpu.memory_space<vmem>>, vector<8x12xf32>,
    %c0_844 = arith.constant 0 : index
    %c56_845 = arith.constant 56 : index
    %448 = vector.load %arg10[%c0_844, %c56_845] : memref<8x196xf32, #tpu.memory_space<vmem>>, vector<8x12xf32>
    %c24_846 = arith.constant 24 : index
    %c36_847 = arith.constant 36 : index
    %449 = vector.load %arg11[%c24_846, %c36_847] : memref<72x144xf32, #tpu.memory_space<vmem>>, vector<8x12xf32>
    tpu.vector_store %arg11[%c24_846, %c36_847], %448 {strides = array<i32>} : memref<72x144xf32, #tpu.memory_space<vmem>>, vector<8x12xf32>,
    %c0_848 = arith.constant 0 : index
    %c57_849 = arith.constant 57 : index
    %450 = vector.load %arg10[%c0_848, %c57_849] : memref<8x196xf32, #tpu.memory_space<vmem>>, vector<8x12xf32>
    %c32_850 = arith.constant 32 : index
    %c36_851 = arith.constant 36 : index
    %451 = vector.load %arg11[%c32_850, %c36_851] : memref<72x144xf32, #tpu.memory_space<vmem>>, vector<8x12xf32>
    tpu.vector_store %arg11[%c32_850, %c36_851], %450 {strides = array<i32>} : memref<72x144xf32, #tpu.memory_space<vmem>>, vector<8x12xf32>,
    %c0_852 = arith.constant 0 : index
    %c58_853 = arith.constant 58 : index
    %452 = vector.load %arg10[%c0_852, %c58_853] : memref<8x196xf32, #tpu.memory_space<vmem>>, vector<8x12xf32>
    %c40_854 = arith.constant 40 : index
    %c36_855 = arith.constant 36 : index
    %453 = vector.load %arg11[%c40_854, %c36_855] : memref<72x144xf32, #tpu.memory_space<vmem>>, vector<8x12xf32>
    tpu.vector_store %arg11[%c40_854, %c36_855], %452 {strides = array<i32>} : memref<72x144xf32, #tpu.memory_space<vmem>>, vector<8x12xf32>,
    %c0_856 = arith.constant 0 : index
    %c70_857 = arith.constant 70 : index
    %454 = vector.load %arg10[%c0_856, %c70_857] : memref<8x196xf32, #tpu.memory_space<vmem>>, vector<8x12xf32>
    %c48_858 = arith.constant 48 : index
    %c36_859 = arith.constant 36 : index
    %455 = vector.load %arg11[%c48_858, %c36_859] : memref<72x144xf32, #tpu.memory_space<vmem>>, vector<8x12xf32>
    tpu.vector_store %arg11[%c48_858, %c36_859], %454 {strides = array<i32>} : memref<72x144xf32, #tpu.memory_space<vmem>>, vector<8x12xf32>,
    %c0_860 = arith.constant 0 : index
    %c71 = arith.constant 71 : index
    %456 = vector.load %arg10[%c0_860, %c71] : memref<8x196xf32, #tpu.memory_space<vmem>>, vector<8x12xf32>
    %c56_861 = arith.constant 56 : index
    %c36_862 = arith.constant 36 : index
    %457 = vector.load %arg11[%c56_861, %c36_862] : memref<72x144xf32, #tpu.memory_space<vmem>>, vector<8x12xf32>
    tpu.vector_store %arg11[%c56_861, %c36_862], %456 {strides = array<i32>} : memref<72x144xf32, #tpu.memory_space<vmem>>, vector<8x12xf32>,
    %c0_863 = arith.constant 0 : index
    %c72 = arith.constant 72 : index
    %458 = vector.load %arg10[%c0_863, %c72] : memref<8x196xf32, #tpu.memory_space<vmem>>, vector<8x12xf32>
    %c64_864 = arith.constant 64 : index
    %c36_865 = arith.constant 36 : index
    %459 = vector.load %arg11[%c64_864, %c36_865] : memref<72x144xf32, #tpu.memory_space<vmem>>, vector<8x12xf32>
    tpu.vector_store %arg11[%c64_864, %c36_865], %458 {strides = array<i32>} : memref<72x144xf32, #tpu.memory_space<vmem>>, vector<8x12xf32>,
    %c0_866 = arith.constant 0 : index
    %c56_867 = arith.constant 56 : index
    %460 = vector.load %arg10[%c0_866, %c56_867] : memref<8x196xf32, #tpu.memory_space<vmem>>, vector<8x12xf32>
    %c0_868 = arith.constant 0 : index
    %c48_869 = arith.constant 48 : index
    %461 = vector.load %arg11[%c0_868, %c48_869] : memref<72x144xf32, #tpu.memory_space<vmem>>, vector<8x12xf32>
    tpu.vector_store %arg11[%c0_868, %c48_869], %460 {strides = array<i32>} : memref<72x144xf32, #tpu.memory_space<vmem>>, vector<8x12xf32>,
    %c0_870 = arith.constant 0 : index
    %c57_871 = arith.constant 57 : index
    %462 = vector.load %arg10[%c0_870, %c57_871] : memref<8x196xf32, #tpu.memory_space<vmem>>, vector<8x12xf32>
    %c8_872 = arith.constant 8 : index
    %c48_873 = arith.constant 48 : index
    %463 = vector.load %arg11[%c8_872, %c48_873] : memref<72x144xf32, #tpu.memory_space<vmem>>, vector<8x12xf32>
    tpu.vector_store %arg11[%c8_872, %c48_873], %462 {strides = array<i32>} : memref<72x144xf32, #tpu.memory_space<vmem>>, vector<8x12xf32>,
    %c0_874 = arith.constant 0 : index
    %c58_875 = arith.constant 58 : index
    %464 = vector.load %arg10[%c0_874, %c58_875] : memref<8x196xf32, #tpu.memory_space<vmem>>, vector<8x12xf32>
    %c16_876 = arith.constant 16 : index
    %c48_877 = arith.constant 48 : index
    %465 = vector.load %arg11[%c16_876, %c48_877] : memref<72x144xf32, #tpu.memory_space<vmem>>, vector<8x12xf32>
    tpu.vector_store %arg11[%c16_876, %c48_877], %464 {strides = array<i32>} : memref<72x144xf32, #tpu.memory_space<vmem>>, vector<8x12xf32>,
    %c0_878 = arith.constant 0 : index
    %c70_879 = arith.constant 70 : index
    %466 = vector.load %arg10[%c0_878, %c70_879] : memref<8x196xf32, #tpu.memory_space<vmem>>, vector<8x12xf32>
    %c24_880 = arith.constant 24 : index
    %c48_881 = arith.constant 48 : index
    %467 = vector.load %arg11[%c24_880, %c48_881] : memref<72x144xf32, #tpu.memory_space<vmem>>, vector<8x12xf32>
    tpu.vector_store %arg11[%c24_880, %c48_881], %466 {strides = array<i32>} : memref<72x144xf32, #tpu.memory_space<vmem>>, vector<8x12xf32>,
    %c0_882 = arith.constant 0 : index
    %c71_883 = arith.constant 71 : index
    %468 = vector.load %arg10[%c0_882, %c71_883] : memref<8x196xf32, #tpu.memory_space<vmem>>, vector<8x12xf32>
    %c32_884 = arith.constant 32 : index
    %c48_885 = arith.constant 48 : index
    %469 = vector.load %arg11[%c32_884, %c48_885] : memref<72x144xf32, #tpu.memory_space<vmem>>, vector<8x12xf32>
    tpu.vector_store %arg11[%c32_884, %c48_885], %468 {strides = array<i32>} : memref<72x144xf32, #tpu.memory_space<vmem>>, vector<8x12xf32>,
    %c0_886 = arith.constant 0 : index
    %c72_887 = arith.constant 72 : index
    %470 = vector.load %arg10[%c0_886, %c72_887] : memref<8x196xf32, #tpu.memory_space<vmem>>, vector<8x12xf32>
    %c40_888 = arith.constant 40 : index
    %c48_889 = arith.constant 48 : index
    %471 = vector.load %arg11[%c40_888, %c48_889] : memref<72x144xf32, #tpu.memory_space<vmem>>, vector<8x12xf32>
    tpu.vector_store %arg11[%c40_888, %c48_889], %470 {strides = array<i32>} : memref<72x144xf32, #tpu.memory_space<vmem>>, vector<8x12xf32>,
    %c0_890 = arith.constant 0 : index
    %c84_891 = arith.constant 84 : index
    %472 = vector.load %arg10[%c0_890, %c84_891] : memref<8x196xf32, #tpu.memory_space<vmem>>, vector<8x12xf32>
    %c48_892 = arith.constant 48 : index
    %c48_893 = arith.constant 48 : index
    %473 = vector.load %arg11[%c48_892, %c48_893] : memref<72x144xf32, #tpu.memory_space<vmem>>, vector<8x12xf32>
    tpu.vector_store %arg11[%c48_892, %c48_893], %472 {strides = array<i32>} : memref<72x144xf32, #tpu.memory_space<vmem>>, vector<8x12xf32>,
    %c0_894 = arith.constant 0 : index
    %c85 = arith.constant 85 : index
    %474 = vector.load %arg10[%c0_894, %c85] : memref<8x196xf32, #tpu.memory_space<vmem>>, vector<8x12xf32>
    %c56_895 = arith.constant 56 : index
    %c48_896 = arith.constant 48 : index
    %475 = vector.load %arg11[%c56_895, %c48_896] : memref<72x144xf32, #tpu.memory_space<vmem>>, vector<8x12xf32>
    tpu.vector_store %arg11[%c56_895, %c48_896], %474 {strides = array<i32>} : memref<72x144xf32, #tpu.memory_space<vmem>>, vector<8x12xf32>,
    %c0_897 = arith.constant 0 : index
    %c86 = arith.constant 86 : index
    %476 = vector.load %arg10[%c0_897, %c86] : memref<8x196xf32, #tpu.memory_space<vmem>>, vector<8x12xf32>
    %c64_898 = arith.constant 64 : index
    %c48_899 = arith.constant 48 : index
    %477 = vector.load %arg11[%c64_898, %c48_899] : memref<72x144xf32, #tpu.memory_space<vmem>>, vector<8x12xf32>
    tpu.vector_store %arg11[%c64_898, %c48_899], %476 {strides = array<i32>} : memref<72x144xf32, #tpu.memory_space<vmem>>, vector<8x12xf32>,
    %c0_900 = arith.constant 0 : index
    %c70_901 = arith.constant 70 : index
    %478 = vector.load %arg10[%c0_900, %c70_901] : memref<8x196xf32, #tpu.memory_space<vmem>>, vector<8x12xf32>
    %c0_902 = arith.constant 0 : index
    %c60 = arith.constant 60 : index
    %479 = vector.load %arg11[%c0_902, %c60] : memref<72x144xf32, #tpu.memory_space<vmem>>, vector<8x12xf32>
    tpu.vector_store %arg11[%c0_902, %c60], %478 {strides = array<i32>} : memref<72x144xf32, #tpu.memory_space<vmem>>, vector<8x12xf32>,
    %c0_903 = arith.constant 0 : index
    %c71_904 = arith.constant 71 : index
    %480 = vector.load %arg10[%c0_903, %c71_904] : memref<8x196xf32, #tpu.memory_space<vmem>>, vector<8x12xf32>
    %c8_905 = arith.constant 8 : index
    %c60_906 = arith.constant 60 : index
    %481 = vector.load %arg11[%c8_905, %c60_906] : memref<72x144xf32, #tpu.memory_space<vmem>>, vector<8x12xf32>
    tpu.vector_store %arg11[%c8_905, %c60_906], %480 {strides = array<i32>} : memref<72x144xf32, #tpu.memory_space<vmem>>, vector<8x12xf32>,
    %c0_907 = arith.constant 0 : index
    %c72_908 = arith.constant 72 : index
    %482 = vector.load %arg10[%c0_907, %c72_908] : memref<8x196xf32, #tpu.memory_space<vmem>>, vector<8x12xf32>
    %c16_909 = arith.constant 16 : index
    %c60_910 = arith.constant 60 : index
    %483 = vector.load %arg11[%c16_909, %c60_910] : memref<72x144xf32, #tpu.memory_space<vmem>>, vector<8x12xf32>
    tpu.vector_store %arg11[%c16_909, %c60_910], %482 {strides = array<i32>} : memref<72x144xf32, #tpu.memory_space<vmem>>, vector<8x12xf32>,
    %c0_911 = arith.constant 0 : index
    %c84_912 = arith.constant 84 : index
    %484 = vector.load %arg10[%c0_911, %c84_912] : memref<8x196xf32, #tpu.memory_space<vmem>>, vector<8x12xf32>
    %c24_913 = arith.constant 24 : index
    %c60_914 = arith.constant 60 : index
    %485 = vector.load %arg11[%c24_913, %c60_914] : memref<72x144xf32, #tpu.memory_space<vmem>>, vector<8x12xf32>
    tpu.vector_store %arg11[%c24_913, %c60_914], %484 {strides = array<i32>} : memref<72x144xf32, #tpu.memory_space<vmem>>, vector<8x12xf32>,
    %c0_915 = arith.constant 0 : index
    %c85_916 = arith.constant 85 : index
    %486 = vector.load %arg10[%c0_915, %c85_916] : memref<8x196xf32, #tpu.memory_space<vmem>>, vector<8x12xf32>
    %c32_917 = arith.constant 32 : index
    %c60_918 = arith.constant 60 : index
    %487 = vector.load %arg11[%c32_917, %c60_918] : memref<72x144xf32, #tpu.memory_space<vmem>>, vector<8x12xf32>
    tpu.vector_store %arg11[%c32_917, %c60_918], %486 {strides = array<i32>} : memref<72x144xf32, #tpu.memory_space<vmem>>, vector<8x12xf32>,
    %c0_919 = arith.constant 0 : index
    %c86_920 = arith.constant 86 : index
    %488 = vector.load %arg10[%c0_919, %c86_920] : memref<8x196xf32, #tpu.memory_space<vmem>>, vector<8x12xf32>
    %c40_921 = arith.constant 40 : index
    %c60_922 = arith.constant 60 : index
    %489 = vector.load %arg11[%c40_921, %c60_922] : memref<72x144xf32, #tpu.memory_space<vmem>>, vector<8x12xf32>
    tpu.vector_store %arg11[%c40_921, %c60_922], %488 {strides = array<i32>} : memref<72x144xf32, #tpu.memory_space<vmem>>, vector<8x12xf32>,
    %c0_923 = arith.constant 0 : index
    %c98_924 = arith.constant 98 : index
    %490 = vector.load %arg10[%c0_923, %c98_924] : memref<8x196xf32, #tpu.memory_space<vmem>>, vector<8x12xf32>
    %c48_925 = arith.constant 48 : index
    %c60_926 = arith.constant 60 : index
    %491 = vector.load %arg11[%c48_925, %c60_926] : memref<72x144xf32, #tpu.memory_space<vmem>>, vector<8x12xf32>
    tpu.vector_store %arg11[%c48_925, %c60_926], %490 {strides = array<i32>} : memref<72x144xf32, #tpu.memory_space<vmem>>, vector<8x12xf32>,
    %c0_927 = arith.constant 0 : index
    %c99 = arith.constant 99 : index
    %492 = vector.load %arg10[%c0_927, %c99] : memref<8x196xf32, #tpu.memory_space<vmem>>, vector<8x12xf32>
    %c56_928 = arith.constant 56 : index
    %c60_929 = arith.constant 60 : index
    %493 = vector.load %arg11[%c56_928, %c60_929] : memref<72x144xf32, #tpu.memory_space<vmem>>, vector<8x12xf32>
    tpu.vector_store %arg11[%c56_928, %c60_929], %492 {strides = array<i32>} : memref<72x144xf32, #tpu.memory_space<vmem>>, vector<8x12xf32>,
    %c0_930 = arith.constant 0 : index
    %c100 = arith.constant 100 : index
    %494 = vector.load %arg10[%c0_930, %c100] : memref<8x196xf32, #tpu.memory_space<vmem>>, vector<8x12xf32>
    %c64_931 = arith.constant 64 : index
    %c60_932 = arith.constant 60 : index
    %495 = vector.load %arg11[%c64_931, %c60_932] : memref<72x144xf32, #tpu.memory_space<vmem>>, vector<8x12xf32>
    tpu.vector_store %arg11[%c64_931, %c60_932], %494 {strides = array<i32>} : memref<72x144xf32, #tpu.memory_space<vmem>>, vector<8x12xf32>,
    %c0_933 = arith.constant 0 : index
    %c84_934 = arith.constant 84 : index
    %496 = vector.load %arg10[%c0_933, %c84_934] : memref<8x196xf32, #tpu.memory_space<vmem>>, vector<8x12xf32>
    %c0_935 = arith.constant 0 : index
    %c72_936 = arith.constant 72 : index
    %497 = vector.load %arg11[%c0_935, %c72_936] : memref<72x144xf32, #tpu.memory_space<vmem>>, vector<8x12xf32>
    tpu.vector_store %arg11[%c0_935, %c72_936], %496 {strides = array<i32>} : memref<72x144xf32, #tpu.memory_space<vmem>>, vector<8x12xf32>,
    %c0_937 = arith.constant 0 : index
    %c85_938 = arith.constant 85 : index
    %498 = vector.load %arg10[%c0_937, %c85_938] : memref<8x196xf32, #tpu.memory_space<vmem>>, vector<8x12xf32>
    %c8_939 = arith.constant 8 : index
    %c72_940 = arith.constant 72 : index
    %499 = vector.load %arg11[%c8_939, %c72_940] : memref<72x144xf32, #tpu.memory_space<vmem>>, vector<8x12xf32>
    tpu.vector_store %arg11[%c8_939, %c72_940], %498 {strides = array<i32>} : memref<72x144xf32, #tpu.memory_space<vmem>>, vector<8x12xf32>,
    %c0_941 = arith.constant 0 : index
    %c86_942 = arith.constant 86 : index
    %500 = vector.load %arg10[%c0_941, %c86_942] : memref<8x196xf32, #tpu.memory_space<vmem>>, vector<8x12xf32>
    %c16_943 = arith.constant 16 : index
    %c72_944 = arith.constant 72 : index
    %501 = vector.load %arg11[%c16_943, %c72_944] : memref<72x144xf32, #tpu.memory_space<vmem>>, vector<8x12xf32>
    tpu.vector_store %arg11[%c16_943, %c72_944], %500 {strides = array<i32>} : memref<72x144xf32, #tpu.memory_space<vmem>>, vector<8x12xf32>,
    %c0_945 = arith.constant 0 : index
    %c98_946 = arith.constant 98 : index
    %502 = vector.load %arg10[%c0_945, %c98_946] : memref<8x196xf32, #tpu.memory_space<vmem>>, vector<8x12xf32>
    %c24_947 = arith.constant 24 : index
    %c72_948 = arith.constant 72 : index
    %503 = vector.load %arg11[%c24_947, %c72_948] : memref<72x144xf32, #tpu.memory_space<vmem>>, vector<8x12xf32>
    tpu.vector_store %arg11[%c24_947, %c72_948], %502 {strides = array<i32>} : memref<72x144xf32, #tpu.memory_space<vmem>>, vector<8x12xf32>,
    %c0_949 = arith.constant 0 : index
    %c99_950 = arith.constant 99 : index
    %504 = vector.load %arg10[%c0_949, %c99_950] : memref<8x196xf32, #tpu.memory_space<vmem>>, vector<8x12xf32>
    %c32_951 = arith.constant 32 : index
    %c72_952 = arith.constant 72 : index
    %505 = vector.load %arg11[%c32_951, %c72_952] : memref<72x144xf32, #tpu.memory_space<vmem>>, vector<8x12xf32>
    tpu.vector_store %arg11[%c32_951, %c72_952], %504 {strides = array<i32>} : memref<72x144xf32, #tpu.memory_space<vmem>>, vector<8x12xf32>,
    %c0_953 = arith.constant 0 : index
    %c100_954 = arith.constant 100 : index
    %506 = vector.load %arg10[%c0_953, %c100_954] : memref<8x196xf32, #tpu.memory_space<vmem>>, vector<8x12xf32>
    %c40_955 = arith.constant 40 : index
    %c72_956 = arith.constant 72 : index
    %507 = vector.load %arg11[%c40_955, %c72_956] : memref<72x144xf32, #tpu.memory_space<vmem>>, vector<8x12xf32>
    tpu.vector_store %arg11[%c40_955, %c72_956], %506 {strides = array<i32>} : memref<72x144xf32, #tpu.memory_space<vmem>>, vector<8x12xf32>,
    %c0_957 = arith.constant 0 : index
    %c112_958 = arith.constant 112 : index
    %508 = vector.load %arg10[%c0_957, %c112_958] : memref<8x196xf32, #tpu.memory_space<vmem>>, vector<8x12xf32>
    %c48_959 = arith.constant 48 : index
    %c72_960 = arith.constant 72 : index
    %509 = vector.load %arg11[%c48_959, %c72_960] : memref<72x144xf32, #tpu.memory_space<vmem>>, vector<8x12xf32>
    tpu.vector_store %arg11[%c48_959, %c72_960], %508 {strides = array<i32>} : memref<72x144xf32, #tpu.memory_space<vmem>>, vector<8x12xf32>,
    %c0_961 = arith.constant 0 : index
    %c113 = arith.constant 113 : index
    %510 = vector.load %arg10[%c0_961, %c113] : memref<8x196xf32, #tpu.memory_space<vmem>>, vector<8x12xf32>
    %c56_962 = arith.constant 56 : index
    %c72_963 = arith.constant 72 : index
    %511 = vector.load %arg11[%c56_962, %c72_963] : memref<72x144xf32, #tpu.memory_space<vmem>>, vector<8x12xf32>
    tpu.vector_store %arg11[%c56_962, %c72_963], %510 {strides = array<i32>} : memref<72x144xf32, #tpu.memory_space<vmem>>, vector<8x12xf32>,
    %c0_964 = arith.constant 0 : index
    %c114 = arith.constant 114 : index
    %512 = vector.load %arg10[%c0_964, %c114] : memref<8x196xf32, #tpu.memory_space<vmem>>, vector<8x12xf32>
    %c64_965 = arith.constant 64 : index
    %c72_966 = arith.constant 72 : index
    %513 = vector.load %arg11[%c64_965, %c72_966] : memref<72x144xf32, #tpu.memory_space<vmem>>, vector<8x12xf32>
    tpu.vector_store %arg11[%c64_965, %c72_966], %512 {strides = array<i32>} : memref<72x144xf32, #tpu.memory_space<vmem>>, vector<8x12xf32>,
    %c0_967 = arith.constant 0 : index
    %c98_968 = arith.constant 98 : index
    %514 = vector.load %arg10[%c0_967, %c98_968] : memref<8x196xf32, #tpu.memory_space<vmem>>, vector<8x12xf32>
    %c0_969 = arith.constant 0 : index
    %c84_970 = arith.constant 84 : index
    %515 = vector.load %arg11[%c0_969, %c84_970] : memref<72x144xf32, #tpu.memory_space<vmem>>, vector<8x12xf32>
    tpu.vector_store %arg11[%c0_969, %c84_970], %514 {strides = array<i32>} : memref<72x144xf32, #tpu.memory_space<vmem>>, vector<8x12xf32>,
    %c0_971 = arith.constant 0 : index
    %c99_972 = arith.constant 99 : index
    %516 = vector.load %arg10[%c0_971, %c99_972] : memref<8x196xf32, #tpu.memory_space<vmem>>, vector<8x12xf32>
    %c8_973 = arith.constant 8 : index
    %c84_974 = arith.constant 84 : index
    %517 = vector.load %arg11[%c8_973, %c84_974] : memref<72x144xf32, #tpu.memory_space<vmem>>, vector<8x12xf32>
    tpu.vector_store %arg11[%c8_973, %c84_974], %516 {strides = array<i32>} : memref<72x144xf32, #tpu.memory_space<vmem>>, vector<8x12xf32>,
    %c0_975 = arith.constant 0 : index
    %c100_976 = arith.constant 100 : index
    %518 = vector.load %arg10[%c0_975, %c100_976] : memref<8x196xf32, #tpu.memory_space<vmem>>, vector<8x12xf32>
    %c16_977 = arith.constant 16 : index
    %c84_978 = arith.constant 84 : index
    %519 = vector.load %arg11[%c16_977, %c84_978] : memref<72x144xf32, #tpu.memory_space<vmem>>, vector<8x12xf32>
    tpu.vector_store %arg11[%c16_977, %c84_978], %518 {strides = array<i32>} : memref<72x144xf32, #tpu.memory_space<vmem>>, vector<8x12xf32>,
    %c0_979 = arith.constant 0 : index
    %c112_980 = arith.constant 112 : index
    %520 = vector.load %arg10[%c0_979, %c112_980] : memref<8x196xf32, #tpu.memory_space<vmem>>, vector<8x12xf32>
    %c24_981 = arith.constant 24 : index
    %c84_982 = arith.constant 84 : index
    %521 = vector.load %arg11[%c24_981, %c84_982] : memref<72x144xf32, #tpu.memory_space<vmem>>, vector<8x12xf32>
    tpu.vector_store %arg11[%c24_981, %c84_982], %520 {strides = array<i32>} : memref<72x144xf32, #tpu.memory_space<vmem>>, vector<8x12xf32>,
    %c0_983 = arith.constant 0 : index
    %c113_984 = arith.constant 113 : index
    %522 = vector.load %arg10[%c0_983, %c113_984] : memref<8x196xf32, #tpu.memory_space<vmem>>, vector<8x12xf32>
    %c32_985 = arith.constant 32 : index
    %c84_986 = arith.constant 84 : index
    %523 = vector.load %arg11[%c32_985, %c84_986] : memref<72x144xf32, #tpu.memory_space<vmem>>, vector<8x12xf32>
    tpu.vector_store %arg11[%c32_985, %c84_986], %522 {strides = array<i32>} : memref<72x144xf32, #tpu.memory_space<vmem>>, vector<8x12xf32>,
    %c0_987 = arith.constant 0 : index
    %c114_988 = arith.constant 114 : index
    %524 = vector.load %arg10[%c0_987, %c114_988] : memref<8x196xf32, #tpu.memory_space<vmem>>, vector<8x12xf32>
    %c40_989 = arith.constant 40 : index
    %c84_990 = arith.constant 84 : index
    %525 = vector.load %arg11[%c40_989, %c84_990] : memref<72x144xf32, #tpu.memory_space<vmem>>, vector<8x12xf32>
    tpu.vector_store %arg11[%c40_989, %c84_990], %524 {strides = array<i32>} : memref<72x144xf32, #tpu.memory_space<vmem>>, vector<8x12xf32>,
    %c0_991 = arith.constant 0 : index
    %c126_992 = arith.constant 126 : index
    %526 = vector.load %arg10[%c0_991, %c126_992] : memref<8x196xf32, #tpu.memory_space<vmem>>, vector<8x12xf32>
    %c48_993 = arith.constant 48 : index
    %c84_994 = arith.constant 84 : index
    %527 = vector.load %arg11[%c48_993, %c84_994] : memref<72x144xf32, #tpu.memory_space<vmem>>, vector<8x12xf32>
    tpu.vector_store %arg11[%c48_993, %c84_994], %526 {strides = array<i32>} : memref<72x144xf32, #tpu.memory_space<vmem>>, vector<8x12xf32>,
    %c0_995 = arith.constant 0 : index
    %c127 = arith.constant 127 : index
    %528 = vector.load %arg10[%c0_995, %c127] : memref<8x196xf32, #tpu.memory_space<vmem>>, vector<8x12xf32>
    %c56_996 = arith.constant 56 : index
    %c84_997 = arith.constant 84 : index
    %529 = vector.load %arg11[%c56_996, %c84_997] : memref<72x144xf32, #tpu.memory_space<vmem>>, vector<8x12xf32>
    tpu.vector_store %arg11[%c56_996, %c84_997], %528 {strides = array<i32>} : memref<72x144xf32, #tpu.memory_space<vmem>>, vector<8x12xf32>,
    %c0_998 = arith.constant 0 : index
    %c128 = arith.constant 128 : index
    %530 = vector.load %arg10[%c0_998, %c128] : memref<8x196xf32, #tpu.memory_space<vmem>>, vector<8x12xf32>
    %c64_999 = arith.constant 64 : index
    %c84_1000 = arith.constant 84 : index
    %531 = vector.load %arg11[%c64_999, %c84_1000] : memref<72x144xf32, #tpu.memory_space<vmem>>, vector<8x12xf32>
    tpu.vector_store %arg11[%c64_999, %c84_1000], %530 {strides = array<i32>} : memref<72x144xf32, #tpu.memory_space<vmem>>, vector<8x12xf32>,
    %c0_1001 = arith.constant 0 : index
    %c112_1002 = arith.constant 112 : index
    %532 = vector.load %arg10[%c0_1001, %c112_1002] : memref<8x196xf32, #tpu.memory_space<vmem>>, vector<8x12xf32>
    %c0_1003 = arith.constant 0 : index
    %c96 = arith.constant 96 : index
    %533 = vector.load %arg11[%c0_1003, %c96] : memref<72x144xf32, #tpu.memory_space<vmem>>, vector<8x12xf32>
    tpu.vector_store %arg11[%c0_1003, %c96], %532 {strides = array<i32>} : memref<72x144xf32, #tpu.memory_space<vmem>>, vector<8x12xf32>,
    %c0_1004 = arith.constant 0 : index
    %c113_1005 = arith.constant 113 : index
    %534 = vector.load %arg10[%c0_1004, %c113_1005] : memref<8x196xf32, #tpu.memory_space<vmem>>, vector<8x12xf32>
    %c8_1006 = arith.constant 8 : index
    %c96_1007 = arith.constant 96 : index
    %535 = vector.load %arg11[%c8_1006, %c96_1007] : memref<72x144xf32, #tpu.memory_space<vmem>>, vector<8x12xf32>
    tpu.vector_store %arg11[%c8_1006, %c96_1007], %534 {strides = array<i32>} : memref<72x144xf32, #tpu.memory_space<vmem>>, vector<8x12xf32>,
    %c0_1008 = arith.constant 0 : index
    %c114_1009 = arith.constant 114 : index
    %536 = vector.load %arg10[%c0_1008, %c114_1009] : memref<8x196xf32, #tpu.memory_space<vmem>>, vector<8x12xf32>
    %c16_1010 = arith.constant 16 : index
    %c96_1011 = arith.constant 96 : index
    %537 = vector.load %arg11[%c16_1010, %c96_1011] : memref<72x144xf32, #tpu.memory_space<vmem>>, vector<8x12xf32>
    tpu.vector_store %arg11[%c16_1010, %c96_1011], %536 {strides = array<i32>} : memref<72x144xf32, #tpu.memory_space<vmem>>, vector<8x12xf32>,
    %c0_1012 = arith.constant 0 : index
    %c126_1013 = arith.constant 126 : index
    %538 = vector.load %arg10[%c0_1012, %c126_1013] : memref<8x196xf32, #tpu.memory_space<vmem>>, vector<8x12xf32>
    %c24_1014 = arith.constant 24 : index
    %c96_1015 = arith.constant 96 : index
    %539 = vector.load %arg11[%c24_1014, %c96_1015] : memref<72x144xf32, #tpu.memory_space<vmem>>, vector<8x12xf32>
    tpu.vector_store %arg11[%c24_1014, %c96_1015], %538 {strides = array<i32>} : memref<72x144xf32, #tpu.memory_space<vmem>>, vector<8x12xf32>,
    %c0_1016 = arith.constant 0 : index
    %c127_1017 = arith.constant 127 : index
    %540 = vector.load %arg10[%c0_1016, %c127_1017] : memref<8x196xf32, #tpu.memory_space<vmem>>, vector<8x12xf32>
    %c32_1018 = arith.constant 32 : index
    %c96_1019 = arith.constant 96 : index
    %541 = vector.load %arg11[%c32_1018, %c96_1019] : memref<72x144xf32, #tpu.memory_space<vmem>>, vector<8x12xf32>
    tpu.vector_store %arg11[%c32_1018, %c96_1019], %540 {strides = array<i32>} : memref<72x144xf32, #tpu.memory_space<vmem>>, vector<8x12xf32>,
    %c0_1020 = arith.constant 0 : index
    %c128_1021 = arith.constant 128 : index
    %542 = vector.load %arg10[%c0_1020, %c128_1021] : memref<8x196xf32, #tpu.memory_space<vmem>>, vector<8x12xf32>
    %c40_1022 = arith.constant 40 : index
    %c96_1023 = arith.constant 96 : index
    %543 = vector.load %arg11[%c40_1022, %c96_1023] : memref<72x144xf32, #tpu.memory_space<vmem>>, vector<8x12xf32>
    tpu.vector_store %arg11[%c40_1022, %c96_1023], %542 {strides = array<i32>} : memref<72x144xf32, #tpu.memory_space<vmem>>, vector<8x12xf32>,
    %c0_1024 = arith.constant 0 : index
    %c140_1025 = arith.constant 140 : index
    %544 = vector.load %arg10[%c0_1024, %c140_1025] : memref<8x196xf32, #tpu.memory_space<vmem>>, vector<8x12xf32>
    %c48_1026 = arith.constant 48 : index
    %c96_1027 = arith.constant 96 : index
    %545 = vector.load %arg11[%c48_1026, %c96_1027] : memref<72x144xf32, #tpu.memory_space<vmem>>, vector<8x12xf32>
    tpu.vector_store %arg11[%c48_1026, %c96_1027], %544 {strides = array<i32>} : memref<72x144xf32, #tpu.memory_space<vmem>>, vector<8x12xf32>,
    %c0_1028 = arith.constant 0 : index
    %c141 = arith.constant 141 : index
    %546 = vector.load %arg10[%c0_1028, %c141] : memref<8x196xf32, #tpu.memory_space<vmem>>, vector<8x12xf32>
    %c56_1029 = arith.constant 56 : index
    %c96_1030 = arith.constant 96 : index
    %547 = vector.load %arg11[%c56_1029, %c96_1030] : memref<72x144xf32, #tpu.memory_space<vmem>>, vector<8x12xf32>
    tpu.vector_store %arg11[%c56_1029, %c96_1030], %546 {strides = array<i32>} : memref<72x144xf32, #tpu.memory_space<vmem>>, vector<8x12xf32>,
    %c0_1031 = arith.constant 0 : index
    %c142 = arith.constant 142 : index
    %548 = vector.load %arg10[%c0_1031, %c142] : memref<8x196xf32, #tpu.memory_space<vmem>>, vector<8x12xf32>
    %c64_1032 = arith.constant 64 : index
    %c96_1033 = arith.constant 96 : index
    %549 = vector.load %arg11[%c64_1032, %c96_1033] : memref<72x144xf32, #tpu.memory_space<vmem>>, vector<8x12xf32>
    tpu.vector_store %arg11[%c64_1032, %c96_1033], %548 {strides = array<i32>} : memref<72x144xf32, #tpu.memory_space<vmem>>, vector<8x12xf32>,
    %c0_1034 = arith.constant 0 : index
    %c126_1035 = arith.constant 126 : index
    %550 = vector.load %arg10[%c0_1034, %c126_1035] : memref<8x196xf32, #tpu.memory_space<vmem>>, vector<8x12xf32>
    %c0_1036 = arith.constant 0 : index
    %c108 = arith.constant 108 : index
    %551 = vector.load %arg11[%c0_1036, %c108] : memref<72x144xf32, #tpu.memory_space<vmem>>, vector<8x12xf32>
    tpu.vector_store %arg11[%c0_1036, %c108], %550 {strides = array<i32>} : memref<72x144xf32, #tpu.memory_space<vmem>>, vector<8x12xf32>,
    %c0_1037 = arith.constant 0 : index
    %c127_1038 = arith.constant 127 : index
    %552 = vector.load %arg10[%c0_1037, %c127_1038] : memref<8x196xf32, #tpu.memory_space<vmem>>, vector<8x12xf32>
    %c8_1039 = arith.constant 8 : index
    %c108_1040 = arith.constant 108 : index
    %553 = vector.load %arg11[%c8_1039, %c108_1040] : memref<72x144xf32, #tpu.memory_space<vmem>>, vector<8x12xf32>
    tpu.vector_store %arg11[%c8_1039, %c108_1040], %552 {strides = array<i32>} : memref<72x144xf32, #tpu.memory_space<vmem>>, vector<8x12xf32>,
    %c0_1041 = arith.constant 0 : index
    %c128_1042 = arith.constant 128 : index
    %554 = vector.load %arg10[%c0_1041, %c128_1042] : memref<8x196xf32, #tpu.memory_space<vmem>>, vector<8x12xf32>
    %c16_1043 = arith.constant 16 : index
    %c108_1044 = arith.constant 108 : index
    %555 = vector.load %arg11[%c16_1043, %c108_1044] : memref<72x144xf32, #tpu.memory_space<vmem>>, vector<8x12xf32>
    tpu.vector_store %arg11[%c16_1043, %c108_1044], %554 {strides = array<i32>} : memref<72x144xf32, #tpu.memory_space<vmem>>, vector<8x12xf32>,
    %c0_1045 = arith.constant 0 : index
    %c140_1046 = arith.constant 140 : index
    %556 = vector.load %arg10[%c0_1045, %c140_1046] : memref<8x196xf32, #tpu.memory_space<vmem>>, vector<8x12xf32>
    %c24_1047 = arith.constant 24 : index
    %c108_1048 = arith.constant 108 : index
    %557 = vector.load %arg11[%c24_1047, %c108_1048] : memref<72x144xf32, #tpu.memory_space<vmem>>, vector<8x12xf32>
    tpu.vector_store %arg11[%c24_1047, %c108_1048], %556 {strides = array<i32>} : memref<72x144xf32, #tpu.memory_space<vmem>>, vector<8x12xf32>,
    %c0_1049 = arith.constant 0 : index
    %c141_1050 = arith.constant 141 : index
    %558 = vector.load %arg10[%c0_1049, %c141_1050] : memref<8x196xf32, #tpu.memory_space<vmem>>, vector<8x12xf32>
    %c32_1051 = arith.constant 32 : index
    %c108_1052 = arith.constant 108 : index
    %559 = vector.load %arg11[%c32_1051, %c108_1052] : memref<72x144xf32, #tpu.memory_space<vmem>>, vector<8x12xf32>
    tpu.vector_store %arg11[%c32_1051, %c108_1052], %558 {strides = array<i32>} : memref<72x144xf32, #tpu.memory_space<vmem>>, vector<8x12xf32>,
    %c0_1053 = arith.constant 0 : index
    %c142_1054 = arith.constant 142 : index
    %560 = vector.load %arg10[%c0_1053, %c142_1054] : memref<8x196xf32, #tpu.memory_space<vmem>>, vector<8x12xf32>
    %c40_1055 = arith.constant 40 : index
    %c108_1056 = arith.constant 108 : index
    %561 = vector.load %arg11[%c40_1055, %c108_1056] : memref<72x144xf32, #tpu.memory_space<vmem>>, vector<8x12xf32>
    tpu.vector_store %arg11[%c40_1055, %c108_1056], %560 {strides = array<i32>} : memref<72x144xf32, #tpu.memory_space<vmem>>, vector<8x12xf32>,
    %c0_1057 = arith.constant 0 : index
    %c154_1058 = arith.constant 154 : index
    %562 = vector.load %arg10[%c0_1057, %c154_1058] : memref<8x196xf32, #tpu.memory_space<vmem>>, vector<8x12xf32>
    %c48_1059 = arith.constant 48 : index
    %c108_1060 = arith.constant 108 : index
    %563 = vector.load %arg11[%c48_1059, %c108_1060] : memref<72x144xf32, #tpu.memory_space<vmem>>, vector<8x12xf32>
    tpu.vector_store %arg11[%c48_1059, %c108_1060], %562 {strides = array<i32>} : memref<72x144xf32, #tpu.memory_space<vmem>>, vector<8x12xf32>,
    %c0_1061 = arith.constant 0 : index
    %c155 = arith.constant 155 : index
    %564 = vector.load %arg10[%c0_1061, %c155] : memref<8x196xf32, #tpu.memory_space<vmem>>, vector<8x12xf32>
    %c56_1062 = arith.constant 56 : index
    %c108_1063 = arith.constant 108 : index
    %565 = vector.load %arg11[%c56_1062, %c108_1063] : memref<72x144xf32, #tpu.memory_space<vmem>>, vector<8x12xf32>
    tpu.vector_store %arg11[%c56_1062, %c108_1063], %564 {strides = array<i32>} : memref<72x144xf32, #tpu.memory_space<vmem>>, vector<8x12xf32>,
    %c0_1064 = arith.constant 0 : index
    %c156 = arith.constant 156 : index
    %566 = vector.load %arg10[%c0_1064, %c156] : memref<8x196xf32, #tpu.memory_space<vmem>>, vector<8x12xf32>
    %c64_1065 = arith.constant 64 : index
    %c108_1066 = arith.constant 108 : index
    %567 = vector.load %arg11[%c64_1065, %c108_1066] : memref<72x144xf32, #tpu.memory_space<vmem>>, vector<8x12xf32>
    tpu.vector_store %arg11[%c64_1065, %c108_1066], %566 {strides = array<i32>} : memref<72x144xf32, #tpu.memory_space<vmem>>, vector<8x12xf32>,
    %c0_1067 = arith.constant 0 : index
    %c140_1068 = arith.constant 140 : index
    %568 = vector.load %arg10[%c0_1067, %c140_1068] : memref<8x196xf32, #tpu.memory_space<vmem>>, vector<8x12xf32>
    %c0_1069 = arith.constant 0 : index
    %c120 = arith.constant 120 : index
    %569 = vector.load %arg11[%c0_1069, %c120] : memref<72x144xf32, #tpu.memory_space<vmem>>, vector<8x12xf32>
    tpu.vector_store %arg11[%c0_1069, %c120], %568 {strides = array<i32>} : memref<72x144xf32, #tpu.memory_space<vmem>>, vector<8x12xf32>,
    %c0_1070 = arith.constant 0 : index
    %c141_1071 = arith.constant 141 : index
    %570 = vector.load %arg10[%c0_1070, %c141_1071] : memref<8x196xf32, #tpu.memory_space<vmem>>, vector<8x12xf32>
    %c8_1072 = arith.constant 8 : index
    %c120_1073 = arith.constant 120 : index
    %571 = vector.load %arg11[%c8_1072, %c120_1073] : memref<72x144xf32, #tpu.memory_space<vmem>>, vector<8x12xf32>
    tpu.vector_store %arg11[%c8_1072, %c120_1073], %570 {strides = array<i32>} : memref<72x144xf32, #tpu.memory_space<vmem>>, vector<8x12xf32>,
    %c0_1074 = arith.constant 0 : index
    %c142_1075 = arith.constant 142 : index
    %572 = vector.load %arg10[%c0_1074, %c142_1075] : memref<8x196xf32, #tpu.memory_space<vmem>>, vector<8x12xf32>
    %c16_1076 = arith.constant 16 : index
    %c120_1077 = arith.constant 120 : index
    %573 = vector.load %arg11[%c16_1076, %c120_1077] : memref<72x144xf32, #tpu.memory_space<vmem>>, vector<8x12xf32>
    tpu.vector_store %arg11[%c16_1076, %c120_1077], %572 {strides = array<i32>} : memref<72x144xf32, #tpu.memory_space<vmem>>, vector<8x12xf32>,
    %c0_1078 = arith.constant 0 : index
    %c154_1079 = arith.constant 154 : index
    %574 = vector.load %arg10[%c0_1078, %c154_1079] : memref<8x196xf32, #tpu.memory_space<vmem>>, vector<8x12xf32>
    %c24_1080 = arith.constant 24 : index
    %c120_1081 = arith.constant 120 : index
    %575 = vector.load %arg11[%c24_1080, %c120_1081] : memref<72x144xf32, #tpu.memory_space<vmem>>, vector<8x12xf32>
    tpu.vector_store %arg11[%c24_1080, %c120_1081], %574 {strides = array<i32>} : memref<72x144xf32, #tpu.memory_space<vmem>>, vector<8x12xf32>,
    %c0_1082 = arith.constant 0 : index
    %c155_1083 = arith.constant 155 : index
    %576 = vector.load %arg10[%c0_1082, %c155_1083] : memref<8x196xf32, #tpu.memory_space<vmem>>, vector<8x12xf32>
    %c32_1084 = arith.constant 32 : index
    %c120_1085 = arith.constant 120 : index
    %577 = vector.load %arg11[%c32_1084, %c120_1085] : memref<72x144xf32, #tpu.memory_space<vmem>>, vector<8x12xf32>
    tpu.vector_store %arg11[%c32_1084, %c120_1085], %576 {strides = array<i32>} : memref<72x144xf32, #tpu.memory_space<vmem>>, vector<8x12xf32>,
    %c0_1086 = arith.constant 0 : index
    %c156_1087 = arith.constant 156 : index
    %578 = vector.load %arg10[%c0_1086, %c156_1087] : memref<8x196xf32, #tpu.memory_space<vmem>>, vector<8x12xf32>
    %c40_1088 = arith.constant 40 : index
    %c120_1089 = arith.constant 120 : index
    %579 = vector.load %arg11[%c40_1088, %c120_1089] : memref<72x144xf32, #tpu.memory_space<vmem>>, vector<8x12xf32>
    tpu.vector_store %arg11[%c40_1088, %c120_1089], %578 {strides = array<i32>} : memref<72x144xf32, #tpu.memory_space<vmem>>, vector<8x12xf32>,
    %c0_1090 = arith.constant 0 : index
    %c168_1091 = arith.constant 168 : index
    %580 = vector.load %arg10[%c0_1090, %c168_1091] : memref<8x196xf32, #tpu.memory_space<vmem>>, vector<8x12xf32>
    %c48_1092 = arith.constant 48 : index
    %c120_1093 = arith.constant 120 : index
    %581 = vector.load %arg11[%c48_1092, %c120_1093] : memref<72x144xf32, #tpu.memory_space<vmem>>, vector<8x12xf32>
    tpu.vector_store %arg11[%c48_1092, %c120_1093], %580 {strides = array<i32>} : memref<72x144xf32, #tpu.memory_space<vmem>>, vector<8x12xf32>,
    %c0_1094 = arith.constant 0 : index
    %c169 = arith.constant 169 : index
    %582 = vector.load %arg10[%c0_1094, %c169] : memref<8x196xf32, #tpu.memory_space<vmem>>, vector<8x12xf32>
    %c56_1095 = arith.constant 56 : index
    %c120_1096 = arith.constant 120 : index
    %583 = vector.load %arg11[%c56_1095, %c120_1096] : memref<72x144xf32, #tpu.memory_space<vmem>>, vector<8x12xf32>
    tpu.vector_store %arg11[%c56_1095, %c120_1096], %582 {strides = array<i32>} : memref<72x144xf32, #tpu.memory_space<vmem>>, vector<8x12xf32>,
    %c0_1097 = arith.constant 0 : index
    %c170 = arith.constant 170 : index
    %584 = vector.load %arg10[%c0_1097, %c170] : memref<8x196xf32, #tpu.memory_space<vmem>>, vector<8x12xf32>
    %c64_1098 = arith.constant 64 : index
    %c120_1099 = arith.constant 120 : index
    %585 = vector.load %arg11[%c64_1098, %c120_1099] : memref<72x144xf32, #tpu.memory_space<vmem>>, vector<8x12xf32>
    tpu.vector_store %arg11[%c64_1098, %c120_1099], %584 {strides = array<i32>} : memref<72x144xf32, #tpu.memory_space<vmem>>, vector<8x12xf32>,
    %c0_1100 = arith.constant 0 : index
    %c154_1101 = arith.constant 154 : index
    %586 = vector.load %arg10[%c0_1100, %c154_1101] : memref<8x196xf32, #tpu.memory_space<vmem>>, vector<8x12xf32>
    %c0_1102 = arith.constant 0 : index
    %c132 = arith.constant 132 : index
    %587 = vector.load %arg11[%c0_1102, %c132] : memref<72x144xf32, #tpu.memory_space<vmem>>, vector<8x12xf32>
    tpu.vector_store %arg11[%c0_1102, %c132], %586 {strides = array<i32>} : memref<72x144xf32, #tpu.memory_space<vmem>>, vector<8x12xf32>,
    %c0_1103 = arith.constant 0 : index
    %c155_1104 = arith.constant 155 : index
    %588 = vector.load %arg10[%c0_1103, %c155_1104] : memref<8x196xf32, #tpu.memory_space<vmem>>, vector<8x12xf32>
    %c8_1105 = arith.constant 8 : index
    %c132_1106 = arith.constant 132 : index
    %589 = vector.load %arg11[%c8_1105, %c132_1106] : memref<72x144xf32, #tpu.memory_space<vmem>>, vector<8x12xf32>
    tpu.vector_store %arg11[%c8_1105, %c132_1106], %588 {strides = array<i32>} : memref<72x144xf32, #tpu.memory_space<vmem>>, vector<8x12xf32>,
    %c0_1107 = arith.constant 0 : index
    %c156_1108 = arith.constant 156 : index
    %590 = vector.load %arg10[%c0_1107, %c156_1108] : memref<8x196xf32, #tpu.memory_space<vmem>>, vector<8x12xf32>
    %c16_1109 = arith.constant 16 : index
    %c132_1110 = arith.constant 132 : index
    %591 = vector.load %arg11[%c16_1109, %c132_1110] : memref<72x144xf32, #tpu.memory_space<vmem>>, vector<8x12xf32>
    tpu.vector_store %arg11[%c16_1109, %c132_1110], %590 {strides = array<i32>} : memref<72x144xf32, #tpu.memory_space<vmem>>, vector<8x12xf32>,
    %c0_1111 = arith.constant 0 : index
    %c168_1112 = arith.constant 168 : index
    %592 = vector.load %arg10[%c0_1111, %c168_1112] : memref<8x196xf32, #tpu.memory_space<vmem>>, vector<8x12xf32>
    %c24_1113 = arith.constant 24 : index
    %c132_1114 = arith.constant 132 : index
    %593 = vector.load %arg11[%c24_1113, %c132_1114] : memref<72x144xf32, #tpu.memory_space<vmem>>, vector<8x12xf32>
    tpu.vector_store %arg11[%c24_1113, %c132_1114], %592 {strides = array<i32>} : memref<72x144xf32, #tpu.memory_space<vmem>>, vector<8x12xf32>,
    %c0_1115 = arith.constant 0 : index
    %c169_1116 = arith.constant 169 : index
    %594 = vector.load %arg10[%c0_1115, %c169_1116] : memref<8x196xf32, #tpu.memory_space<vmem>>, vector<8x12xf32>
    %c32_1117 = arith.constant 32 : index
    %c132_1118 = arith.constant 132 : index
    %595 = vector.load %arg11[%c32_1117, %c132_1118] : memref<72x144xf32, #tpu.memory_space<vmem>>, vector<8x12xf32>
    tpu.vector_store %arg11[%c32_1117, %c132_1118], %594 {strides = array<i32>} : memref<72x144xf32, #tpu.memory_space<vmem>>, vector<8x12xf32>,
    %c0_1119 = arith.constant 0 : index
    %c170_1120 = arith.constant 170 : index
    %596 = vector.load %arg10[%c0_1119, %c170_1120] : memref<8x196xf32, #tpu.memory_space<vmem>>, vector<8x12xf32>
    %c40_1121 = arith.constant 40 : index
    %c132_1122 = arith.constant 132 : index
    %597 = vector.load %arg11[%c40_1121, %c132_1122] : memref<72x144xf32, #tpu.memory_space<vmem>>, vector<8x12xf32>
    tpu.vector_store %arg11[%c40_1121, %c132_1122], %596 {strides = array<i32>} : memref<72x144xf32, #tpu.memory_space<vmem>>, vector<8x12xf32>,
    %c0_1123 = arith.constant 0 : index
    %c182_1124 = arith.constant 182 : index
    %598 = vector.load %arg10[%c0_1123, %c182_1124] : memref<8x196xf32, #tpu.memory_space<vmem>>, vector<8x12xf32>
    %c48_1125 = arith.constant 48 : index
    %c132_1126 = arith.constant 132 : index
    %599 = vector.load %arg11[%c48_1125, %c132_1126] : memref<72x144xf32, #tpu.memory_space<vmem>>, vector<8x12xf32>
    tpu.vector_store %arg11[%c48_1125, %c132_1126], %598 {strides = array<i32>} : memref<72x144xf32, #tpu.memory_space<vmem>>, vector<8x12xf32>,
    %c0_1127 = arith.constant 0 : index
    %c183 = arith.constant 183 : index
    %600 = vector.load %arg10[%c0_1127, %c183] : memref<8x196xf32, #tpu.memory_space<vmem>>, vector<8x12xf32>
    %c56_1128 = arith.constant 56 : index
    %c132_1129 = arith.constant 132 : index
    %601 = vector.load %arg11[%c56_1128, %c132_1129] : memref<72x144xf32, #tpu.memory_space<vmem>>, vector<8x12xf32>
    tpu.vector_store %arg11[%c56_1128, %c132_1129], %600 {strides = array<i32>} : memref<72x144xf32, #tpu.memory_space<vmem>>, vector<8x12xf32>,
    %c0_1130 = arith.constant 0 : index
    %c184 = arith.constant 184 : index
    %602 = vector.load %arg10[%c0_1130, %c184] : memref<8x196xf32, #tpu.memory_space<vmem>>, vector<8x12xf32>
    %c64_1131 = arith.constant 64 : index
    %c132_1132 = arith.constant 132 : index
    %603 = vector.load %arg11[%c64_1131, %c132_1132] : memref<72x144xf32, #tpu.memory_space<vmem>>, vector<8x12xf32>
    tpu.vector_store %arg11[%c64_1131, %c132_1132], %602 {strides = array<i32>} : memref<72x144xf32, #tpu.memory_space<vmem>>, vector<8x12xf32>,
    %c0_1133 = arith.constant 0 : index
    %c0_1134 = arith.constant 0 : index
    %604 = vector.load %arg4[%c0_1133, %c0_1134] : memref<16x72xbf16, #tpu.memory_space<vmem>>, vector<16x72xbf16>
    %c0_1135 = arith.constant 0 : index
    %c0_1136 = arith.constant 0 : index
    %605 = vector.load %arg11[%c0_1135, %c0_1136] : memref<72x144xf32, #tpu.memory_space<vmem>>, vector<72x144xf32>
    %606 = arith.truncf %605 : vector<72x144xf32> to vector<72x144xbf16>
    %cst_1137 = arith.constant dense<0.000000e+00> : vector<16x144xf32>
    %607 = tpu.matmul %604, %606, %cst_1137 {dimension_numbers = #tpu.dot_dimension_numbers<[1], [0], [0], [1], [0, 0, 1, 1], [], []>} : vector<16x72xbf16>, vector<72x144xbf16>, vector<16x144xf32> -> vector<16x144xf32>
    %c0_1138 = arith.constant 0 : index
    %c0_1139 = arith.constant 0 : index
    %608 = vector.load %arg5[%c0_1138, %c0_1139] : memref<16x1xf32, #tpu.memory_space<vmem>>, vector<16x1xf32>
    %609 = vector.broadcast %608 : vector<16x1xf32> to vector<16x144xf32>
    %610 = arith.addf %607, %609 : vector<16x144xf32>
    %cst_1140 = arith.constant 0.000000e+00 : f32
    %611 = vector.broadcast %cst_1140 : f32 to vector<16x144xf32>
    %612 = arith.maximumf %610, %611 : vector<16x144xf32>
    %613 = arith.truncf %612 : vector<16x144xf32> to vector<16x144xbf16>
    %c0_1141 = arith.constant 0 : index
    %c0_1142 = arith.constant 0 : index
    %614 = vector.load %arg7[%c0_1141, %c0_1142] : memref<1x10xf32, #tpu.memory_space<vmem>>, vector<1x10xf32>
    %615 = vector.extract_strided_slice %613 {offsets = [0, 0], sizes = [1, 144], strides = [1, 1]} : vector<16x144xbf16> to vector<1x144xbf16>
    %c0_1143 = arith.constant 0 : index
    %c0_1144 = arith.constant 0 : index
    %c0_1145 = arith.constant 0 : index
    %616 = vector.load %arg6[%c0_1143, %c0_1144, %c0_1145] : memref<16x144x10xbf16, #tpu.memory_space<vmem>>, vector<1x144x10xbf16>
    %617 = vector.shape_cast %616 : vector<1x144x10xbf16> to vector<144x10xbf16>
    %cst_1146 = arith.constant dense<0.000000e+00> : vector<1x10xf32>
    %618 = tpu.matmul %615, %617, %cst_1146 {dimension_numbers = #tpu.dot_dimension_numbers<[1], [0], [0], [1], [0, 0, 1, 1], [], []>} : vector<1x144xbf16>, vector<144x10xbf16>, vector<1x10xf32> -> vector<1x10xf32>
    %619 = arith.addf %614, %618 : vector<1x10xf32>
    %620 = vector.extract_strided_slice %613 {offsets = [1, 0], sizes = [1, 144], strides = [1, 1]} : vector<16x144xbf16> to vector<1x144xbf16>
    %c1_1147 = arith.constant 1 : index
    %c0_1148 = arith.constant 0 : index
    %c0_1149 = arith.constant 0 : index
    %621 = vector.load %arg6[%c1_1147, %c0_1148, %c0_1149] : memref<16x144x10xbf16, #tpu.memory_space<vmem>>, vector<1x144x10xbf16>
    %622 = vector.shape_cast %621 : vector<1x144x10xbf16> to vector<144x10xbf16>
    %cst_1150 = arith.constant dense<0.000000e+00> : vector<1x10xf32>
    %623 = tpu.matmul %620, %622, %cst_1150 {dimension_numbers = #tpu.dot_dimension_numbers<[1], [0], [0], [1], [0, 0, 1, 1], [], []>} : vector<1x144xbf16>, vector<144x10xbf16>, vector<1x10xf32> -> vector<1x10xf32>
    %624 = arith.addf %619, %623 : vector<1x10xf32>
    %625 = vector.extract_strided_slice %613 {offsets = [2, 0], sizes = [1, 144], strides = [1, 1]} : vector<16x144xbf16> to vector<1x144xbf16>
    %c2_1151 = arith.constant 2 : index
    %c0_1152 = arith.constant 0 : index
    %c0_1153 = arith.constant 0 : index
    %626 = vector.load %arg6[%c2_1151, %c0_1152, %c0_1153] : memref<16x144x10xbf16, #tpu.memory_space<vmem>>, vector<1x144x10xbf16>
    %627 = vector.shape_cast %626 : vector<1x144x10xbf16> to vector<144x10xbf16>
    %cst_1154 = arith.constant dense<0.000000e+00> : vector<1x10xf32>
    %628 = tpu.matmul %625, %627, %cst_1154 {dimension_numbers = #tpu.dot_dimension_numbers<[1], [0], [0], [1], [0, 0, 1, 1], [], []>} : vector<1x144xbf16>, vector<144x10xbf16>, vector<1x10xf32> -> vector<1x10xf32>
    %629 = arith.addf %624, %628 : vector<1x10xf32>
    %630 = vector.extract_strided_slice %613 {offsets = [3, 0], sizes = [1, 144], strides = [1, 1]} : vector<16x144xbf16> to vector<1x144xbf16>
    %c3_1155 = arith.constant 3 : index
    %c0_1156 = arith.constant 0 : index
    %c0_1157 = arith.constant 0 : index
    %631 = vector.load %arg6[%c3_1155, %c0_1156, %c0_1157] : memref<16x144x10xbf16, #tpu.memory_space<vmem>>, vector<1x144x10xbf16>
    %632 = vector.shape_cast %631 : vector<1x144x10xbf16> to vector<144x10xbf16>
    %cst_1158 = arith.constant dense<0.000000e+00> : vector<1x10xf32>
    %633 = tpu.matmul %630, %632, %cst_1158 {dimension_numbers = #tpu.dot_dimension_numbers<[1], [0], [0], [1], [0, 0, 1, 1], [], []>} : vector<1x144xbf16>, vector<144x10xbf16>, vector<1x10xf32> -> vector<1x10xf32>
    %634 = arith.addf %629, %633 : vector<1x10xf32>
    %635 = vector.extract_strided_slice %613 {offsets = [4, 0], sizes = [1, 144], strides = [1, 1]} : vector<16x144xbf16> to vector<1x144xbf16>
    %c4_1159 = arith.constant 4 : index
    %c0_1160 = arith.constant 0 : index
    %c0_1161 = arith.constant 0 : index
    %636 = vector.load %arg6[%c4_1159, %c0_1160, %c0_1161] : memref<16x144x10xbf16, #tpu.memory_space<vmem>>, vector<1x144x10xbf16>
    %637 = vector.shape_cast %636 : vector<1x144x10xbf16> to vector<144x10xbf16>
    %cst_1162 = arith.constant dense<0.000000e+00> : vector<1x10xf32>
    %638 = tpu.matmul %635, %637, %cst_1162 {dimension_numbers = #tpu.dot_dimension_numbers<[1], [0], [0], [1], [0, 0, 1, 1], [], []>} : vector<1x144xbf16>, vector<144x10xbf16>, vector<1x10xf32> -> vector<1x10xf32>
    %639 = arith.addf %634, %638 : vector<1x10xf32>
    %640 = vector.extract_strided_slice %613 {offsets = [5, 0], sizes = [1, 144], strides = [1, 1]} : vector<16x144xbf16> to vector<1x144xbf16>
    %c5_1163 = arith.constant 5 : index
    %c0_1164 = arith.constant 0 : index
    %c0_1165 = arith.constant 0 : index
    %641 = vector.load %arg6[%c5_1163, %c0_1164, %c0_1165] : memref<16x144x10xbf16, #tpu.memory_space<vmem>>, vector<1x144x10xbf16>
    %642 = vector.shape_cast %641 : vector<1x144x10xbf16> to vector<144x10xbf16>
    %cst_1166 = arith.constant dense<0.000000e+00> : vector<1x10xf32>
    %643 = tpu.matmul %640, %642, %cst_1166 {dimension_numbers = #tpu.dot_dimension_numbers<[1], [0], [0], [1], [0, 0, 1, 1], [], []>} : vector<1x144xbf16>, vector<144x10xbf16>, vector<1x10xf32> -> vector<1x10xf32>
    %644 = arith.addf %639, %643 : vector<1x10xf32>
    %645 = vector.extract_strided_slice %613 {offsets = [6, 0], sizes = [1, 144], strides = [1, 1]} : vector<16x144xbf16> to vector<1x144xbf16>
    %c6_1167 = arith.constant 6 : index
    %c0_1168 = arith.constant 0 : index
    %c0_1169 = arith.constant 0 : index
    %646 = vector.load %arg6[%c6_1167, %c0_1168, %c0_1169] : memref<16x144x10xbf16, #tpu.memory_space<vmem>>, vector<1x144x10xbf16>
    %647 = vector.shape_cast %646 : vector<1x144x10xbf16> to vector<144x10xbf16>
    %cst_1170 = arith.constant dense<0.000000e+00> : vector<1x10xf32>
    %648 = tpu.matmul %645, %647, %cst_1170 {dimension_numbers = #tpu.dot_dimension_numbers<[1], [0], [0], [1], [0, 0, 1, 1], [], []>} : vector<1x144xbf16>, vector<144x10xbf16>, vector<1x10xf32> -> vector<1x10xf32>
    %649 = arith.addf %644, %648 : vector<1x10xf32>
    %650 = vector.extract_strided_slice %613 {offsets = [7, 0], sizes = [1, 144], strides = [1, 1]} : vector<16x144xbf16> to vector<1x144xbf16>
    %c7_1171 = arith.constant 7 : index
    %c0_1172 = arith.constant 0 : index
    %c0_1173 = arith.constant 0 : index
    %651 = vector.load %arg6[%c7_1171, %c0_1172, %c0_1173] : memref<16x144x10xbf16, #tpu.memory_space<vmem>>, vector<1x144x10xbf16>
    %652 = vector.shape_cast %651 : vector<1x144x10xbf16> to vector<144x10xbf16>
    %cst_1174 = arith.constant dense<0.000000e+00> : vector<1x10xf32>
    %653 = tpu.matmul %650, %652, %cst_1174 {dimension_numbers = #tpu.dot_dimension_numbers<[1], [0], [0], [1], [0, 0, 1, 1], [], []>} : vector<1x144xbf16>, vector<144x10xbf16>, vector<1x10xf32> -> vector<1x10xf32>
    %654 = arith.addf %649, %653 : vector<1x10xf32>
    %655 = vector.extract_strided_slice %613 {offsets = [8, 0], sizes = [1, 144], strides = [1, 1]} : vector<16x144xbf16> to vector<1x144xbf16>
    %c8_1175 = arith.constant 8 : index
    %c0_1176 = arith.constant 0 : index
    %c0_1177 = arith.constant 0 : index
    %656 = vector.load %arg6[%c8_1175, %c0_1176, %c0_1177] : memref<16x144x10xbf16, #tpu.memory_space<vmem>>, vector<1x144x10xbf16>
    %657 = vector.shape_cast %656 : vector<1x144x10xbf16> to vector<144x10xbf16>
    %cst_1178 = arith.constant dense<0.000000e+00> : vector<1x10xf32>
    %658 = tpu.matmul %655, %657, %cst_1178 {dimension_numbers = #tpu.dot_dimension_numbers<[1], [0], [0], [1], [0, 0, 1, 1], [], []>} : vector<1x144xbf16>, vector<144x10xbf16>, vector<1x10xf32> -> vector<1x10xf32>
    %659 = arith.addf %654, %658 : vector<1x10xf32>
    %660 = vector.extract_strided_slice %613 {offsets = [9, 0], sizes = [1, 144], strides = [1, 1]} : vector<16x144xbf16> to vector<1x144xbf16>
    %c9_1179 = arith.constant 9 : index
    %c0_1180 = arith.constant 0 : index
    %c0_1181 = arith.constant 0 : index
    %661 = vector.load %arg6[%c9_1179, %c0_1180, %c0_1181] : memref<16x144x10xbf16, #tpu.memory_space<vmem>>, vector<1x144x10xbf16>
    %662 = vector.shape_cast %661 : vector<1x144x10xbf16> to vector<144x10xbf16>
    %cst_1182 = arith.constant dense<0.000000e+00> : vector<1x10xf32>
    %663 = tpu.matmul %660, %662, %cst_1182 {dimension_numbers = #tpu.dot_dimension_numbers<[1], [0], [0], [1], [0, 0, 1, 1], [], []>} : vector<1x144xbf16>, vector<144x10xbf16>, vector<1x10xf32> -> vector<1x10xf32>
    %664 = arith.addf %659, %663 : vector<1x10xf32>
    %665 = vector.extract_strided_slice %613 {offsets = [10, 0], sizes = [1, 144], strides = [1, 1]} : vector<16x144xbf16> to vector<1x144xbf16>
    %c10_1183 = arith.constant 10 : index
    %c0_1184 = arith.constant 0 : index
    %c0_1185 = arith.constant 0 : index
    %666 = vector.load %arg6[%c10_1183, %c0_1184, %c0_1185] : memref<16x144x10xbf16, #tpu.memory_space<vmem>>, vector<1x144x10xbf16>
    %667 = vector.shape_cast %666 : vector<1x144x10xbf16> to vector<144x10xbf16>
    %cst_1186 = arith.constant dense<0.000000e+00> : vector<1x10xf32>
    %668 = tpu.matmul %665, %667, %cst_1186 {dimension_numbers = #tpu.dot_dimension_numbers<[1], [0], [0], [1], [0, 0, 1, 1], [], []>} : vector<1x144xbf16>, vector<144x10xbf16>, vector<1x10xf32> -> vector<1x10xf32>
    %669 = arith.addf %664, %668 : vector<1x10xf32>
    %670 = vector.extract_strided_slice %613 {offsets = [11, 0], sizes = [1, 144], strides = [1, 1]} : vector<16x144xbf16> to vector<1x144xbf16>
    %c11_1187 = arith.constant 11 : index
    %c0_1188 = arith.constant 0 : index
    %c0_1189 = arith.constant 0 : index
    %671 = vector.load %arg6[%c11_1187, %c0_1188, %c0_1189] : memref<16x144x10xbf16, #tpu.memory_space<vmem>>, vector<1x144x10xbf16>
    %672 = vector.shape_cast %671 : vector<1x144x10xbf16> to vector<144x10xbf16>
    %cst_1190 = arith.constant dense<0.000000e+00> : vector<1x10xf32>
    %673 = tpu.matmul %670, %672, %cst_1190 {dimension_numbers = #tpu.dot_dimension_numbers<[1], [0], [0], [1], [0, 0, 1, 1], [], []>} : vector<1x144xbf16>, vector<144x10xbf16>, vector<1x10xf32> -> vector<1x10xf32>
    %674 = arith.addf %669, %673 : vector<1x10xf32>
    %675 = vector.extract_strided_slice %613 {offsets = [12, 0], sizes = [1, 144], strides = [1, 1]} : vector<16x144xbf16> to vector<1x144xbf16>
    %c12_1191 = arith.constant 12 : index
    %c0_1192 = arith.constant 0 : index
    %c0_1193 = arith.constant 0 : index
    %676 = vector.load %arg6[%c12_1191, %c0_1192, %c0_1193] : memref<16x144x10xbf16, #tpu.memory_space<vmem>>, vector<1x144x10xbf16>
    %677 = vector.shape_cast %676 : vector<1x144x10xbf16> to vector<144x10xbf16>
    %cst_1194 = arith.constant dense<0.000000e+00> : vector<1x10xf32>
    %678 = tpu.matmul %675, %677, %cst_1194 {dimension_numbers = #tpu.dot_dimension_numbers<[1], [0], [0], [1], [0, 0, 1, 1], [], []>} : vector<1x144xbf16>, vector<144x10xbf16>, vector<1x10xf32> -> vector<1x10xf32>
    %679 = arith.addf %674, %678 : vector<1x10xf32>
    %680 = vector.extract_strided_slice %613 {offsets = [13, 0], sizes = [1, 144], strides = [1, 1]} : vector<16x144xbf16> to vector<1x144xbf16>
    %c13_1195 = arith.constant 13 : index
    %c0_1196 = arith.constant 0 : index
    %c0_1197 = arith.constant 0 : index
    %681 = vector.load %arg6[%c13_1195, %c0_1196, %c0_1197] : memref<16x144x10xbf16, #tpu.memory_space<vmem>>, vector<1x144x10xbf16>
    %682 = vector.shape_cast %681 : vector<1x144x10xbf16> to vector<144x10xbf16>
    %cst_1198 = arith.constant dense<0.000000e+00> : vector<1x10xf32>
    %683 = tpu.matmul %680, %682, %cst_1198 {dimension_numbers = #tpu.dot_dimension_numbers<[1], [0], [0], [1], [0, 0, 1, 1], [], []>} : vector<1x144xbf16>, vector<144x10xbf16>, vector<1x10xf32> -> vector<1x10xf32>
    %684 = arith.addf %679, %683 : vector<1x10xf32>
    %685 = vector.extract_strided_slice %613 {offsets = [14, 0], sizes = [1, 144], strides = [1, 1]} : vector<16x144xbf16> to vector<1x144xbf16>
    %c14_1199 = arith.constant 14 : index
    %c0_1200 = arith.constant 0 : index
    %c0_1201 = arith.constant 0 : index
    %686 = vector.load %arg6[%c14_1199, %c0_1200, %c0_1201] : memref<16x144x10xbf16, #tpu.memory_space<vmem>>, vector<1x144x10xbf16>
    %687 = vector.shape_cast %686 : vector<1x144x10xbf16> to vector<144x10xbf16>
    %cst_1202 = arith.constant dense<0.000000e+00> : vector<1x10xf32>
    %688 = tpu.matmul %685, %687, %cst_1202 {dimension_numbers = #tpu.dot_dimension_numbers<[1], [0], [0], [1], [0, 0, 1, 1], [], []>} : vector<1x144xbf16>, vector<144x10xbf16>, vector<1x10xf32> -> vector<1x10xf32>
    %689 = arith.addf %684, %688 : vector<1x10xf32>
    %690 = vector.extract_strided_slice %613 {offsets = [15, 0], sizes = [1, 144], strides = [1, 1]} : vector<16x144xbf16> to vector<1x144xbf16>
    %c15_1203 = arith.constant 15 : index
    %c0_1204 = arith.constant 0 : index
    %c0_1205 = arith.constant 0 : index
    %691 = vector.load %arg6[%c15_1203, %c0_1204, %c0_1205] : memref<16x144x10xbf16, #tpu.memory_space<vmem>>, vector<1x144x10xbf16>
    %692 = vector.shape_cast %691 : vector<1x144x10xbf16> to vector<144x10xbf16>
    %cst_1206 = arith.constant dense<0.000000e+00> : vector<1x10xf32>
    %693 = tpu.matmul %690, %692, %cst_1206 {dimension_numbers = #tpu.dot_dimension_numbers<[1], [0], [0], [1], [0, 0, 1, 1], [], []>} : vector<1x144xbf16>, vector<144x10xbf16>, vector<1x10xf32> -> vector<1x10xf32>
    %694 = arith.addf %689, %693 : vector<1x10xf32>
    %c0_1207 = arith.constant 0 : index
    %c0_1208 = arith.constant 0 : index
    %c0_1209 = arith.constant 0 : index
    %695 = vector.load %arg8[%c0_1207, %c0_1208, %c0_1209] : memref<1x1x10xf32, #tpu.memory_space<vmem>>, vector<1x1x10xf32>
    %696 = vector.shape_cast %695 : vector<1x1x10xf32> to vector<1x10xf32>
    %697 = vector.shape_cast %694 : vector<1x10xf32> to vector<1x1x10xf32>
    tpu.vector_store %arg8[%c0_1207, %c0_1208, %c0_1209], %697 {strides = array<i32>} : memref<1x1x10xf32, #tpu.memory_space<vmem>>, vector<1x1x10xf32>,
    return
  }
  func.func @transform_0(%arg0: i32) -> (i32, i32, i32, i32) {
    %c0_i32 = arith.constant 0 : i32
    %c0_i32_0 = arith.constant 0 : i32
    %c0_i32_1 = arith.constant 0 : i32
    %c0_i32_2 = arith.constant 0 : i32
    return %arg0, %c0_i32, %c0_i32_0, %c0_i32_1 : i32, i32, i32, i32
  }
  func.func @transform_1(%arg0: i32) -> (i32, i32) {
    %c0_i32 = arith.constant 0 : i32
    %c0_i32_0 = arith.constant 0 : i32
    %c0_i32_1 = arith.constant 0 : i32
    return %c0_i32, %c0_i32_0 : i32, i32
  }
  func.func @transform_2(%arg0: i32) -> (i32, i32) {
    %c0_i32 = arith.constant 0 : i32
    %c0_i32_0 = arith.constant 0 : i32
    %c0_i32_1 = arith.constant 0 : i32
    return %c0_i32, %c0_i32_0 : i32, i32
  }
  func.func @transform_3(%arg0: i32) -> (i32, i32) {
    %c0_i32 = arith.constant 0 : i32
    %c0_i32_0 = arith.constant 0 : i32
    %c0_i32_1 = arith.constant 0 : i32
    return %c0_i32, %c0_i32_0 : i32, i32
  }
  func.func @transform_4(%arg0: i32) -> (i32, i32) {
    %c0_i32 = arith.constant 0 : i32
    %c0_i32_0 = arith.constant 0 : i32
    %c0_i32_1 = arith.constant 0 : i32
    return %c0_i32, %c0_i32_0 : i32, i32
  }
  func.func @transform_5(%arg0: i32) -> (i32, i32, i32) {
    %c0_i32 = arith.constant 0 : i32
    %c0_i32_0 = arith.constant 0 : i32
    %c0_i32_1 = arith.constant 0 : i32
    %c0_i32_2 = arith.constant 0 : i32
    return %c0_i32, %c0_i32_0, %c0_i32_1 : i32, i32, i32
  }
  func.func @transform_6(%arg0: i32) -> (i32, i32) {
    %c0_i32 = arith.constant 0 : i32
    %c0_i32_0 = arith.constant 0 : i32
    %c0_i32_1 = arith.constant 0 : i32
    return %c0_i32, %c0_i32_0 : i32, i32
  }
  func.func @transform_7(%arg0: i32) -> (i32, i32, i32) {
    %c0_i32 = arith.constant 0 : i32
    %c0_i32_0 = arith.constant 0 : i32
    %c0_i32_1 = arith.constant 0 : i32
    return %arg0, %c0_i32, %c0_i32_0 : i32, i32, i32
  }
}

</mosaic_0001>

<bundles_post_ra>
// kernel: _lambda_.1
= control target key start
LH: loop header
LB: loop body
LE: loop exit
PB: predicated region body
PF: predicated region fallthrough
CT: control target
= control target key end

     0   :  { %s6105_s0 = inlined_call_operand.hbm [shape: f32[2,1,16,16], index: 0, kind: input, shape index: {}]   ;;  %s6106_s1 = inlined_call_operand.hbm [shape: bf16[8,9], index: 1, kind: input, shape index: {}]   ;;  %s6107_s2 = inlined_call_operand.hbm [shape: f32[8,1], index: 2, kind: input, shape index: {}]   ;;  %s6108_s3 = inlined_call_operand.hbm [shape: bf16[16,72], index: 3, kind: input, shape index: {}]   ;;  %s6109_s4 = inlined_call_operand.hbm [shape: f32[16,1], index: 4, kind: input, shape index: {}]   ;;  %s6110_s5 = inlined_call_operand.hbm [shape: bf16[16,144,10], index: 5, kind: input, shape index: {}]   ;;  %s6111_s6 = inlined_call_operand.vmem [shape: f32[1,10], index: 6, kind: input, shape index: {}]   ;;  %s6112_s7 = inlined_call_operand.hbm [shape: f32[2,1,10], index: 7, kind: output, shape index: {}]  }
   0x1   :  { %6156 = sst [smem:[#allocation22_spill]] %s6106_s1 }
   0x2   :  { %12 = vsyncpa [#allocation6], 0 }
   0x3   :  { %14 = vsyncpa [#allocation6 + $0x1], 0 }
   0x4   :  { %15 = vsyncpa [#allocation9], 0 }
   0x5   :  { %16 = vsyncpa [#allocation12], 0 }
   0x6   :  { %17 = vsyncpa [#allocation15], 0 }
   0x7   :  { %18 = vsyncpa [#allocation7], 0 }
   0x8   :  { %20 = vsyncpa [#allocation7 + $0x1], 0  ;;  %s5168_s24 = smov 0   ;;  %s5170_s25 = smov 0  }
   0x9   :  { %s5172_s26 = smov 0   ;;  %s5174_s27 = smov 0  }
   0xa LB: > { %s6157_s1 = sld [smem:[#allocation22_spill]]  ;;  %s5192_s8 = sadd.s32 4294967295, %s5040_s27   ;;  %s5040_s27 = sphi %s5174_s27, %s6198_s27   ;;  %s5036_s26 = sphi %s5172_s26, %s6197_s26   ;;  %s5032_s25 = sphi %s5170_s25, %s6196_s25   ;;  %s5028_s24 = sphi %s5168_s24, %s6195_s24  }
   0xb   : > { %p3836_p0 = scmp.ge.s32.totalorder %s5040_s27, 1  ;;  %p47_p1 = scmp.eq.s32.totalorder %s5192_s8, 0 }
   0xc   : > { %p209_p2 = scmp.lt.s32.totalorder %s5040_s27, 3  ;;  %s5042_s10 = smov [#allocation8]  }
   0xd   : > { %s223_s11 = sshll.u32 %s5042_s10, 4  ;;  %s244_s14 = sshll.u32 %s6108_s3, 4  ;;  %s224_s11 = int_to_ptr.vmem [resolvable:$true] %s223_s11  ;;  %s245_s14 = int_to_ptr.hbm [resolvable:$true] %s244_s14 }
   0xe   : > { %p5197_p3 = pnand %p3836_p0, %p209_p2  ;;  %s5043_s16 = smov [#allocation11]  }
   0xf   : > { %s246_s17 = sshll.u32 %s5043_s16, 4  ;;  %s5044_s18 = smov 64   ;;  %s247_s17 = int_to_ptr.vmem [resolvable:$true] %s246_s17 }
  0x10   : > { %s221_s30 = sshll.u32 %s6157_s1, 4  ;;  %p4625_p5 = pneg %p5197_p3  ;;  %s222_s30 = int_to_ptr.hbm [resolvable:$true] %s221_s30 }
  0x11   : > { %s5045_s19 = smov 4   ;;  %s233_s22 = sshll.u32 %s6107_s2, 4  ;;  %s234_s22 = int_to_ptr.hbm [resolvable:$true] %s233_s22 }
  0x12   : > { %p5209_p6 = pnand %p4625_p5, %p47_p1  ;;  %s5046_s23 = smov [#allocation10]  }
  0x13   : > { %s235_s28 = sshll.u32 %s5046_s23, 4  ;;  %s258_s12 = sshll.u32 %s6109_s4, 4  ;;  %s236_s28 = int_to_ptr.vmem [resolvable:$true] %s235_s28  ;;  %s259_s12 = int_to_ptr.hbm [resolvable:$true] %s258_s12 }
  0x14   : > { %4628 = dma.hbm_to_vmem [thread:$0]  (!%p5209_p6), %s222_s30, 64, %s224_s11, [#allocation9]  }
  0x15   : > { %4634 = dma.hbm_to_vmem [thread:$0]  (!%p5209_p6), %s245_s14, 128, %s247_s17, [#allocation12], %s5044_s18, %s5044_s18, %s5045_s19  }
  0x16   : > { %4631 = dma.hbm_to_vmem [thread:$0]  (!%p5209_p6), %s234_s22, 128, %s236_s28, [#allocation9]  }
  0x17   : > { %s5047_s30 = smov [#allocation13]   ;;  %s6113_s13 = smov 128  }
  0x18   : > { %s260_s11 = sshll.u32 %s5047_s30, 4  ;;  %s6114_s14 = smov 8   ;;  %s261_s11 = int_to_ptr.vmem [resolvable:$true] %s260_s11 }
  0x19   : > { %4637 = dma.hbm_to_vmem [thread:$0]  (!%p5209_p6), %s259_s12, 256, %s261_s11, [#allocation12], %s6113_s13, %s6113_s13, %s6114_s14  }
  0x1a   : > { %s272_s20 = sshll.u32 %s6110_s5, 4  ;;  %s5050_s21 = smov [#allocation14]   ;;  %s273_s20 = int_to_ptr.hbm [resolvable:$true] %s272_s20 }
  0x1b   : > { %s274_s22 = sshll.u32 %s5050_s21, 4  ;;  %s3835_s23 = sadd.s32 4294967294, %s5040_s27   ;;  %s275_s22 = int_to_ptr.vmem [resolvable:$true] %s274_s22 }
  0x1c   : > { %4640 = dma.hbm_to_vmem [thread:$0]  (!%p5209_p6), %s273_s20, 18432, %s275_s22, [#allocation15], %s5044_s18, %s5044_s18, %s5045_s19  }
  0x1d   : > { %s5237_s28 = sadd.s32 1, %s5040_s27   ;;  %s33_s29 = sadd.s32 1, %s5036_s26 }
  0x1e   : > { %s30_s10 = ssub.s32 %s5040_s27, %s5237_s28  ;;  %p40_p7 = scmp.ne.s32.totalorder %s5036_s26, %s5032_s25 }
  0x1f   : > { %p31_p8 = scmp.eq.s32.totalorder %s30_s10, 0  ;;  %p41_p9 = scmp.eq.s32.totalorder %s5040_s27, 0 }
  0x20   : > { %p46_p10 = scmp.ne.s32.totalorder %s5032_s25, %s5028_s24  ;;  %p196_p11 = scmp.eq.s32.totalorder %s5192_s8, 1 }
  0x21   : > { %s5249_s12 = scalar_select %p31_p8, %s5036_s26, %s33_s29  }
  0x22   : > { %p5253_p12 = por %p47_p1, %p46_p10  ;;  %p5257_p13 = por %p196_p11, %p40_p7 }
  0x23   : > { %p202_p0 = scmp.eq.s32.totalorder %s3835_s23, 1  ;;  %p42_p2 = por %p41_p9, %p40_p7 }
  0x24   : > { %s291_s19 = sand.u32 1, %s5036_s26   ;;  %p4654_p6 = scmp.lt.s32.totalorder %s5040_s27, 2 }
  0x25   : > { %p5262_p5 = por %p202_p0, %p46_p10  ;;  %s3843_s11 = sshll.u32 %s291_s19, 4 }
  0x26   : > { %s4455_s16 = sshll.u32 %s5040_s27, 4  ;;  %s295_s29 = scalar_lea.vmem [#allocation5], %s3843_s11 }
  0x27   : > { %s300_s21 = scalar_lea.hbm %s6105_s0, %s4455_s16  ;;  %s303_s10 = sshll.u32 %s295_s29, 4  ;;  %s304_s10 = int_to_ptr.vmem [resolvable:$true] %s303_s10 }
  0x28   : > { %s301_s22 = sshll.u32 %s300_s21, 4  ;;  %p5271_p8 = pnand %p4654_p6, %p42_p2  ;;  %s302_s22 = int_to_ptr.hbm [resolvable:$true] %s301_s22 }
  0x29   : > { %s292_s13 = scalar_lea.sflag [#allocation6], %s291_s19  ;;  %s4932_s14 = sshra.s32 %s302_s22, 4  ;;  %s4933_s14 = int_to_ptr.hbm [resolvable:$true] %s4932_s14 }
  0x2a   : > { %s4934_s1 = scalar_lea.hbm %s4933_s14, 16  ;;  %p4936_p9 = pneg %p5271_p8 }
  0x2b   : > { %p4935_p7 = scmp.ne.s32.totalorder %s4933_s14, %s4934_s1  ;;  %s4939_s11 = scalar_lea.hbm %s6105_s0, 32 }
  0x2c   : > { %p4940_p0 = scmp.lt.s32.totalorder %s4933_s14, %s6105_s0  ;;  %p4941_p2 = scmp.lt.s32.totalorder %s4939_s11, %s4934_s1 }
  0x2d   : > { %p4937_p10 = pnand %p4936_p9, %p4935_p7 }
  0x2e   : > { %p4942_p6 = por %p4941_p2, %p4940_p0 }
  0x2f   : > { %p4938_p11 = pneg %p4937_p10 }
  0x31   : > { %p4943_p4 = pnand %p4942_p6, %p4938_p11 }
  0x33   : > { %4946 = shalt.err (!%p4943_p4)
}
  0x34   : > { %s6164_s19 = smov 8   ;;  %s6165_s29 = smov 128  }
  0x35   : > { %4644 = dma.hbm_to_vmem [thread:$0]  (!%p5271_p8), %s302_s22, 256, %s304_s10, %s292_s13, %s6165_s29, %s6165_s29, %s6164_s19  }
  0x36   : > { %315 = sbr.rel (%p5197_p3) target bundleno = 1462 (0x5b6), region = 48  ;;  %s5291_s16 = sand.u32 (!%p5197_p3), 1, %s5032_s25  }
  0x37   : > { %s3847_s14 = sshll.u32 (!%p5197_p3), %s5291_s16, 4  ;;  %s318_s1 = scalar_lea.sflag (!%p5197_p3), [#allocation6], %s5291_s16 }
  0x38   : > { %s5295_s17 = scalar_lea.vmem (!%p5197_p3), [#allocation5], %s3847_s14 }
  0x3b   : > { %5007 = dma.done.wait (%p5253_p12), %s318_s1, 256  }
  0x3c   : > { %5009 = vsyncadd (%p5253_p12), %s318_s1, 4294967040 }
  0x3d   : > { %5011 = dma.done.wait (%p47_p1), [#allocation9], 192  }
  0x3e   : > { %5013 = vsyncadd (%p47_p1), [#allocation9], 4294967104 }
  0x3f   : > { %5015 = dma.done.wait (%p47_p1), [#allocation12], 384  }
  0x40   : > { %5017 = vsyncadd (%p47_p1), [#allocation12], 4294966912 }
  0x41   : > { %5019 = dma.done.wait (%p47_p1), [#allocation15], 18432  }
  0x42   : > { %5021 = vsyncadd (%p47_p1), [#allocation15], 4294948864  ;;  %v395_v0 = vld [vmem:[%s5295_s17 + $0x1] sm:$0x1]  ;;  %v381_v1 = vld [vmem:[%s5295_s17] sm:$0x1] }
  0x43   : > { %s6115_s9 = smov 127   ;;  %v409_v2 = vld [vmem:[%s5295_s17 + $0x2] sm:$0x1]  ;;  %v401_v3 = vld [vmem:[%s5295_s17 + $0x1] sm:$0x1]  ;;  %s6140_s13 = smov 126  }
  0x44   : > { %397 = vrot.lane.b32.xlu1 %v395_v0, %s6115_s9  ;;  %383 = vrot.lane.b32.xlu0 %v381_v1, %s6115_s9  ;;  %v387_v4 = vld [vmem:[%s5295_s17] sm:$0x1]  ;;  %v415_v5 = vld [vmem:[%s5295_s17 + $0x2] sm:$0x1]  ;;  %s5053_s15 = smov 13   ;;  %s5054_s22 = smov 14  }
  0x45   : > { %411 = vrot.lane.b32.xlu2 %v409_v2, %s6115_s9  ;;  %v428_v6 = vld [vmem:[%s5295_s17 + $0x1] sm:$0x1]  ;;  %s5055_s10 = smov 12   ;;  %v446_v9 = vld [vmem:[%s5295_s17 + $0x2] sm:$0x1]  ;;  %s5056_s23 = smov 27  }
  0x46   : > { %v421_v7 = vld [vmem:[%s5295_s17 + $0x1] sm:$0x1]  ;;  %v440_v10 = vld [vmem:[%s5295_s17 + $0x2] sm:$0x1]  ;;  %v464_v12 = vld [vmem:[%s5295_s17 + $0x3] sm:$0x1] }
  0x47   : > { %v434_v8 = vld [vmem:[%s5295_s17 + $0x1] sm:$0x1]  ;;  %v452_v11 = vld [vmem:[%s5295_s17 + $0x2] sm:$0x1]  ;;  %v458_v13 = vld [vmem:[%s5295_s17 + $0x3] sm:$0x1] }
  0x48   : > { %v470_v14 = vld [vmem:[%s5295_s17 + $0x3] sm:$0x1]  ;;  %v483_v15 = vld [vmem:[%s5295_s17 + $0x2] sm:$0x1]  ;;  %s5057_s11 = smov 28   ;;  %s5058_s20 = smov 26  }
  0x49   : > { %v476_v16 = vld [vmem:[%s5295_s17 + $0x2] sm:$0x1]  ;;  %v501_v18 = vld [vmem:[%s5295_s17 + $0x3] sm:$0x1]  ;;  %v519_v21 = vld [vmem:[%s5295_s17 + $0x4] sm:$0x1] }
  0x4a   : > { %v489_v17 = vld [vmem:[%s5295_s17 + $0x2] sm:$0x1]  ;;  %v495_v19 = vld [vmem:[%s5295_s17 + $0x3] sm:$0x1]  ;;  %v513_v22 = vld [vmem:[%s5295_s17 + $0x4] sm:$0x1] }
  0x4b   : > { %v507_v20 = vld [vmem:[%s5295_s17 + $0x3] sm:$0x1]  ;;  %v525_v23 = vld [vmem:[%s5295_s17 + $0x4] sm:$0x1]  ;;  %s5059_s21 = smov 41   ;;  %s5060_s19 = smov 42  }
  0x4c   : > { %403 = vrot.lane.b32.xlu1 %v401_v3, %s6140_s13  ;;  %389 = vrot.lane.b32.xlu0 %v387_v4, %s6140_s13  ;;  %v538_v24 = vld [vmem:[%s5295_s17 + $0x3] sm:$0x1]  ;;  %s5061_s29 = smov 40   ;;  %v556_v27 = vld [vmem:[%s5295_s17 + $0x4] sm:$0x1]  ;;  %s5062_s14 = smov 55  }
  0x4d   : > { %417 = vrot.lane.b32.xlu2 %v415_v5, %s6140_s13  ;;  %v531_v25 = vld [vmem:[%s5295_s17 + $0x3] sm:$0x1]  ;;  %v550_v28 = vld [vmem:[%s5295_s17 + $0x4] sm:$0x1]  ;;  %v574_v30 = vld [vmem:[%s5295_s17 + $0x5] sm:$0x1] }
  0x4e   : > { %v544_v26 = vld [vmem:[%s5295_s17 + $0x3] sm:$0x1]  ;;  %v562_v29 = vld [vmem:[%s5295_s17 + $0x4] sm:$0x1]  ;;  %v568_v31 = vld [vmem:[%s5295_s17 + $0x5] sm:$0x1] }
  0x4f   : > { %v580_v32 = vld [vmem:[%s5295_s17 + $0x5] sm:$0x1]  ;;  %v593_v33 = vld [vmem:[%s5295_s17 + $0x4] sm:$0x1]  ;;  %s5063_s1 = smov 56   ;;  %vm379_vm0 = vcmask 106496  }
  0x50   : > { %v586_v34 = vld [vmem:[%s5295_s17 + $0x4] sm:$0x1]  ;;  %v611_v37 = vld [vmem:[%s5295_s17 + $0x5] sm:$0x1]  ;;  %v378_v40 = vld [vmem:[%s5295_s17] sm:$0x1] }
  0x51   : > { %v599_v35 = vld [vmem:[%s5295_s17 + $0x4] sm:$0x1]  ;;  %v605_v38 = vld [vmem:[%s5295_s17 + $0x5] sm:$0x1]  ;;  %380 = vst.msk [vmem:[#allocation2] sm:$0x1] %vm379_vm0, %v378_v40 }
  0x52   : > { %v617_v39 = vld [vmem:[%s5295_s17 + $0x5] sm:$0x1]  ;;  %v629_v42 = vld [vmem:[%s5295_s17 + $0x6] sm:$0x1]  ;;  %v393_v45 = vld [vmem:[%s5295_s17 + $0x1] sm:$0x1] }
  0x53   : > { %v623_v43 = vld [vmem:[%s5295_s17 + $0x6] sm:$0x1]  ;;  %394 = vst.msk [vmem:[#allocation2 + $0x3] sm:$0x1] %vm379_vm0, %v393_v45  ;;  %v648_v47 = vld [vmem:[%s5295_s17 + $0x5] sm:$0x1] }
  0x54   : > { %430 = vrot.lane.b32.xlu1 %v428_v6, %s5053_s15  ;;  %423 = vrot.lane.b32.xlu0 %v421_v7, %s5054_s22  ;;  %v635_v44 = vld [vmem:[%s5295_s17 + $0x6] sm:$0x1]  ;;  %v641_v48 = vld [vmem:[%s5295_s17 + $0x5] sm:$0x1]  ;;  %vm426_vm1 = vcmask 221296   ;;  %vm481_vm2 = vcmask 336096  }
  0x55   : > { %436 = vrot.lane.b32.xlu2 %v434_v8, %s5055_s10  ;;  %v654_v49 = vld [vmem:[%s5295_s17 + $0x5] sm:$0x1]  ;;  %v407_v52 = vld [vmem:[%s5295_s17 + $0x2] sm:$0x1]  ;;  %v666_v54 = vld [vmem:[%s5295_s17 + $0x6] sm:$0x1] }
  0x56   : > { %v660_v55 = vld [vmem:[%s5295_s17 + $0x6] sm:$0x1]  ;;  %408 = vst.msk [vmem:[#allocation2 + $0x6] sm:$0x1] %vm379_vm0, %v407_v52  ;;  %v684_v60 = vld [vmem:[%s5295_s17 + $0x7] sm:$0x1] }
  0x57   : > { %v672_v56 = vld [vmem:[%s5295_s17 + $0x6] sm:$0x1]  ;;  %v678_v61 = vld [vmem:[%s5295_s17 + $0x7] sm:$0x1]  ;;  %vm536_vm3 = vcmask 450896   ;;  %vm591_vm4 = vcmask 565696  }
  0x58   : > { %v690_v62 = vld [vmem:[%s5295_s17 + $0x7] sm:$0x1]  ;;  %v703_v2 = vld [vmem:[%s5295_s17 + $0x6] sm:$0x1]  ;;  %v819_v40 = vld [vmem:[%s5295_s17 + $0x8] sm:$0x1] }
  0x59   : > { %v696_v3 = vld [vmem:[%s5295_s17 + $0x6] sm:$0x1]  ;;  %v721_v8 = vld [vmem:[%s5295_s17 + $0x7] sm:$0x1]  ;;  %s5075_s9 = smov 112   ;;  %vm646_vm5 = vcmask 680496  }
  0x5a   : > { %v709_v4 = vld [vmem:[%s5295_s17 + $0x6] sm:$0x1]  ;;  %v825_v45 = vld [vmem:[%s5295_s17 + $0x9] sm:$0x1]  ;;  %v855_v52 = vld [vmem:[%s5295_s17 + $0xa] sm:$0x1] }
  0x5b   : > { %vm701_vm6 = vcmask 795296   ;;  %vm756_vm7 = vcmask 910096   ;;  %vm811_vm8 = vcmask 1024896   ;;  %vm866_vm9 = vcmask 1041392  }
  0x5c   : > { %448 = vrot.lane.b32.xlu1 %v446_v9, %s5053_s15  ;;  %442 = vrot.lane.b32.xlu0 %v440_v10, %s5054_s22  ;;  %v715_v9 = vld [vmem:[%s5295_s17 + $0x7] sm:$0x1]  ;;  %vm868_vm10 = vcmask 90112   ;;  %vm931_vm11 = vcmask 204896   ;;  %vm1163_vm12 = vcmask 1043456   ;;  %vm1164_vm13 = vcmask 1044480  }
  0x5d   : > { %454 = vrot.lane.b32.xlu2 %v452_v11, %s5055_s10  ;;  %v727_v10 = vld [vmem:[%s5295_s17 + $0x7] sm:$0x1]  ;;  %vm986_vm14 = vcmask 319696   ;;  %vm1159_vm15 = vcmask 72704  }
  0x64   : > { %466 = vrot.lane.b32.xlu1 %v464_v12, %s5053_s15  ;;  %460 = vrot.lane.b32.xlu0 %v458_v13, %s5054_s22  ;;  %s5064_s15 = smov 54   ;;  %s5065_s22 = smov 69  }
  0x65   : > { %472 = vrot.lane.b32.xlu2 %v470_v14, %s5055_s10  ;;  %v739_v14 = vld [vmem:[%s5295_s17 + $0x8] sm:$0x1] }
  0x6c   : > { %485 = vrot.lane.b32.xlu1 %v483_v15, %s5056_s23  ;;  %478 = vrot.lane.b32.xlu0 %v476_v16, %s5057_s11  ;;  %v733_v15 = vld [vmem:[%s5295_s17 + $0x8] sm:$0x1] }
  0x6d   : > { %491 = vrot.lane.b32.xlu2 %v489_v17, %s5058_s20  ;;  %v745_v16 = vld [vmem:[%s5295_s17 + $0x8] sm:$0x1] }
  0x74   : > { %503 = vrot.lane.b32.xlu1 %v501_v18, %s5056_s23  ;;  %497 = vrot.lane.b32.xlu0 %v495_v19, %s5057_s11 }
  0x75   : > { %509 = vrot.lane.b32.xlu2 %v507_v20, %s5058_s20  ;;  %v758_v20 = vld [vmem:[%s5295_s17 + $0x7] sm:$0x1] }
  0x7c   : > { %521 = vrot.lane.b32.xlu1 %v519_v21, %s5056_s23  ;;  %515 = vrot.lane.b32.xlu0 %v513_v22, %s5057_s11  ;;  %s5066_s23 = smov 70   ;;  %s5067_s11 = smov 68   ;;  %v751_v21 = vld [vmem:[%s5295_s17 + $0x7] sm:$0x1] }
  0x7d   : > { %527 = vrot.lane.b32.xlu2 %v525_v23, %s5058_s20  ;;  %v764_v22 = vld [vmem:[%s5295_s17 + $0x7] sm:$0x1] }
  0x84   : > { %540 = vrot.lane.b32.xlu1 %v538_v24, %s5059_s21  ;;  %533 = vrot.lane.b32.xlu0 %v531_v25, %s5060_s19 }
  0x85   : > { %546 = vrot.lane.b32.xlu2 %v544_v26, %s5061_s29  ;;  %v776_v26 = vld [vmem:[%s5295_s17 + $0x8] sm:$0x1] }
  0x8c   : > { %558 = vrot.lane.b32.xlu1 %v556_v27, %s5059_s21  ;;  %552 = vrot.lane.b32.xlu0 %v550_v28, %s5060_s19  ;;  %v770_v27 = vld [vmem:[%s5295_s17 + $0x8] sm:$0x1] }
  0x8d   : > { %564 = vrot.lane.b32.xlu2 %v562_v29, %s5061_s29  ;;  %v782_v28 = vld [vmem:[%s5295_s17 + $0x8] sm:$0x1] }
  0x94   : > { %576 = vrot.lane.b32.xlu1 %v574_v30, %s5059_s21  ;;  %570 = vrot.lane.b32.xlu0 %v568_v31, %s5060_s19  ;;  %s6116_s21 = smov 83   ;;  %s5069_s19 = smov 84  }
  0x95   : > { %582 = vrot.lane.b32.xlu2 %v580_v32, %s5061_s29  ;;  %v794_v32 = vld [vmem:[%s5295_s17 + $0x9] sm:$0x1] }
  0x9c   : > { %595 = vrot.lane.b32.xlu1 %v593_v33, %s5062_s14  ;;  %588 = vrot.lane.b32.xlu0 %v586_v34, %s5063_s1  ;;  %v788_v33 = vld [vmem:[%s5295_s17 + $0x9] sm:$0x1] }
  0x9d   : > { %601 = vrot.lane.b32.xlu2 %v599_v35, %s5064_s15  ;;  %v800_v34 = vld [vmem:[%s5295_s17 + $0x9] sm:$0x1] }
  0x9f   : > { %v412_v36 = vpop.permute.xlu2 %411 }
  0xa0   : > { %414 = vst.msk [vmem:[#allocation2 + $0x7] sm:$0x1] %vm379_vm0, %v412_v36 }
  0xa4   : > { %613 = vrot.lane.b32.xlu1 %v611_v37, %s5062_s14  ;;  %607 = vrot.lane.b32.xlu0 %v605_v38, %s5063_s1  ;;  %v813_v38 = vld [vmem:[%s5295_s17 + $0x8] sm:$0x1] }
  0xa5   : > { %619 = vrot.lane.b32.xlu2 %v617_v39, %s5064_s15  ;;  %v806_v39 = vld [vmem:[%s5295_s17 + $0x8] sm:$0x1] }
  0xa7   : > { %v418_v41 = vpop.permute.xlu2 %417 }
  0xa8   : > { %420 = vst.msk [vmem:[#allocation2 + $0x10] sm:$0x1] %vm379_vm0, %v418_v41 }
  0xac   : > { %631 = vrot.lane.b32.xlu1 %v629_v42, %s5062_s14  ;;  %625 = vrot.lane.b32.xlu0 %v623_v43, %s5063_s1  ;;  %s6117_s14 = smov 82   ;;  %s6145_s1 = smov 97  }
  0xad   : > { %637 = vrot.lane.b32.xlu2 %v635_v44, %s5064_s15  ;;  %v831_v44 = vld [vmem:[%s5295_s17 + $0x9] sm:$0x1] }
  0xaf   : > { %v437_v46 = vpop.permute.xlu2 %436 }
  0xb4   : > { %650 = vrot.lane.b32.xlu1 %v648_v47, %s5065_s22  ;;  %643 = vrot.lane.b32.xlu0 %v641_v48, %s5066_s23 }
  0xb5   : > { %656 = vrot.lane.b32.xlu2 %v654_v49, %s5067_s11 }
  0xb6   : > { %v398_v50 = vpop.permute.xlu1 %397  ;;  %v384_v51 = vpop.permute.xlu0 %383 }
  0xb7   : > { %400 = vst.msk [vmem:[#allocation2 + $0x4] sm:$0x1] %vm379_vm0, %v398_v50  ;;  %v455_v53 = vpop.permute.xlu2 %454  ;;  %v849_v50 = vld [vmem:[%s5295_s17 + $0xa] sm:$0x1] }
  0xb8   : > { %386 = vst.msk [vmem:[#allocation2 + $0x1] sm:$0x1] %vm379_vm0, %v384_v51  ;;  %v843_v51 = vld [vmem:[%s5295_s17 + $0xa] sm:$0x1] }
  0xbc   : > { %668 = vrot.lane.b32.xlu1 %v666_v54, %s5065_s22  ;;  %662 = vrot.lane.b32.xlu0 %v660_v55, %s5066_s23 }
  0xbd   : > { %674 = vrot.lane.b32.xlu2 %v672_v56, %s5067_s11  ;;  %v870_v56 = vld [vmem:[%s5295_s17 + $0x9] sm:$0x1] }
  0xbe   : > { %v404_v57 = vpop.permute.xlu1 %403  ;;  %v390_v58 = vpop.permute.xlu0 %389 }
  0xbf   : > { %406 = vst.msk [vmem:[#allocation2 + $0x5] sm:$0x1] %vm379_vm0, %v404_v57  ;;  %v473_v59 = vpop.permute.xlu2 %472  ;;  %v861_v57 = vld [vmem:[%s5295_s17 + $0x9] sm:$0x1] }
  0xc0   : > { %392 = vst.msk [vmem:[#allocation2 + $0x2] sm:$0x1] %vm379_vm0, %v390_v58  ;;  %v877_v58 = vld [vmem:[%s5295_s17 + $0x9] sm:$0x1]  ;;  %vm1041_vm0 = vcmask 434496  }
  0xc1   : > { %439 = vst.msk [vmem:[#allocation2 + $0x2] sm:$0x1] %vm426_vm1, %v437_v46  ;;  %v837_v46 = vld [vmem:[%s5295_s17 + $0x9] sm:$0x1] }
  0xc2   : > { %457 = vst.msk [vmem:[#allocation2 + $0x5] sm:$0x1] %vm426_vm1, %v455_v53 }
  0xc3   : > { %475 = vst.msk [vmem:[#allocation2 + $0x10] sm:$0x1] %vm426_vm1, %v473_v59 }
  0xc4   : > { %686 = vrot.lane.b32.xlu1 %v684_v60, %s5065_s22  ;;  %680 = vrot.lane.b32.xlu0 %v678_v61, %s5066_s23  ;;  %s6128_s22 = smov 98   ;;  %s6130_s23 = smov 96  }
  0xc5   : > { %692 = vrot.lane.b32.xlu2 %v690_v62, %s5067_s11  ;;  %s6136_s11 = smov 111   ;;  %v891_v62 = vld [vmem:[%s5295_s17 + $0xa] sm:$0x1] }
  0xc6   : > { %v431_v63 = vpop.permute.xlu1 %430  ;;  %v424_v0 = vpop.permute.xlu0 %423 }
  0xc7   : > { %433 = vst.msk [vmem:[#allocation2 + $0x1] sm:$0x1] %vm426_vm1, %v431_v63  ;;  %v492_v1 = vpop.permute.xlu2 %491  ;;  %v884_v63 = vld [vmem:[%s5295_s17 + $0xa] sm:$0x1] }
  0xc8   : > { %427 = vst.msk [vmem:[#allocation2] sm:$0x1] %vm426_vm1, %v424_v0  ;;  %v898_v0 = vld [vmem:[%s5295_s17 + $0xa] sm:$0x1] }
  0xc9   : > { %494 = vst.msk [vmem:[#allocation2 + $0x2] sm:$0x1] %vm481_vm2, %v492_v1 }
  0xcc   : > { %705 = vrot.lane.b32.xlu1 %v703_v2, %s6116_s21  ;;  %698 = vrot.lane.b32.xlu0 %v696_v3, %s5069_s19 }
  0xcd   : > { %711 = vrot.lane.b32.xlu2 %v709_v4, %s6117_s14  ;;  %v912_v4 = vld [vmem:[%s5295_s17 + $0xb] sm:$0x1] }
  0xce   : > { %v449_v5 = vpop.permute.xlu1 %448  ;;  %v443_v6 = vpop.permute.xlu0 %442 }
  0xcf   : > { %451 = vst.msk [vmem:[#allocation2 + $0x4] sm:$0x1] %vm426_vm1, %v449_v5  ;;  %v510_v7 = vpop.permute.xlu2 %509  ;;  %v905_v5 = vld [vmem:[%s5295_s17 + $0xb] sm:$0x1] }
  0xd0   : > { %445 = vst.msk [vmem:[#allocation2 + $0x3] sm:$0x1] %vm426_vm1, %v443_v6  ;;  %v919_v6 = vld [vmem:[%s5295_s17 + $0xb] sm:$0x1] }
  0xd1   : > { %512 = vst.msk [vmem:[#allocation2 + $0x5] sm:$0x1] %vm481_vm2, %v510_v7 }
  0xd4   : > { %723 = vrot.lane.b32.xlu1 %v721_v8, %s6116_s21  ;;  %717 = vrot.lane.b32.xlu0 %v715_v9, %s5069_s19 }
  0xd5   : > { %729 = vrot.lane.b32.xlu2 %v727_v10, %s6117_s14  ;;  %v933_v10 = vld [vmem:[%s5295_s17 + $0xa] sm:$0x1] }
  0xd6   : > { %v467_v11 = vpop.permute.xlu1 %466  ;;  %v461_v12 = vpop.permute.xlu0 %460 }
  0xd7   : > { %469 = vst.msk [vmem:[#allocation2 + $0x7] sm:$0x1] %vm426_vm1, %v467_v11  ;;  %v528_v13 = vpop.permute.xlu2 %527  ;;  %v926_v11 = vld [vmem:[%s5295_s17 + $0xa] sm:$0x1] }
  0xd8   : > { %463 = vst.msk [vmem:[#allocation2 + $0x6] sm:$0x1] %vm426_vm1, %v461_v12  ;;  %v939_v12 = vld [vmem:[%s5295_s17 + $0xa] sm:$0x1]  ;;  %vm1096_vm1 = vcmask 549296  }
  0xd9   : > { %530 = vst.msk [vmem:[#allocation2 + $0x10] sm:$0x1] %vm481_vm2, %v528_v13 }
  0xdc   : > { %741 = vrot.lane.b32.xlu1 %v739_v14, %s6116_s21  ;;  %735 = vrot.lane.b32.xlu0 %v733_v15, %s5069_s19  ;;  %s6119_s21 = smov 110  }
  0xdd   : > { %747 = vrot.lane.b32.xlu2 %v745_v16, %s6117_s14  ;;  %s6121_s14 = smov 125   ;;  %v951_v16 = vld [vmem:[%s5295_s17 + $0xb] sm:$0x1] }
  0xde   : > { %v486_v17 = vpop.permute.xlu1 %485  ;;  %v479_v18 = vpop.permute.xlu0 %478 }
  0xdf   : > { %488 = vst.msk [vmem:[#allocation2 + $0x1] sm:$0x1] %vm481_vm2, %v486_v17  ;;  %v547_v19 = vpop.permute.xlu2 %546  ;;  %v945_v17 = vld [vmem:[%s5295_s17 + $0xb] sm:$0x1] }
  0xe0   : > { %482 = vst.msk [vmem:[#allocation2] sm:$0x1] %vm481_vm2, %v479_v18  ;;  %v957_v18 = vld [vmem:[%s5295_s17 + $0xb] sm:$0x1] }
  0xe1   : > { %549 = vst.msk [vmem:[#allocation2 + $0x2] sm:$0x1] %vm536_vm3, %v547_v19 }
  0xe4   : > { %760 = vrot.lane.b32.xlu1 %v758_v20, %s6145_s1  ;;  %753 = vrot.lane.b32.xlu0 %v751_v21, %s6128_s22 }
  0xe5   : > { %766 = vrot.lane.b32.xlu2 %v764_v22, %s6130_s23  ;;  %v969_v22 = vld [vmem:[%s5295_s17 + $0xc] sm:$0x1] }
  0xe6   : > { %v504_v23 = vpop.permute.xlu1 %503  ;;  %v498_v24 = vpop.permute.xlu0 %497 }
  0xe7   : > { %506 = vst.msk [vmem:[#allocation2 + $0x4] sm:$0x1] %vm481_vm2, %v504_v23  ;;  %v565_v25 = vpop.permute.xlu2 %564  ;;  %v963_v23 = vld [vmem:[%s5295_s17 + $0xc] sm:$0x1] }
  0xe8   : > { %500 = vst.msk [vmem:[#allocation2 + $0x3] sm:$0x1] %vm481_vm2, %v498_v24  ;;  %v975_v24 = vld [vmem:[%s5295_s17 + $0xc] sm:$0x1] }
  0xe9   : > { %567 = vst.msk [vmem:[#allocation2 + $0x5] sm:$0x1] %vm536_vm3, %v565_v25 }
  0xec   : > { %778 = vrot.lane.b32.xlu1 %v776_v26, %s6145_s1  ;;  %772 = vrot.lane.b32.xlu0 %v770_v27, %s6128_s22 }
  0xed   : > { %784 = vrot.lane.b32.xlu2 %v782_v28, %s6130_s23  ;;  %v988_v28 = vld [vmem:[%s5295_s17 + $0xb] sm:$0x1] }
  0xee   : > { %v522_v29 = vpop.permute.xlu1 %521  ;;  %v516_v30 = vpop.permute.xlu0 %515 }
  0xef   : > { %524 = vst.msk [vmem:[#allocation2 + $0x7] sm:$0x1] %vm481_vm2, %v522_v29  ;;  %v583_v31 = vpop.permute.xlu2 %582  ;;  %v981_v29 = vld [vmem:[%s5295_s17 + $0xb] sm:$0x1] }
  0xf0   : > { %518 = vst.msk [vmem:[#allocation2 + $0x6] sm:$0x1] %vm481_vm2, %v516_v30  ;;  %v994_v30 = vld [vmem:[%s5295_s17 + $0xb] sm:$0x1]  ;;  %vm1205_vm2 = vcmask 97280  }
  0xf1   : > { %585 = vst.msk [vmem:[#allocation2 + $0x10] sm:$0x1] %vm536_vm3, %v583_v31 }
  0xf4   : > { %796 = vrot.lane.b32.xlu1 %v794_v32, %s6145_s1  ;;  %790 = vrot.lane.b32.xlu0 %v788_v33, %s6128_s22 }
  0xf5   : > { %802 = vrot.lane.b32.xlu2 %v800_v34, %s6130_s23  ;;  %v1006_v34 = vld [vmem:[%s5295_s17 + $0xc] sm:$0x1] }
  0xf6   : > { %v541_v35 = vpop.permute.xlu1 %540  ;;  %v534_v36 = vpop.permute.xlu0 %533 }
  0xf7   : > { %543 = vst.msk [vmem:[#allocation2 + $0x1] sm:$0x1] %vm536_vm3, %v541_v35  ;;  %v602_v37 = vpop.permute.xlu2 %601  ;;  %v1000_v35 = vld [vmem:[%s5295_s17 + $0xc] sm:$0x1] }
  0xf8   : > { %537 = vst.msk [vmem:[#allocation2] sm:$0x1] %vm536_vm3, %v534_v36  ;;  %v1012_v36 = vld [vmem:[%s5295_s17 + $0xc] sm:$0x1] }
  0xf9   : > { %604 = vst.msk [vmem:[#allocation2 + $0x2] sm:$0x1] %vm591_vm4, %v602_v37 }
  0xfc   : > { %815 = vrot.lane.b32.xlu1 %v813_v38, %s6136_s11  ;;  %808 = vrot.lane.b32.xlu0 %v806_v39, %s5075_s9 }
  0xfd   : > { %821 = vrot.lane.b32.xlu2 %v819_v40, %s6119_s21  ;;  %v1024_v40 = vld [vmem:[%s5295_s17 + $0xd] sm:$0x1] }
  0xfe   : > { %v559_v41 = vpop.permute.xlu1 %558  ;;  %v553_v42 = vpop.permute.xlu0 %552 }
  0xff   : > { %561 = vst.msk [vmem:[#allocation2 + $0x4] sm:$0x1] %vm536_vm3, %v559_v41  ;;  %v620_v43 = vpop.permute.xlu2 %619  ;;  %v1018_v41 = vld [vmem:[%s5295_s17 + $0xd] sm:$0x1] }
 0x100   : > { %555 = vst.msk [vmem:[#allocation2 + $0x3] sm:$0x1] %vm536_vm3, %v553_v42  ;;  %v1030_v42 = vld [vmem:[%s5295_s17 + $0xd] sm:$0x1] }
 0x101   : > { %622 = vst.msk [vmem:[#allocation2 + $0x5] sm:$0x1] %vm591_vm4, %v620_v43 }
 0x104   : > { %833 = vrot.lane.b32.xlu1 %v831_v44, %s6136_s11  ;;  %827 = vrot.lane.b32.xlu0 %v825_v45, %s5075_s9 }
 0x105   : > { %839 = vrot.lane.b32.xlu2 %v837_v46, %s6119_s21  ;;  %v1043_v46 = vld [vmem:[%s5295_s17 + $0xc] sm:$0x1] }
 0x106   : > { %v577_v47 = vpop.permute.xlu1 %576  ;;  %v571_v48 = vpop.permute.xlu0 %570 }
 0x107   : > { %579 = vst.msk [vmem:[#allocation2 + $0x7] sm:$0x1] %vm536_vm3, %v577_v47  ;;  %v638_v49 = vpop.permute.xlu2 %637  ;;  %v1036_v47 = vld [vmem:[%s5295_s17 + $0xc] sm:$0x1] }
 0x108   : > { %573 = vst.msk [vmem:[#allocation2 + $0x6] sm:$0x1] %vm536_vm3, %v571_v48  ;;  %v1049_v48 = vld [vmem:[%s5295_s17 + $0xc] sm:$0x1]  ;;  %vm1202_vm3 = vcmask 556032  }
 0x109   : > { %640 = vst.msk [vmem:[#allocation2 + $0x10] sm:$0x1] %vm591_vm4, %v638_v49 }
 0x10c   : > { %851 = vrot.lane.b32.xlu1 %v849_v50, %s6136_s11  ;;  %845 = vrot.lane.b32.xlu0 %v843_v51, %s5075_s9 }
 0x10d   : > { %857 = vrot.lane.b32.xlu2 %v855_v52, %s6119_s21  ;;  %s6122_s21 = smov 124   ;;  %v1061_v52 = vld [vmem:[%s5295_s17 + $0xd] sm:$0x1] }
 0x10e   : > { %v596_v53 = vpop.permute.xlu1 %595  ;;  %v589_v54 = vpop.permute.xlu0 %588 }
 0x10f   : > { %598 = vst.msk [vmem:[#allocation2 + $0x1] sm:$0x1] %vm591_vm4, %v596_v53  ;;  %v657_v55 = vpop.permute.xlu2 %656  ;;  %v1055_v53 = vld [vmem:[%s5295_s17 + $0xd] sm:$0x1] }
 0x110   : > { %592 = vst.msk [vmem:[#allocation2] sm:$0x1] %vm591_vm4, %v589_v54  ;;  %v1067_v54 = vld [vmem:[%s5295_s17 + $0xd] sm:$0x1] }
 0x111   : > { %659 = vst.msk [vmem:[#allocation2 + $0x2] sm:$0x1] %vm646_vm5, %v657_v55 }
 0x114   : > { %872 = vrot.lane.b32.xlu1 %v870_v56, %s6121_s14  ;;  %863 = vrot.lane.b32.xlu0 %v861_v57, %s6140_s13 }
 0x115   : > { %879 = vrot.lane.b32.xlu2 %v877_v58, %s6122_s21  ;;  %v1079_v58 = vld [vmem:[%s5295_s17 + $0xe] sm:$0x1] }
 0x116   : > { %v614_v59 = vpop.permute.xlu1 %613  ;;  %v608_v60 = vpop.permute.xlu0 %607 }
 0x117   : > { %616 = vst.msk [vmem:[#allocation2 + $0x4] sm:$0x1] %vm591_vm4, %v614_v59  ;;  %v675_v61 = vpop.permute.xlu2 %674  ;;  %v1073_v59 = vld [vmem:[%s5295_s17 + $0xe] sm:$0x1] }
 0x118   : > { %610 = vst.msk [vmem:[#allocation2 + $0x3] sm:$0x1] %vm591_vm4, %v608_v60  ;;  %v1085_v60 = vld [vmem:[%s5295_s17 + $0xe] sm:$0x1] }
 0x119   : > { %677 = vst.msk [vmem:[#allocation2 + $0x5] sm:$0x1] %vm646_vm5, %v675_v61 }
 0x11c   : > { %893 = vrot.lane.b32.xlu1 %v891_v62, %s6121_s14  ;;  %886 = vrot.lane.b32.xlu0 %v884_v63, %s6140_s13 }
 0x11d   : > { %900 = vrot.lane.b32.xlu2 %v898_v0, %s6122_s21  ;;  %v1098_v0 = vld [vmem:[%s5295_s17 + $0xd] sm:$0x1] }
 0x11e   : > { %v632_v1 = vpop.permute.xlu1 %631  ;;  %v626_v2 = vpop.permute.xlu0 %625 }
 0x11f   : > { %634 = vst.msk [vmem:[#allocation2 + $0x7] sm:$0x1] %vm591_vm4, %v632_v1  ;;  %v693_v3 = vpop.permute.xlu2 %692  ;;  %v1091_v1 = vld [vmem:[%s5295_s17 + $0xd] sm:$0x1] }
 0x120   : > { %628 = vst.msk [vmem:[#allocation2 + $0x6] sm:$0x1] %vm591_vm4, %v626_v2  ;;  %v1104_v2 = vld [vmem:[%s5295_s17 + $0xd] sm:$0x1]  ;;  %vm1260_vm4 = vcmask 195680  }
 0x121   : > { %695 = vst.msk [vmem:[#allocation2 + $0x10] sm:$0x1] %vm646_vm5, %v693_v3 }
 0x124   : > { %914 = vrot.lane.b32.xlu1 %v912_v4, %s6121_s14  ;;  %907 = vrot.lane.b32.xlu0 %v905_v5, %s6140_s13  ;;  %s5079_s14 = smov 11  }
 0x125   : > { %921 = vrot.lane.b32.xlu2 %v919_v6, %s6122_s21  ;;  %s5080_s21 = smov 10   ;;  %v1116_v6 = vld [vmem:[%s5295_s17 + $0xe] sm:$0x1] }
 0x126   : > { %v651_v7 = vpop.permute.xlu1 %650  ;;  %v644_v8 = vpop.permute.xlu0 %643 }
 0x127   : > { %653 = vst.msk [vmem:[#allocation2 + $0x1] sm:$0x1] %vm646_vm5, %v651_v7  ;;  %v712_v9 = vpop.permute.xlu2 %711  ;;  %v1110_v7 = vld [vmem:[%s5295_s17 + $0xe] sm:$0x1] }
 0x128   : > { %647 = vst.msk [vmem:[#allocation2] sm:$0x1] %vm646_vm5, %v644_v8  ;;  %v1122_v8 = vld [vmem:[%s5295_s17 + $0xe] sm:$0x1] }
 0x129   : > { %714 = vst.msk [vmem:[#allocation2 + $0x2] sm:$0x1] %vm701_vm6, %v712_v9 }
 0x12c   : > { %935 = vrot.lane.b32.xlu1 %v933_v10, %s5079_s14  ;;  %928 = vrot.lane.b32.xlu0 %v926_v11, %s5055_s10 }
 0x12d   : > { %941 = vrot.lane.b32.xlu2 %v939_v12, %s5080_s21  ;;  %v1134_v12 = vld [vmem:[%s5295_s17 + $0xf] sm:$0x1] }
 0x12e   : > { %v669_v13 = vpop.permute.xlu1 %668  ;;  %v663_v14 = vpop.permute.xlu0 %662 }
 0x12f   : > { %671 = vst.msk [vmem:[#allocation2 + $0x4] sm:$0x1] %vm646_vm5, %v669_v13  ;;  %v730_v15 = vpop.permute.xlu2 %729  ;;  %v1128_v13 = vld [vmem:[%s5295_s17 + $0xf] sm:$0x1] }
 0x130   : > { %665 = vst.msk [vmem:[#allocation2 + $0x3] sm:$0x1] %vm646_vm5, %v663_v14  ;;  %v1140_v14 = vld [vmem:[%s5295_s17 + $0xf] sm:$0x1]  ;;  %s6124_s17 = smov 90  }
 0x131   : > { %732 = vst.msk [vmem:[#allocation2 + $0x5] sm:$0x1] %vm701_vm6, %v730_v15 }
 0x134   : > { %953 = vrot.lane.b32.xlu1 %v951_v16, %s5079_s14  ;;  %947 = vrot.lane.b32.xlu0 %v945_v17, %s5055_s10 }
 0x135   : > { %959 = vrot.lane.b32.xlu2 %v957_v18, %s5080_s21 }
 0x136   : > { %v687_v19 = vpop.permute.xlu1 %686  ;;  %v681_v20 = vpop.permute.xlu0 %680 }
 0x137   : > { %689 = vst.msk [vmem:[#allocation2 + $0x7] sm:$0x1] %vm646_vm5, %v687_v19  ;;  %v748_v21 = vpop.permute.xlu2 %747 }
 0x138   : > { %683 = vst.msk [vmem:[#allocation2 + $0x6] sm:$0x1] %vm646_vm5, %v681_v20  ;;  %vm1315_vm5 = vcmask 294080  }
 0x139   : > { %750 = vst.msk [vmem:[#allocation2 + $0x10] sm:$0x1] %vm701_vm6, %v748_v21  ;;  %v1153_v21 = vld [vmem:[#allocation10] sm:$0xff] }
 0x13c   : > { %971 = vrot.lane.b32.xlu1 %v969_v22, %s5079_s14  ;;  %965 = vrot.lane.b32.xlu0 %v963_v23, %s5055_s10  ;;  %s5081_s14 = smov 25   ;;  %s5082_s10 = smov 24   ;;  %v5087_v22 = vmov 0  }
 0x13d   : > { %977 = vrot.lane.b32.xlu2 %v975_v24, %s5080_s21  ;;  %s5083_s21 = smov 39   ;;  %4779 = vset.pattern.permute.xlu0 %v5087_v22 }
 0x13e   : > { %v706_v25 = vpop.permute.xlu1 %705  ;;  %v699_v26 = vpop.permute.xlu0 %698  ;;  %4780 = vset.pattern.permute.xlu1 %v5087_v22  ;;  %4781 = vset.pattern.permute.xlu2 %v5087_v22 }
 0x13f   : > { %708 = vst.msk [vmem:[#allocation2 + $0x1] sm:$0x1] %vm701_vm6, %v706_v25  ;;  %v767_v27 = vpop.permute.xlu2 %766 }
 0x140   : > { %702 = vst.msk [vmem:[#allocation2] sm:$0x1] %vm701_vm6, %v699_v26  ;;  %v5088_v26 = vmov 65535  }
 0x141   : > { %769 = vst.msk [vmem:[#allocation2 + $0x2] sm:$0x1] %vm756_vm7, %v767_v27  ;;  %v1165_v27 = vsel %vm1163_vm12, 4294967295, %v5088_v26 }
 0x144   : > { %990 = vrot.lane.b32.xlu1 %v988_v28, %s5081_s14  ;;  %983 = vrot.lane.b32.xlu0 %v981_v29, %s5058_s20 }
 0x145   : > { %996 = vrot.lane.b32.xlu2 %v994_v30, %s5082_s10 }
 0x146   : > { %v724_v31 = vpop.permute.xlu1 %723  ;;  %v718_v32 = vpop.permute.xlu0 %717 }
 0x147   : > { %726 = vst.msk [vmem:[#allocation2 + $0x4] sm:$0x1] %vm701_vm6, %v724_v31  ;;  %v785_v33 = vpop.permute.xlu2 %784 }
 0x148   : > { %720 = vst.msk [vmem:[#allocation2 + $0x3] sm:$0x1] %vm701_vm6, %v718_v32  ;;  %v5616_v32 = vsel %vm1164_vm13, %v1165_v27, 0  ;;  %vm1730_vm13 = vcmask 982880  }
 0x149   : > { %787 = vst.msk [vmem:[#allocation2 + $0x5] sm:$0x1] %vm756_vm7, %v785_v33 }
 0x14c   : > { %1008 = vrot.lane.b32.xlu1 %v1006_v34, %s5081_s14  ;;  %1002 = vrot.lane.b32.xlu0 %v1000_v35, %s5058_s20 }
 0x14d   : > { %1014 = vrot.lane.b32.xlu2 %v1012_v36, %s5082_s10  ;;  %v5620_v36 = vld [vmem:[#allocation8] sm:$0xf] }
 0x14e   : > { %v742_v37 = vpop.permute.xlu1 %741  ;;  %v736_v38 = vpop.permute.xlu0 %735 }
 0x14f   : > { %744 = vst.msk [vmem:[#allocation2 + $0x7] sm:$0x1] %vm701_vm6, %v742_v37  ;;  %v803_v39 = vpop.permute.xlu2 %802 }
 0x150   : > { %738 = vst.msk [vmem:[#allocation2 + $0x6] sm:$0x1] %vm701_vm6, %v736_v38  ;;  %vm1370_vm6 = vcmask 392480  }
 0x151   : > { %805 = vst.msk [vmem:[#allocation2 + $0x10] sm:$0x1] %vm756_vm7, %v803_v39 }
 0x154   : > { %1026 = vrot.lane.b32.xlu1 %v1024_v40, %s5081_s14  ;;  %1020 = vrot.lane.b32.xlu0 %v1018_v41, %s5058_s20  ;;  %s5084_s20 = smov 38   ;;  %s5086_s14 = smov 52  }
 0x155   : > { %1032 = vrot.lane.b32.xlu2 %v1030_v42, %s5082_s10  ;;  %s6141_s10 = smov 92  }
 0x156   : > { %v761_v43 = vpop.permute.xlu1 %760  ;;  %v754_v44 = vpop.permute.xlu0 %753 }
 0x157   : > { %763 = vst.msk [vmem:[#allocation2 + $0x1] sm:$0x1] %vm756_vm7, %v761_v43  ;;  %v822_v45 = vpop.permute.xlu2 %821 }
 0x158   : > { %757 = vst.msk [vmem:[#allocation2] sm:$0x1] %vm756_vm7, %v754_v44 }
 0x159   : > { %824 = vst.msk [vmem:[#allocation2 + $0x2] sm:$0x1] %vm811_vm8, %v822_v45 }
 0x15c   : > { %1045 = vrot.lane.b32.xlu1 %v1043_v46, %s5083_s21  ;;  %1038 = vrot.lane.b32.xlu0 %v1036_v47, %s5061_s29 }
 0x15d   : > { %1051 = vrot.lane.b32.xlu2 %v1049_v48, %s5084_s20 }
 0x15e   : > { %v779_v49 = vpop.permute.xlu1 %778  ;;  %v773_v50 = vpop.permute.xlu0 %772 }
 0x15f   : > { %781 = vst.msk [vmem:[#allocation2 + $0x4] sm:$0x1] %vm756_vm7, %v779_v49  ;;  %v840_v51 = vpop.permute.xlu2 %839 }
 0x160   : > { %775 = vst.msk [vmem:[#allocation2 + $0x3] sm:$0x1] %vm756_vm7, %v773_v50 }
 0x161   : > { %842 = vst.msk [vmem:[#allocation2 + $0x5] sm:$0x1] %vm811_vm8, %v840_v51 }
 0x164   : > { %1063 = vrot.lane.b32.xlu1 %v1061_v52, %s5083_s21  ;;  %1057 = vrot.lane.b32.xlu0 %v1055_v53, %s5061_s29 }
 0x165   : > { %1069 = vrot.lane.b32.xlu2 %v1067_v54, %s5084_s20 }
 0x166   : > { %v797_v55 = vpop.permute.xlu1 %796  ;;  %v791_v56 = vpop.permute.xlu0 %790 }
 0x167   : > { %799 = vst.msk [vmem:[#allocation2 + $0x7] sm:$0x1] %vm756_vm7, %v797_v55  ;;  %v858_v57 = vpop.permute.xlu2 %857 }
 0x168   : > { %793 = vst.msk [vmem:[#allocation2 + $0x6] sm:$0x1] %vm756_vm7, %v791_v56  ;;  %vm1425_vm7 = vcmask 490880  }
 0x169   : > { %860 = vst.msk [vmem:[#allocation2 + $0x10] sm:$0x1] %vm811_vm8, %v858_v57 }
 0x16c   : > { %1081 = vrot.lane.b32.xlu1 %v1079_v58, %s5083_s21  ;;  %1075 = vrot.lane.b32.xlu0 %v1073_v59, %s5061_s29  ;;  %s5085_s29 = smov 53   ;;  %s5092_s21 = smov 88  }
 0x16d   : > { %1087 = vrot.lane.b32.xlu2 %v1085_v60, %s5084_s20  ;;  %s6126_s20 = smov 100  }
 0x16e   : > { %v816_v61 = vpop.permute.xlu1 %815  ;;  %v809_v62 = vpop.permute.xlu0 %808 }
 0x16f   : > { %818 = vst.msk [vmem:[#allocation2 + $0x1] sm:$0x1] %vm811_vm8, %v816_v61  ;;  %v880_v63 = vpop.permute.xlu2 %879 }
 0x170   : > { %812 = vst.msk [vmem:[#allocation2] sm:$0x1] %vm811_vm8, %v809_v62 }
 0x171   : > { %882 = vst.msk [vmem:[#allocation2 + $0x2] sm:$0x1] %vm866_vm9, %v880_v63 }
 0x172   : > { %883 = vst.msk [vmem:[#allocation2 + $0xa] sm:$0x1] %vm868_vm10, %v880_v63 }
 0x174   : > { %1100 = vrot.lane.b32.xlu1 %v1098_v0, %s5085_s29  ;;  %1093 = vrot.lane.b32.xlu0 %v1091_v1, %s5064_s15 }
 0x175   : > { %1106 = vrot.lane.b32.xlu2 %v1104_v2, %s5086_s14 }
 0x176   : > { %v834_v3 = vpop.permute.xlu1 %833  ;;  %v828_v4 = vpop.permute.xlu0 %827 }
 0x177   : > { %836 = vst.msk [vmem:[#allocation2 + $0x4] sm:$0x1] %vm811_vm8, %v834_v3  ;;  %v901_v5 = vpop.permute.xlu2 %900 }
 0x178   : > { %830 = vst.msk [vmem:[#allocation2 + $0x3] sm:$0x1] %vm811_vm8, %v828_v4 }
 0x179   : > { %903 = vst.msk [vmem:[#allocation2 + $0x5] sm:$0x1] %vm866_vm9, %v901_v5 }
 0x17a   : > { %904 = vst.msk [vmem:[#allocation2 + $0xd] sm:$0x1] %vm868_vm10, %v901_v5 }
 0x17c   : > { %1118 = vrot.lane.b32.xlu1 %v1116_v6, %s5085_s29  ;;  %1112 = vrot.lane.b32.xlu0 %v1110_v7, %s5064_s15 }
 0x17d   : > { %1124 = vrot.lane.b32.xlu2 %v1122_v8, %s5086_s14 }
 0x17e   : > { %v852_v9 = vpop.permute.xlu1 %851  ;;  %v846_v10 = vpop.permute.xlu0 %845 }
 0x17f   : > { %854 = vst.msk [vmem:[#allocation2 + $0x7] sm:$0x1] %vm811_vm8, %v852_v9  ;;  %v922_v11 = vpop.permute.xlu2 %921 }
 0x180   : > { %848 = vst.msk [vmem:[#allocation2 + $0x6] sm:$0x1] %vm811_vm8, %v846_v10  ;;  %vm1480_vm8 = vcmask 589280  }
 0x181   : > { %924 = vst.msk [vmem:[#allocation2 + $0x10] sm:$0x1] %vm866_vm9, %v922_v11 }
 0x182   : > { %925 = vst.msk [vmem:[#allocation2 + $0x18] sm:$0x1] %vm868_vm10, %v922_v11 }
 0x184   : > { %1136 = vrot.lane.b32.xlu1 %v1134_v12, %s5085_s29  ;;  %1130 = vrot.lane.b32.xlu0 %v1128_v13, %s5064_s15  ;;  %s6132_s15 = smov 94   ;;  %s6139_s29 = smov 99  }
 0x185   : > { %1142 = vrot.lane.b32.xlu2 %v1140_v14, %s5086_s14  ;;  %s5095_s14 = smov 86  }
 0x186   : > { %v873_v15 = vpop.permute.xlu1 %872  ;;  %v864_v16 = vpop.permute.xlu0 %863 }
 0x187   : > { %875 = vst.msk [vmem:[#allocation2 + $0x1] sm:$0x1] %vm866_vm9, %v873_v15  ;;  %v942_v17 = vpop.permute.xlu2 %941 }
 0x188   : > { %876 = vst.msk [vmem:[#allocation2 + $0x9] sm:$0x1] %vm868_vm10, %v873_v15  ;;  %v1149_v30 = vld [vmem:[#allocation2 + $0x10] sm:$0x1] }
 0x189   : > { %867 = vst.msk [vmem:[#allocation2] sm:$0x1] %vm866_vm9, %v864_v16 }
 0x18a   : > { %869 = vst.msk [vmem:[#allocation2 + $0x8] sm:$0x1] %vm868_vm10, %v864_v16 }
 0x18b   : > { %944 = vst.msk [vmem:[#allocation2 + $0xa] sm:$0x1] %vm931_vm11, %v942_v17 }
 0x18c   : > { %1156 = vperm.xlu0 %4779, %v1153_v21  }
 0x18e   : > { %v894_v18 = vpop.permute.xlu1 %893  ;;  %v887_v19 = vpop.permute.xlu0 %886 }
 0x18f   : > { %896 = vst.msk [vmem:[#allocation2 + $0x4] sm:$0x1] %vm866_vm9, %v894_v18  ;;  %v960_v20 = vpop.permute.xlu2 %959 }
 0x190   : > { %897 = vst.msk [vmem:[#allocation2 + $0xc] sm:$0x1] %vm868_vm10, %v894_v18 }
 0x191   : > { %889 = vst.msk [vmem:[#allocation2 + $0x3] sm:$0x1] %vm866_vm9, %v887_v19 }
 0x192   : > { %890 = vst.msk [vmem:[#allocation2 + $0xb] sm:$0x1] %vm868_vm10, %v887_v19 }
 0x193   : > { %962 = vst.msk [vmem:[#allocation2 + $0xd] sm:$0x1] %vm931_vm11, %v960_v20 }
 0x196   : > { %v915_v23 = vpop.permute.xlu1 %914  ;;  %v908_v24 = vpop.permute.xlu0 %907 }
 0x197   : > { %917 = vst.msk [vmem:[#allocation2 + $0x7] sm:$0x1] %vm866_vm9, %v915_v23  ;;  %v978_v25 = vpop.permute.xlu2 %977 }
 0x198   : > { %918 = vst.msk [vmem:[#allocation2 + $0xf] sm:$0x1] %vm868_vm10, %v915_v23 }
 0x199   : > { %910 = vst.msk [vmem:[#allocation2 + $0x6] sm:$0x1] %vm866_vm9, %v908_v24  ;;  %vm1535_vm9 = vcmask 687680  }
 0x19a   : > { %911 = vst.msk [vmem:[#allocation2 + $0xe] sm:$0x1] %vm868_vm10, %v908_v24  ;;  %vm1590_vm10 = vcmask 786080  }
 0x19b   : > { %980 = vst.msk [vmem:[#allocation2 + $0x18] sm:$0x1] %vm931_vm11, %v978_v25 }
 0x19e   : > { %v936_v28 = vpop.permute.xlu1 %935  ;;  %v929_v29 = vpop.permute.xlu0 %928 }
 0x19f   : > { %938 = vst.msk [vmem:[#allocation2 + $0x9] sm:$0x1] %vm931_vm11, %v936_v28  ;;  %v997_v33 = vpop.permute.xlu2 %996 }
 0x1a0   : > { %932 = vst.msk [vmem:[#allocation2 + $0x8] sm:$0x1] %vm931_vm11, %v929_v29  ;;  %v1147_v31 = vld [vmem:[#allocation2] sm:$0xff] }
 0x1a1   : > { %v1151_v34 = vpack.c.bf16 %v1149_v30, %v1147_v31  ;;  %999 = vst.msk [vmem:[#allocation2 + $0xa] sm:$0x1] %vm986_vm14, %v997_v33 }
 0x1a3   : > { %v1168_v35 = vand.u32 %v5616_v32, %v1151_v34 }
 0x1a5   : > { %1180 = vmatpush.bf16.msra.mxu0 %v1168_v35 }
 0x1a6   : > { %v954_v37 = vpop.permute.xlu1 %953  ;;  %v948_v38 = vpop.permute.xlu0 %947 }
 0x1a7   : > { %956 = vst.msk [vmem:[#allocation2 + $0xc] sm:$0x1] %vm931_vm11, %v954_v37  ;;  %v1015_v39 = vpop.permute.xlu2 %1014 }
 0x1a8   : > { %950 = vst.msk [vmem:[#allocation2 + $0xb] sm:$0x1] %vm931_vm11, %v948_v38  ;;  %3853 = vmatmul.msk.bf16.vlgmr.msra.gmra.mxu0 %vm1159_vm15, %v5620_v36 }
 0x1a9   : > { %1017 = vst.msk [vmem:[#allocation2 + $0xd] sm:$0x1] %vm986_vm14, %v1015_v39 }
 0x1ae   : > { %v972_v40 = vpop.permute.xlu1 %971  ;;  %v966_v41 = vpop.permute.xlu0 %965 }
 0x1af   : > { %974 = vst.msk [vmem:[#allocation2 + $0xf] sm:$0x1] %vm931_vm11, %v972_v40  ;;  %v1033_v42 = vpop.permute.xlu2 %1032 }
 0x1b0   : > { %968 = vst.msk [vmem:[#allocation2 + $0xe] sm:$0x1] %vm931_vm11, %v966_v41  ;;  %vm1657_vm11 = vcmask 884480  }
 0x1b1   : > { %1035 = vst.msk [vmem:[#allocation2 + $0x18] sm:$0x1] %vm986_vm14, %v1033_v42 }
 0x1b6   : > { %v991_v43 = vpop.permute.xlu1 %990  ;;  %v984_v44 = vpop.permute.xlu0 %983 }
 0x1b7   : > { %993 = vst.msk [vmem:[#allocation2 + $0x9] sm:$0x1] %vm986_vm14, %v991_v43  ;;  %v1052_v45 = vpop.permute.xlu2 %1051 }
 0x1b8   : > { %987 = vst.msk [vmem:[#allocation2 + $0x8] sm:$0x1] %vm986_vm14, %v984_v44 }
 0x1b9   : > { %1054 = vst.msk [vmem:[#allocation2 + $0xa] sm:$0x1] %vm1041_vm0, %v1052_v45 }
 0x1be   : > { %v1009_v46 = vpop.permute.xlu1 %1008  ;;  %v1003_v47 = vpop.permute.xlu0 %1002 }
 0x1bf   : > { %1011 = vst.msk [vmem:[#allocation2 + $0xc] sm:$0x1] %vm986_vm14, %v1009_v46  ;;  %v1070_v48 = vpop.permute.xlu2 %1069 }
 0x1c0   : > { %1005 = vst.msk [vmem:[#allocation2 + $0xb] sm:$0x1] %vm986_vm14, %v1003_v47 }
 0x1c1   : > { %1072 = vst.msk [vmem:[#allocation2 + $0xd] sm:$0x1] %vm1041_vm0, %v1070_v48 }
 0x1c6   : > { %v1027_v49 = vpop.permute.xlu1 %1026  ;;  %v1021_v50 = vpop.permute.xlu0 %1020 }
 0x1c7   : > { %1029 = vst.msk [vmem:[#allocation2 + $0xf] sm:$0x1] %vm986_vm14, %v1027_v49  ;;  %v1088_v51 = vpop.permute.xlu2 %1087 }
 0x1c8   : > { %1023 = vst.msk [vmem:[#allocation2 + $0xe] sm:$0x1] %vm986_vm14, %v1021_v50  ;;  %vm1791_vm14 = vcmask 1048512  }
 0x1c9   : > { %1090 = vst.msk [vmem:[#allocation2 + $0x18] sm:$0x1] %vm1041_vm0, %v1088_v51 }
 0x1ce   : > { %v1046_v52 = vpop.permute.xlu1 %1045  ;;  %v1039_v53 = vpop.permute.xlu0 %1038 }
 0x1cf   : > { %1048 = vst.msk [vmem:[#allocation2 + $0x9] sm:$0x1] %vm1041_vm0, %v1046_v52  ;;  %v1107_v54 = vpop.permute.xlu2 %1106 }
 0x1d0   : > { %1042 = vst.msk [vmem:[#allocation2 + $0x8] sm:$0x1] %vm1041_vm0, %v1039_v53 }
 0x1d1   : > { %1109 = vst.msk [vmem:[#allocation2 + $0xa] sm:$0x1] %vm1096_vm1, %v1107_v54 }
 0x1d6   : > { %v1064_v55 = vpop.permute.xlu1 %1063  ;;  %v1058_v56 = vpop.permute.xlu0 %1057 }
 0x1d7   : > { %1066 = vst.msk [vmem:[#allocation2 + $0xc] sm:$0x1] %vm1041_vm0, %v1064_v55  ;;  %v1125_v57 = vpop.permute.xlu2 %1124 }
 0x1d8   : > { %1060 = vst.msk [vmem:[#allocation2 + $0xb] sm:$0x1] %vm1041_vm0, %v1058_v56 }
 0x1d9   : > { %1127 = vst.msk [vmem:[#allocation2 + $0xd] sm:$0x1] %vm1096_vm1, %v1125_v57 }
 0x1de   : > { %v1082_v58 = vpop.permute.xlu1 %1081  ;;  %v1076_v59 = vpop.permute.xlu0 %1075 }
 0x1df   : > { %1084 = vst.msk [vmem:[#allocation2 + $0xf] sm:$0x1] %vm1041_vm0, %v1082_v58  ;;  %v1143_v60 = vpop.permute.xlu2 %1142 }
 0x1e0   : > { %1078 = vst.msk [vmem:[#allocation2 + $0xe] sm:$0x1] %vm1041_vm0, %v1076_v59  ;;  %vm1856_vm0 = vcmask 130080  }
 0x1e1   : > { %1145 = vst.msk [vmem:[#allocation2 + $0x18] sm:$0x1] %vm1096_vm1, %v1143_v60 }
 0x1e6   : > { %v1101_v61 = vpop.permute.xlu1 %1100  ;;  %v1094_v62 = vpop.permute.xlu0 %1093 }
 0x1e7   : > { %1103 = vst.msk [vmem:[#allocation2 + $0x9] sm:$0x1] %vm1096_vm1, %v1101_v61 }
 0x1e8   : > { %1097 = vst.msk [vmem:[#allocation2 + $0x8] sm:$0x1] %vm1096_vm1, %v1094_v62  ;;  %v1150_v3 = vld [vmem:[#allocation2 + $0x18] sm:$0x1] }
 0x1ee   : > { %v1119_v63 = vpop.permute.xlu1 %1118  ;;  %v1113_v0 = vpop.permute.xlu0 %1112 }
 0x1ef   : > { %1121 = vst.msk [vmem:[#allocation2 + $0xc] sm:$0x1] %vm1096_vm1, %v1119_v63 }
 0x1f0   : > { %1115 = vst.msk [vmem:[#allocation2 + $0xb] sm:$0x1] %vm1096_vm1, %v1113_v0 }
 0x1f6   : > { %v1137_v1 = vpop.permute.xlu1 %1136  ;;  %v1131_v2 = vpop.permute.xlu0 %1130 }
 0x1f7   : > { %1139 = vst.msk [vmem:[#allocation2 + $0xf] sm:$0x1] %vm1096_vm1, %v1137_v1 }
 0x1f8   : > { %1133 = vst.msk [vmem:[#allocation2 + $0xe] sm:$0x1] %vm1096_vm1, %v1131_v2  ;;  %vm1630_vm1 = vcmask 703488  }
 0x1fe   : > { %v1157_v7 = vpop.permute.xlu0 %1156 }
 0x1ff   : > { %v1148_v4 = vld [vmem:[#allocation2 + $0x8] sm:$0xff] }
 0x200   : > { %v1152_v5 = vpack.c.bf16 %v1150_v3, %v1148_v4 }
 0x202   : > { %v1171_v6 = vand.u32 %v5616_v32, %v1152_v5 }
 0x204   : > { %1193 = vmatpush.bf16.msra.mxu1 %v1171_v6 }
 0x207   : > { %3854 = vmatmul.msk.bf16.vlgmr.msra.gmra.mxu1 %vm1159_vm15, %v5620_v36  ;;  %vm1793_vm15 = vcmask 31744  }
 0x225   : > { %v1182_v8 = vpop.f32.mrf.mxu0 }
 0x226   : > { %v1183_v9 = vadd.f32 %v1182_v8, %v1157_v7 }
 0x228   : > { %v5657_v10 = vmax.f32 %v1183_v9, 0.0 }
 0x22a   : > { %1251 = vrot.lane.b32.xlu1 %v5657_v10, %s6128_s22  ;;  %1306 = vrot.lane.b32.xlu2 %v5657_v10, %s6130_s23  ;;  %1206 = vst.msk [vmem:[#allocation4] sm:$0xff] %vm1205_vm2, %v5657_v10 }
 0x22b   : > { %1471 = vrot.lane.b32.xlu0 %v5657_v10, %s6124_s17  ;;  %s6134_s17 = smov 95  }
 0x22d   : > { %v1184_v11 = vpop.f32.mrf.mxu0 }
 0x232   : > { %1361 = vrot.lane.b32.xlu1 %v5657_v10, %s6132_s15  ;;  %1416 = vrot.lane.b32.xlu2 %v5657_v10, %s6141_s10 }
 0x233   : > { %1526 = vrot.lane.b32.xlu0 %v5657_v10, %s5092_s21 }
 0x23a   : > { %1239 = vrot.lane.b32.xlu1 %v5657_v10, %s6126_s20  ;;  %1245 = vrot.lane.b32.xlu2 %v5657_v10, %s6139_s29  ;;  %s6138_s20 = smov 93   ;;  %s6143_s29 = smov 104  }
 0x23b   : > { %1581 = vrot.lane.b32.xlu0 %v5657_v10, %s5095_s14 }
 0x242   : > { %1294 = vrot.lane.b32.xlu1 %v5657_v10, %s6128_s22  ;;  %1300 = vrot.lane.b32.xlu2 %v5657_v10, %s6145_s1  ;;  %s6135_s22 = smov 113   ;;  %s6148_s1 = smov 107  }
 0x24a   : > { %1349 = vrot.lane.b32.xlu1 %v5657_v10, %s6130_s23  ;;  %1355 = vrot.lane.b32.xlu2 %v5657_v10, %s6134_s17  ;;  %s6137_s23 = smov 91   ;;  %s6154_s17 = smov 108  }
 0x252   : > { %1404 = vrot.lane.b32.xlu1 %v5657_v10, %s6132_s15  ;;  %1410 = vrot.lane.b32.xlu2 %v5657_v10, %s6138_s20  ;;  %s5100_s15 = smov 89   ;;  %s5104_s20 = smov 76  }
 0x25a   : > { %1227 = vrot.lane.b32.xlu1 %v5657_v10, %s6135_s22  ;;  %1233 = vrot.lane.b32.xlu2 %v5657_v10, %s5075_s9  ;;  %s5103_s22 = smov 85  }
 0x262   : > { %1465 = vrot.lane.b32.xlu1 %v5657_v10, %s6137_s23  ;;  %s6167_s23 = smov 110  }
 0x26a   : > { %1282 = vrot.lane.b32.xlu1 %v5657_v10, %s6136_s11  ;;  %s6166_s11 = smov 82  }
 0x272   : > { %1520 = vrot.lane.b32.xlu1 %v5657_v10, %s5100_s15  ;;  %s5102_s15 = smov 80  }
 0x27a   : > { %1343 = vrot.lane.b32.xlu1 %v5657_v10, %s6154_s17 }
 0x282   : > { %1626 = vrot.lane.b32.xlu1 %v5657_v10, %s5095_s14 }
 0x284   : > { %v1195_v12 = vpop.f32.mrf.mxu1  ;;  %v1307_v13 = vpop.permute.xlu2 %1306 }
 0x285   : > { %v1196_v14 = vadd.f32 %v1195_v12, %v1157_v7 }
 0x287   : > { %v1200_v15 = vmax.f32 %v1196_v14, 0.0 }
 0x289   : > { %1203 = vst.msk [vmem:[#allocation3 + $0x8] sm:$0xff] %vm1202_vm3, %v1200_v15  ;;  %vm1691_vm3 = vcmask 793600  }
 0x28c   : > { %v1197_v16 = vpop.f32.mrf.mxu1  ;;  %v1417_v17 = vpop.permute.xlu2 %1416 }
 0x290   : > { %v5704_v18 = vld [vmem:[#allocation3 + $0x8] sm:$0xff] }
 0x291   : > { %1648 = vrot.lane.b32.xlu0 %v5704_v18, %s5069_s19  ;;  %1782 = vrot.lane.b32.xlu2 %v5704_v18, %s5102_s15 }
 0x292   : > { %1640 = vrot.lane.b32.xlu1 %v5704_v18, %s5103_s22 }
 0x294   : > { %v1246_v19 = vpop.permute.xlu2 %1245 }
 0x295   : > { %1248 = vst.msk [vmem:[#allocation4 + $0x70] sm:$0xff] %vm1205_vm2, %v1246_v19 }
 0x299   : > { %1715 = vrot.lane.b32.xlu0 %v5704_v18, %s6166_s11  ;;  %1288 = vrot.lane.b32.xlu2 %v5657_v10, %s6167_s23 }
 0x29a   : > { %1215 = vrot.lane.b32.xlu1 %v5657_v10, %s6140_s13  ;;  %s5106_s13 = smov 78  }
 0x29c   : > { %v1252_v20 = vpop.permute.xlu1 %1251  ;;  %v1301_v21 = vpop.permute.xlu2 %1300 }
 0x29d   : > { %1254 = vst.msk [vmem:[#allocation4 + $0x80] sm:$0xff] %vm1205_vm2, %v1252_v20  ;;  %v1472_v26 = vpop.permute.xlu0 %1471 }
 0x29e   : > { %1309 = vst.msk [vmem:[#allocation4 + $0x80] sm:$0xff] %vm1260_vm4, %v1307_v13 }
 0x29f   : > { %1303 = vst.msk [vmem:[#allocation4 + $0x70] sm:$0xff] %vm1260_vm4, %v1301_v21 }
 0x2a1   : > { %1459 = vrot.lane.b32.xlu0 %v5657_v10, %s6141_s10  ;;  %1902 = vrot.lane.b32.xlu2 %v5704_v18, %s5104_s20  ;;  %s6168_s20 = smov 124   ;;  %s6169_s10 = smov 90  }
 0x2a2   : > { %1453 = vrot.lane.b32.xlu1 %v5657_v10, %s6143_s29  ;;  %s6147_s29 = smov 102  }
 0x2a4   : > { %v1362_v22 = vpop.permute.xlu1 %1361  ;;  %v1356_v23 = vpop.permute.xlu2 %1355 }
 0x2a5   : > { %1364 = vst.msk [vmem:[#allocation4 + $0x80] sm:$0xff] %vm1315_vm5, %v1362_v22  ;;  %v1527_v29 = vpop.permute.xlu0 %1526 }
 0x2a6   : > { %1358 = vst.msk [vmem:[#allocation4 + $0x70] sm:$0xff] %vm1315_vm5, %v1356_v23 }
 0x2a7   : > { %1419 = vst.msk [vmem:[#allocation4 + $0x80] sm:$0xff] %vm1370_vm6, %v1417_v17 }
 0x2a8   : > { %1474 = vst.msk [vmem:[#allocation4 + $0x80] sm:$0xff] %vm1425_vm7, %v1472_v26 }
 0x2a9   : > { %1846 = vrot.lane.b32.xlu0 %v5704_v18, %s5106_s13  ;;  %1569 = vrot.lane.b32.xlu2 %v5657_v10, %s5092_s21  ;;  %s6150_s21 = smov 109   ;;  %1529 = vst.msk [vmem:[#allocation4 + $0x80] sm:$0xff] %vm1480_vm8, %v1527_v29 }
 0x2aa   : > { %1270 = vrot.lane.b32.xlu1 %v5657_v10, %s6168_s20 }
 0x2ac   : > { %v1240_v24 = vpop.permute.xlu1 %1239  ;;  %v1411_v25 = vpop.permute.xlu2 %1410 }
 0x2ad   : > { %1242 = vst.msk [vmem:[#allocation4 + $0x60] sm:$0xff] %vm1205_vm2, %v1240_v24  ;;  %v1582_v31 = vpop.permute.xlu0 %1581 }
 0x2ae   : > { %1413 = vst.msk [vmem:[#allocation4 + $0x70] sm:$0xff] %vm1370_vm6, %v1411_v25 }
 0x2af   : > { %1584 = vst.msk [vmem:[#allocation4 + $0x80] sm:$0xff] %vm1535_vm9, %v1582_v31 }
 0x2b1   : > { %1514 = vrot.lane.b32.xlu0 %v5657_v10, %s6169_s10  ;;  %1628 = vrot.lane.b32.xlu2 %v5704_v18, %s5095_s14  ;;  %s5110_s14 = smov 87  }
 0x2b2   : > { %1508 = vrot.lane.b32.xlu1 %v5657_v10, %s6147_s29  ;;  %s5111_s29 = smov 114  }
 0x2b4   : > { %v1295_v27 = vpop.permute.xlu1 %1294  ;;  %v1234_v28 = vpop.permute.xlu2 %1233 }
 0x2b5   : > { %1297 = vst.msk [vmem:[#allocation4 + $0x60] sm:$0xff] %vm1260_vm4, %v1295_v27 }
 0x2b6   : > { %1236 = vst.msk [vmem:[#allocation4 + $0x50] sm:$0xff] %vm1205_vm2, %v1234_v28 }
 0x2b9   : > { %1337 = vrot.lane.b32.xlu0 %v5657_v10, %s6150_s21  ;;  %1392 = vrot.lane.b32.xlu2 %v5657_v10, %s6148_s1  ;;  %s6152_s1 = smov 118   ;;  %s6172_s21 = smov 126  }
 0x2ba   : > { %1832 = vrot.lane.b32.xlu1 %v5704_v18, %s5102_s15  ;;  %s5112_s15 = smov 106  }
 0x2bc   : > { %v1350_v30 = vpop.permute.xlu1 %1349 }
 0x2bd   : > { %1352 = vst.msk [vmem:[#allocation4 + $0x60] sm:$0xff] %vm1315_vm5, %v1350_v30 }
 0x2c1   : > { %1575 = vrot.lane.b32.xlu0 %v5657_v10, %s5110_s14  ;;  %1221 = vrot.lane.b32.xlu2 %v5657_v10, %s5111_s29  ;;  %s5114_s14 = smov 79  }
 0x2c2   : > { %1331 = vrot.lane.b32.xlu1 %v5657_v10, %s6167_s23 }
 0x2c4   : > { %v1405_v32 = vpop.permute.xlu1 %1404 }
 0x2c5   : > { %1407 = vst.msk [vmem:[#allocation4 + $0x60] sm:$0xff] %vm1370_vm6, %v1405_v32 }
 0x2c9   : > { %1638 = vrot.lane.b32.xlu0 %v5657_v10, %s5103_s22  ;;  %1703 = vrot.lane.b32.xlu2 %v5704_v18, %s5069_s19  ;;  %s6149_s19 = smov 105   ;;  %s6171_s22 = smov 83  }
 0x2ca   : > { %1890 = vrot.lane.b32.xlu1 %v5704_v18, %s5106_s13  ;;  %s6170_s13 = smov 97  }
 0x2cc   : > { %v1228_v33 = vpop.permute.xlu1 %1227 }
 0x2cd   : > { %1230 = vst.msk [vmem:[#allocation4 + $0x40] sm:$0xff] %vm1205_vm2, %v1228_v33 }
 0x2d1   : > { %1398 = vrot.lane.b32.xlu0 %v5657_v10, %s5112_s15  ;;  %1276 = vrot.lane.b32.xlu2 %v5657_v10, %s5075_s9 }
 0x2d2   : > { %1386 = vrot.lane.b32.xlu1 %v5657_v10, %s6154_s17  ;;  %s6181_s17 = smov 127  }
 0x2d4   : > { %v1466_v34 = vpop.permute.xlu1 %1465 }
 0x2d5   : > { %1468 = vst.msk [vmem:[#allocation4 + $0x70] sm:$0xff] %vm1425_vm7, %v1466_v34 }
 0x2d9   : > { %1447 = vrot.lane.b32.xlu0 %v5657_v10, %s6149_s19  ;;  %1770 = vrot.lane.b32.xlu2 %v5704_v18, %s6166_s11  ;;  %s5116_s11 = smov 103   ;;  %s5117_s19 = smov 101  }
 0x2da   : > { %1687 = vrot.lane.b32.xlu1 %v5657_v10, %s6170_s13 }
 0x2dc   : > { %v1283_v35 = vpop.permute.xlu1 %1282 }
 0x2dd   : > { %1285 = vst.msk [vmem:[#allocation4 + $0x40] sm:$0xff] %vm1260_vm4, %v1283_v35 }
 0x2e1   : > { %1709 = vrot.lane.b32.xlu0 %v5704_v18, %s6171_s22  ;;  %1839 = vrot.lane.b32.xlu2 %v5704_v18, %s5114_s14  ;;  %s5118_s22 = smov 81   ;;  %s5119_s14 = smov 77  }
 0x2e2   : > { %1435 = vrot.lane.b32.xlu1 %v5657_v10, %s6152_s1  ;;  %s6173_s1 = smov 104  }
 0x2e4   : > { %v1521_v36 = vpop.permute.xlu1 %1520 }
 0x2e5   : > { %1523 = vst.msk [vmem:[#allocation4 + $0x70] sm:$0xff] %vm1480_vm8, %v1521_v36 }
 0x2e9   : > { %1502 = vrot.lane.b32.xlu0 %v5657_v10, %s5116_s11  ;;  %1557 = vrot.lane.b32.xlu2 %v5657_v10, %s5117_s19  ;;  %s5120_s19 = smov 122   ;;  %s6175_s11 = smov 93  }
 0x2ea   : > { %1257 = vrot.lane.b32.xlu1 %v5657_v10, %s6172_s21  ;;  %s6174_s21 = smov 99  }
 0x2eb   : > { %v1783_v37 = vpop.permute.xlu2 %1782 }
 0x2ec   : > { %v1344_v38 = vpop.permute.xlu1 %1343 }
 0x2f1   : > { %1776 = vrot.lane.b32.xlu0 %v5704_v18, %s5118_s22  ;;  %1896 = vrot.lane.b32.xlu2 %v5704_v18, %s5119_s14  ;;  %s6176_s22 = smov 100   ;;  %s5121_s14 = smov 123  }
 0x2f2   : > { %1496 = vrot.lane.b32.xlu1 %v5657_v10, %s6173_s1 }
 0x2f3   : > { %v1289_v39 = vpop.permute.xlu2 %1288 }
 0x2f4   : > { %1291 = vst.msk [vmem:[#allocation4 + $0x50] sm:$0xff] %vm1260_vm4, %v1289_v39  ;;  %v1627_v41 = vpop.permute.xlu1 %1626 }
 0x2f5   : > { %1346 = vst.msk [vmem:[#allocation4 + $0x50] sm:$0xff] %vm1315_vm5, %v1344_v38 }
 0x2f9   : > { %1325 = vrot.lane.b32.xlu0 %v5657_v10, %s5120_s19  ;;  %1612 = vrot.lane.b32.xlu2 %v5657_v10, %s6174_s21  ;;  %s6153_s21 = smov 120  }
 0x2fa   : > { %1818 = vrot.lane.b32.xlu1 %v5704_v18, %s6175_s11  ;;  %s6177_s11 = smov 91  }
 0x2fb   : > { %v1903_v40 = vpop.permute.xlu2 %1902 }
 0x301   : > { %1563 = vrot.lane.b32.xlu0 %v5657_v10, %s6176_s22  ;;  %1689 = vrot.lane.b32.xlu2 %v5704_v18, %s6170_s13  ;;  %s6178_s13 = smov 98  }
 0x302   : > { %1319 = vrot.lane.b32.xlu1 %v5657_v10, %s5121_s14  ;;  %s6179_s14 = smov 125  }
 0x303   : > { %v1649_v42 = vpop.permute.xlu0 %1648  ;;  %v1570_v43 = vpop.permute.xlu2 %1569 }
 0x304   : > { %1651 = vst.msk [vmem:[#allocation4 + $0x80] sm:$0xff] %vm1590_vm10, %v1649_v42  ;;  %v5811_v44 = vpop.permute.xlu1 %1640 }
 0x309   : > { %1380 = vrot.lane.b32.xlu0 %v5657_v10, %s6153_s21  ;;  %1441 = vrot.lane.b32.xlu2 %v5657_v10, %s5112_s15  ;;  %s5123_s21 = smov 121  }
 0x30a   : > { %1878 = vrot.lane.b32.xlu1 %v5704_v18, %s6177_s11  ;;  %s6180_s11 = smov 95  }
 0x30b   : > { %v1716_v45 = vpop.permute.xlu0 %1715  ;;  %v1629_v46 = vpop.permute.xlu2 %1628 }
 0x30c   : > { %1718 = vst.msk [vmem:[#allocation4 + $0x80] sm:$0xff] %vm1657_vm11, %v1716_v45  ;;  %v1216_v47 = vpop.permute.xlu1 %1215  ;;  %v1631_v59 = vsel %vm1630_vm1, %v1627_v41, %v1629_v46 }
 0x30d   : > { %1218 = vst.msk [vmem:[#allocation4 + $0x20] sm:$0xff] %vm1205_vm2, %v1216_v47 }
 0x30e   : > { %1785 = vst.msk [vmem:[#allocation4 + $0x80] sm:$0xff] %vm1730_vm13, %v1783_v37 }
 0x311   : > { %1618 = vrot.lane.b32.xlu0 %v5657_v10, %s6178_s13  ;;  %1264 = vrot.lane.b32.xlu2 %v5657_v10, %s6179_s14  ;;  %s5124_s14 = smov 119  }
 0x312   : > { %1374 = vrot.lane.b32.xlu1 %v5657_v10, %s5123_s21  ;;  %s6183_s21 = smov 96  }
 0x313   : > { %v1460_v48 = vpop.permute.xlu0 %1459  ;;  %v1393_v49 = vpop.permute.xlu2 %1392 }
 0x314   : > { %1462 = vst.msk [vmem:[#allocation4 + $0x60] sm:$0xff] %vm1425_vm7, %v1460_v48  ;;  %v5828_v50 = vpop.permute.xlu1 %1453 }
 0x319   : > { %1758 = vrot.lane.b32.xlu2 %v5704_v18, %s6180_s11  ;;  %1209 = vrot.lane.b32.xlu0 %v5657_v10, %s6181_s17  ;;  %s6182_s17 = smov 92   ;;  %s5125_s11 = smov 117  }
 0x31a   : > { %1675 = vrot.lane.b32.xlu1 %v5657_v10, %s6178_s13 }
 0x31b   : > { %v1847_v51 = vpop.permute.xlu0 %1846  ;;  %v1222_v52 = vpop.permute.xlu2 %1221 }
 0x31c   : > { %1849 = vst.msk [vmem:[#allocation4 + $0x80] sm:$0xff] %vm1791_vm14, %v1847_v51  ;;  %v1271_v53 = vpop.permute.xlu1 %1270 }
 0x31d   : > { %1850 = vst.msk [vmem:[#allocation4 + $0x88] sm:$0xff] %vm1793_vm15, %v1847_v51 }
 0x31e   : > { %1905 = vst.msk [vmem:[#allocation4 + $0x88] sm:$0xff] %vm1856_vm0, %v1903_v40 }
 0x31f   : > { %1224 = vst.msk [vmem:[#allocation4 + $0x30] sm:$0xff] %vm1205_vm2, %v1222_v52 }
 0x320   : > { %1273 = vst.msk [vmem:[#allocation4 + $0x20] sm:$0xff] %vm1260_vm4, %v1271_v53 }
 0x321   : > { %1825 = vrot.lane.b32.xlu2 %v5704_v18, %s6182_s17  ;;  %1697 = vrot.lane.b32.xlu0 %v5704_v18, %s6183_s21 }
 0x322   : > { %1429 = vrot.lane.b32.xlu1 %v5657_v10, %s5124_s14  ;;  %s5126_s14 = smov 116  }
 0x323   : > { %v1515_v54 = vpop.permute.xlu0 %1514  ;;  %v1704_v55 = vpop.permute.xlu2 %1703  ;;  %v1924_v56 = vld [vmem:[#allocation4 + $0x80] sm:$0xff] }
 0x324   : > { %1517 = vst.msk [vmem:[#allocation4 + $0x60] sm:$0xff] %vm1480_vm8, %v1515_v54  ;;  %v1509_v57 = vpop.permute.xlu1 %1508  ;;  %v1934_v58 = vpack.c.bf16 %v1924_v56, %v1924_v56 }
 0x325   : > { %1572 = vst.msk [vmem:[#allocation4 + $0x60] sm:$0xff] %vm1535_vm9, %v1570_v43  ;;  %v1925_v60 = vld [vmem:[#allocation4 + $0x88] sm:$0xff] }
 0x326   : > { %1633 = vst.msk [vmem:[#allocation4 + $0x60] sm:$0xff] %vm1590_vm10, %v1631_v59  ;;  %v1958_v61 = vsel %vm1163_vm12, %v1934_v58, 0  ;;  %v1935_v62 = vpack.c.bf16 %v1925_v60, %v1925_v60 }
 0x327   : > { %1706 = vst.msk [vmem:[#allocation4 + $0x60] sm:$0xff] %vm1657_vm11, %v1704_v55  ;;  %1966 = vmatpush.bf16.msra.mxu2 %v1958_v61 }
 0x328   : > { %v1961_v63 = vsel %vm1163_vm12, %v1935_v62, 0  ;;  %vm1642_vm12 = vcmask 695296  }
 0x329   : > { %1980 = vmatpush.bf16.msra.mxu3 %v1961_v63  ;;  %1545 = vrot.lane.b32.xlu2 %v5657_v10, %s5111_s29 }
 0x32a   : > { %1484 = vrot.lane.b32.xlu1 %v5657_v10, %s5125_s11  ;;  %1490 = vrot.lane.b32.xlu0 %v5657_v10, %s5126_s14  ;;  %s6184_s11 = smov 94  }
 0x32b   : > { %v1338_v0 = vpop.permute.xlu0 %1337  ;;  %v1277_v1 = vpop.permute.xlu2 %1276 }
 0x32c   : > { %1340 = vst.msk [vmem:[#allocation4 + $0x40] sm:$0xff] %vm1315_vm5, %v1338_v0  ;;  %v1833_v2 = vpop.permute.xlu1 %1832 }
 0x32d   : > { %1395 = vst.msk [vmem:[#allocation4 + $0x40] sm:$0xff] %vm1370_vm6, %v1393_v49 }
 0x32e   : > { %1279 = vst.msk [vmem:[#allocation4 + $0x30] sm:$0xff] %vm1260_vm4, %v1277_v1 }
 0x32f   : > { %1836 = vst.msk [vmem:[#allocation4 + $0x68] sm:$0xff] %vm1793_vm15, %v1833_v2 }
 0x331   : > { %1884 = vrot.lane.b32.xlu2 %v5704_v18, %s6169_s10  ;;  %s5127_s10 = smov 115  }
 0x332   : > { %1804 = vrot.lane.b32.xlu1 %v5704_v18, %s5112_s15  ;;  %1764 = vrot.lane.b32.xlu0 %v5704_v18, %s6184_s11 }
 0x333   : > { %v1576_v3 = vpop.permute.xlu0 %1575  ;;  %v1771_v4 = vpop.permute.xlu2 %1770 }
 0x334   : > { %1578 = vst.msk [vmem:[#allocation4 + $0x70] sm:$0xff] %vm1535_vm9, %v1576_v3  ;;  %v1332_v5 = vpop.permute.xlu1 %1331 }
 0x335   : > { %1773 = vst.msk [vmem:[#allocation4 + $0x60] sm:$0xff] %vm1730_vm13, %v1771_v4 }
 0x336   : > { %1835 = vst.msk [vmem:[#allocation4 + $0x60] sm:$0xff] %vm1791_vm14, %v1833_v2 }
 0x337   : > { %1334 = vst.msk [vmem:[#allocation4 + $0x30] sm:$0xff] %vm1315_vm5, %v1332_v5 }
 0x339   : > { %1600 = vrot.lane.b32.xlu2 %v5657_v10, %s5075_s9 }
 0x33a   : > { %1539 = vrot.lane.b32.xlu1 %v5657_v10, %s5127_s10  ;;  %1312 = vrot.lane.b32.xlu0 %v5657_v10, %s6168_s20  ;;  %s6185_s10 = smov 102   ;;  %s6186_s20 = smov 111  }
 0x33b   : > { %v1639_v6 = vpop.permute.xlu0 %1638  ;;  %v1840_v7 = vpop.permute.xlu2 %1839 }
 0x33c   : > { %v1643_v8 = vsel %vm1642_vm12, %v1639_v6, %v5811_v44  ;;  %1843 = vst.msk [vmem:[#allocation4 + $0x78] sm:$0xff] %vm1793_vm15, %v1840_v7  ;;  %v1891_v9 = vpop.permute.xlu1 %1890 }
 0x33d   : > { %1645 = vst.msk [vmem:[#allocation4 + $0x70] sm:$0xff] %vm1590_vm10, %v1643_v8  ;;  %v1920_v34 = vld [vmem:[#allocation4 + $0x60] sm:$0xff] }
 0x33e   : > { %1893 = vst.msk [vmem:[#allocation4 + $0x68] sm:$0xff] %vm1856_vm0, %v1891_v9 }
 0x341   : > { %1677 = vrot.lane.b32.xlu2 %v5704_v18, %s6178_s13  ;;  %s6188_s13 = smov 109  }
 0x342   : > { %1587 = vrot.lane.b32.xlu1 %v5657_v10, %s5111_s29  ;;  %1551 = vrot.lane.b32.xlu0 %v5657_v10, %s6185_s10  ;;  %s6187_s29 = smov 108   ;;  %s6190_s10 = smov 120  }
 0x343   : > { %v1399_v11 = vpop.permute.xlu0 %1398  ;;  %v1558_v12 = vpop.permute.xlu2 %1557 }
 0x344   : > { %1401 = vst.msk [vmem:[#allocation4 + $0x50] sm:$0xff] %vm1370_vm6, %v1399_v11  ;;  %v1387_v13 = vpop.permute.xlu1 %1386 }
 0x345   : > { %1456 = vst.msk [vmem:[#allocation4 + $0x50] sm:$0xff] %vm1425_vm7, %v5828_v50  ;;  %v1921_v21 = vld [vmem:[#allocation4 + $0x68] sm:$0xff] }
 0x346   : > { %1511 = vst.msk [vmem:[#allocation4 + $0x50] sm:$0xff] %vm1480_vm8, %v1509_v57 }
 0x347   : > { %1389 = vst.msk [vmem:[#allocation4 + $0x30] sm:$0xff] %vm1370_vm6, %v1387_v13 }
 0x349   : > { %1667 = vrot.lane.b32.xlu2 %v5657_v10, %s6167_s23 }
 0x34a   : > { %1661 = vrot.lane.b32.xlu1 %v5657_v10, %s6186_s20  ;;  %1367 = vrot.lane.b32.xlu0 %v5657_v10, %s5120_s19  ;;  %s6189_s19 = smov 107  }
 0x34b   : > { %v1448_v14 = vpop.permute.xlu0 %1447  ;;  %v1897_v15 = vpop.permute.xlu2 %1896 }
 0x34c   : > { %1450 = vst.msk [vmem:[#allocation4 + $0x40] sm:$0xff] %vm1425_vm7, %v1448_v14  ;;  %v1688_v16 = vpop.permute.xlu1 %1687 }
 0x34d   : > { %1899 = vst.msk [vmem:[#allocation4 + $0x78] sm:$0xff] %vm1856_vm0, %v1897_v15 }
 0x351   : > { %1746 = vrot.lane.b32.xlu2 %v5704_v18, %s6187_s29 }
 0x352   : > { %1736 = vrot.lane.b32.xlu1 %v5657_v10, %s6188_s13  ;;  %1606 = vrot.lane.b32.xlu0 %v5657_v10, %s6176_s22  ;;  %s6191_s22 = smov 118  }
 0x353   : > { %v1710_v17 = vpop.permute.xlu0 %1709  ;;  %v1613_v19 = vpop.permute.xlu2 %1612 }
 0x354   : > { %1712 = vst.msk [vmem:[#allocation4 + $0x70] sm:$0xff] %vm1657_vm11, %v1710_v17  ;;  %v1436_v20 = vpop.permute.xlu1 %1435  ;;  %v1923_v22 = vld [vmem:[#allocation4 + $0x78] sm:$0xff] }
 0x355   : > { %v1933_v23 = vpack.c.bf16 %v1923_v22, %v1921_v21 }
 0x357   : > { %1981 = vmatpush.bf16.msra.mxu3 %v1933_v23 }
 0x359   : > { %1811 = vrot.lane.b32.xlu2 %v5704_v18, %s6184_s11  ;;  %s6192_s11 = smov 113  }
 0x35a   : > { %1797 = vrot.lane.b32.xlu1 %v5704_v18, %s6189_s19  ;;  %1422 = vrot.lane.b32.xlu0 %v5657_v10, %s6190_s10 }
 0x35b   : > { %v1503_v24 = vpop.permute.xlu0 %1502  ;;  %v1690_v25 = vpop.permute.xlu2 %1689 }
 0x35c   : > { %1505 = vst.msk [vmem:[#allocation4 + $0x40] sm:$0xff] %vm1480_vm8, %v1503_v24  ;;  %v1258_v26 = vpop.permute.xlu1 %1257  ;;  %v1692_v27 = vsel %vm1691_vm3, %v1688_v16, %v1690_v25 }
 0x35d   : > { %1560 = vst.msk [vmem:[#allocation4 + $0x40] sm:$0xff] %vm1535_vm9, %v1558_v12 }
 0x35e   : > { %1615 = vst.msk [vmem:[#allocation4 + $0x40] sm:$0xff] %vm1590_vm10, %v1613_v19 }
 0x35f   : > { %1694 = vst.msk [vmem:[#allocation4 + $0x40] sm:$0xff] %vm1657_vm11, %v1692_v27 }
 0x360   : > { %1261 = vst.msk [vmem:[#allocation4] sm:$0xff] %vm1260_vm4, %v1258_v26 }
 0x361   : > { %1866 = vrot.lane.b32.xlu2 %v5704_v18, %s6173_s1 }
 0x362   : > { %1477 = vrot.lane.b32.xlu0 %v5657_v10, %s6191_s22 }
 0x363   : > { %v1777_v28 = vpop.permute.xlu0 %1776  ;;  %v1442_v29 = vpop.permute.xlu2 %1441 }
 0x364   : > { %1779 = vst.msk [vmem:[#allocation4 + $0x70] sm:$0xff] %vm1730_vm13, %v1777_v28  ;;  %v1497_v30 = vpop.permute.xlu1 %1496 }
 0x365   : > { %1842 = vst.msk [vmem:[#allocation4 + $0x70] sm:$0xff] %vm1791_vm14, %v1840_v7 }
 0x366   : > { %1444 = vst.msk [vmem:[#allocation4 + $0x30] sm:$0xff] %vm1425_vm7, %v1442_v29  ;;  %v1936_v29 = vld [vmem:[#allocation13] sm:$0xff] }
 0x367   : > { %1499 = vst.msk [vmem:[#allocation4 + $0x30] sm:$0xff] %vm1480_vm8, %v1497_v30  ;;  %v1937_v30 = vld [vmem:[#allocation13 + $0x8] sm:$0xff]  ;;  %1940 = vperm.xlu1 %4780, %v1936_v29   ;;  %v4518_v29 = vld [vmem:[#allocation14 + $0x1e8] sm:$0xff] }
 0x369   : > { %1594 = vrot.lane.b32.xlu2 %v5657_v10, %s6192_s11  ;;  %s4982_s11 = scalar_lea.hbm %s6112_s7, 2 }
 0x36a   : > { %1752 = vrot.lane.b32.xlu0 %v5704_v18, %s6183_s21  ;;  %s3717_s21 = scalar_lea.hbm %s6112_s7, %s5192_s8 }
 0x36b   : > { %v1326_v31 = vpop.permute.xlu0 %1325  ;;  %v1265_v32 = vpop.permute.xlu2 %1264 }
 0x36c   : > { %1328 = vst.msk [vmem:[#allocation4 + $0x20] sm:$0xff] %vm1315_vm5, %v1326_v31  ;;  %v1819_v33 = vpop.permute.xlu1 %1818  ;;  %v1922_v35 = vld [vmem:[#allocation4 + $0x70] sm:$0xff] }
 0x36d   : > { %1822 = vst.msk [vmem:[#allocation4 + $0x48] sm:$0xff] %vm1793_vm15, %v1819_v33  ;;  %v1932_v36 = vpack.c.bf16 %v1922_v35, %v1920_v34  ;;  %v4464_v31 = vld [vmem:[#allocation14 + $0x38] sm:$0xff]  ;;  %v4463_v35 = vld [vmem:[#allocation14 + $0x30] sm:$0xff] }
 0x36e   : > { %2080 = vmatpush.bf16.msrb.mxu0 %v4464_v31 }
 0x36f   : > { %1967 = vmatpush.bf16.msra.mxu2 %v1932_v36 }
 0x371   : > { %1723 = vrot.lane.b32.xlu2 %v5657_v10, %s6167_s23 }
 0x372   : > { %1532 = vrot.lane.b32.xlu0 %v5657_v10, %s5126_s14  ;;  %2081 = vmatpush.bf16.msrb.mxu0 %v4463_v35  ;;  %v4498_v35 = vld [vmem:[#allocation14 + $0x148] sm:$0xff]  ;;  %s376_s14 = scalar_lea.vmem [#allocation16], %s5291_s16 }
 0x373   : > { %v1564_v37 = vpop.permute.xlu0 %1563  ;;  %v1759_v38 = vpop.permute.xlu2 %1758  ;;  %s3719_s20 = sshll.u32 %s376_s14, 4  ;;  %s3720_s20 = int_to_ptr.vmem [resolvable:$true] %s3719_s20 }
 0x374   : > { %1566 = vst.msk [vmem:[#allocation4 + $0x50] sm:$0xff] %vm1535_vm9, %v1564_v37  ;;  %v1320_v39 = vpop.permute.xlu1 %1319  ;;  %v4472_v37 = vld [vmem:[#allocation14 + $0x78] sm:$0xff] }
 0x375   : > { %1761 = vst.msk [vmem:[#allocation4 + $0x40] sm:$0xff] %vm1730_vm13, %v1759_v38  ;;  %v4462_v38 = vld [vmem:[#allocation14 + $0x28] sm:$0xff] }
 0x376   : > { %1821 = vst.msk [vmem:[#allocation4 + $0x40] sm:$0xff] %vm1791_vm14, %v1819_v33  ;;  %v4473_v33 = vld [vmem:[#allocation14 + $0x80] sm:$0xff]  ;;  %2082 = vmatpush.bf16.msrb.mxu0 %v4462_v38  ;;  %v4515_v38 = vld [vmem:[#allocation14 + $0x1d0] sm:$0xff] }
 0x379   : > { %1738 = vrot.lane.b32.xlu2 %v5704_v18, %s6188_s13  ;;  %s3709_s13 = scalar_lea.sflag [#allocation7], %s5291_s16 }
 0x37a   : > { %1872 = vrot.lane.b32.xlu0 %v5704_v18, %s6182_s17 }
 0x37b   : > { %v1381_v40 = vpop.permute.xlu0 %1380  ;;  %v1826_v41 = vpop.permute.xlu2 %1825 }
 0x37c   : > { %1383 = vst.msk [vmem:[#allocation4 + $0x20] sm:$0xff] %vm1370_vm6, %v1381_v40  ;;  %v1879_v42 = vpop.permute.xlu1 %1878 }
 0x37d   : > { %1438 = vst.msk [vmem:[#allocation4 + $0x20] sm:$0xff] %vm1425_vm7, %v1436_v20  ;;  %v1916_v62 = vld [vmem:[#allocation4 + $0x40] sm:$0xff] }
 0x37e   : > { %1829 = vst.msk [vmem:[#allocation4 + $0x58] sm:$0xff] %vm1793_vm15, %v1826_v41 }
 0x37f   : > { %1881 = vst.msk [vmem:[#allocation4 + $0x48] sm:$0xff] %vm1856_vm0, %v1879_v42 }
 0x381   : > { %1853 = vrot.lane.b32.xlu2 %v5704_v18, %s5112_s15 }
 0x382   : > { %1654 = vrot.lane.b32.xlu0 %v5657_v10, %s5075_s9  ;;  %s6193_s9 = smov 105  }
 0x383   : > { %v1619_v43 = vpop.permute.xlu0 %1618  ;;  %v1546_v44 = vpop.permute.xlu2 %1545 }
 0x384   : > { %1621 = vst.msk [vmem:[#allocation4 + $0x50] sm:$0xff] %vm1590_vm10, %v1619_v43  ;;  %v1375_v45 = vpop.permute.xlu1 %1374 }
 0x386   : > { %v1917_v50 = vld [vmem:[#allocation4 + $0x48] sm:$0xff] }
 0x389   : > { %1945 = vperm.xlu2 %4781, %v1937_v30   ;;  %v4510_v30 = vld [vmem:[#allocation14 + $0x1a8] sm:$0xff] }
 0x38a   : > { %1725 = vrot.lane.b32.xlu0 %v5704_v18, %s6167_s23 }
 0x38b   : > { %v1885_v46 = vpop.permute.xlu2 %1884  ;;  %v1210_v47 = vpop.permute.xlu0 %1209 }
 0x38c   : > { %1887 = vst.msk [vmem:[#allocation4 + $0x58] sm:$0xff] %vm1856_vm0, %v1885_v46  ;;  %v1676_v48 = vpop.permute.xlu1 %1675  ;;  %v4456_v46 = vld [vmem:[#allocation11] sm:$0xff] }
 0x38d   : > { %1212 = vst.msk [vmem:[#allocation4 + $0x10] sm:$0xff] %vm1205_vm2, %v1210_v47  ;;  %vm1679_vm2 = vcmask 801792  }
 0x38e   : > { %1267 = vst.msk [vmem:[#allocation4 + $0x10] sm:$0xff] %vm1260_vm4, %v1265_v32  ;;  %vm1740_vm4 = vcmask 891904   ;;  %v4465_v32 = vld [vmem:[#allocation14 + $0x40] sm:$0xff] }
 0x38f   : > { %1322 = vst.msk [vmem:[#allocation4 + $0x10] sm:$0xff] %vm1315_vm5, %v1320_v39  ;;  %2100 = vmatpush.bf16.msrb.mxu1 %v4465_v32  ;;  %v4471_v39 = vld [vmem:[#allocation14 + $0x70] sm:$0xff] }
 0x390   : > { %1377 = vst.msk [vmem:[#allocation4 + $0x10] sm:$0xff] %vm1370_vm6, %v1375_v45 }
 0x392   : > { %1788 = vrot.lane.b32.xlu0 %v5704_v18, %s6187_s29  ;;  %s3721_s29 = sshll.u32 %s3717_s21, 4  ;;  %s3722_s29 = int_to_ptr.hbm [resolvable:$true] %s3721_s29 }
 0x393   : > { %v1601_v10 = vpop.permute.xlu2 %1600  ;;  %v1698_v49 = vpop.permute.xlu0 %1697  ;;  %v1919_v51 = vld [vmem:[#allocation4 + $0x58] sm:$0xff]  ;;  %2189 = vmatpush.bf16.msra.mxu1 %v4473_v33  ;;  %v4499_v33 = vld [vmem:[#allocation14 + $0x150] sm:$0xff]  ;;  %s4976_s19 = sshra.s32 %s3722_s29, 4  ;;  %s4977_s19 = int_to_ptr.hbm [resolvable:$true] %s4976_s19 }
 0x394   : > { %v1430_v52 = vpop.permute.xlu1 %1429  ;;  %1700 = vst.msk [vmem:[#allocation4 + $0x50] sm:$0xff] %vm1657_vm11, %v1698_v49  ;;  %v1931_v53 = vpack.c.bf16 %v1919_v51, %v1917_v50  ;;  %v4481_v50 = vld [vmem:[#allocation14 + $0xc0] sm:$0xff]  ;;  %v4480_v51 = vld [vmem:[#allocation14 + $0xb8] sm:$0xff]  ;;  %s4978_s10 = scalar_lea.hbm %s4977_s19, 1  ;;  %p4983_p12 = scmp.lt.s32.totalorder %s4977_s19, %s6112_s7 }
 0x395   : > { %1432 = vst.msk [vmem:[#allocation4 + $0x10] sm:$0xff] %vm1425_vm7, %v1430_v52  ;;  %v4461_v52 = vld [vmem:[#allocation14 + $0x20] sm:$0xff]  ;;  %p4979_p1 = scmp.ne.s32.totalorder %s4977_s19, %s4978_s10  ;;  %p4984_p8 = scmp.lt.s32.totalorder %s4982_s11, %s4978_s10 }
 0x396   : > { %1982 = vmatpush.bf16.msra.mxu3 %v1931_v53  ;;  %v4479_v53 = vld [vmem:[#allocation14 + $0xb0] sm:$0xff]  ;;  %2083 = vmatpush.bf16.msrb.mxu0 %v4461_v52  ;;  %v4512_v52 = vld [vmem:[#allocation14 + $0x1b8] sm:$0xff] }
 0x397   : > { %2190 = vmatpush.bf16.msra.mxu1 %v4472_v37  ;;  %v4497_v37 = vld [vmem:[#allocation14 + $0x140] sm:$0xff]  ;;  %p4980_p3 = pnand %p4979_p1, %p5257_p13  ;;  %p4985_p7 = por %p4984_p8, %p4983_p12 }
 0x399   : > { %p4981_p4 = pneg %p4980_p3 }
 0x39a   : > { %1860 = vrot.lane.b32.xlu0 %v5704_v18, %s6193_s9 }
 0x39b   : > { %v1678_v54 = vpop.permute.xlu2 %1677  ;;  %2191 = vmatpush.bf16.msra.mxu1 %v4471_v39  ;;  %p4986_p9 = pnand %p4985_p7, %p4981_p4 }
 0x39c   : > { %v1485_v55 = vpop.permute.xlu1 %1484  ;;  %v1491_v56 = vpop.permute.xlu0 %1490  ;;  %v1680_v11 = vsel %vm1679_vm2, %v1676_v48, %v1678_v54  ;;  %v4470_v54 = vld [vmem:[#allocation14 + $0x68] sm:$0xff] }
 0x39d   : > { %1487 = vst.msk [vmem:[#allocation4 + $0x10] sm:$0xff] %vm1480_vm8, %v1485_v55  ;;  %v4474_v55 = vld [vmem:[#allocation14 + $0x88] sm:$0xff] }
 0x39e   : > { %1493 = vst.msk [vmem:[#allocation4 + $0x20] sm:$0xff] %vm1480_vm8, %v1491_v56  ;;  %v4460_v56 = vld [vmem:[#allocation14 + $0x18] sm:$0xff] }
 0x39f   : > { %1548 = vst.msk [vmem:[#allocation4 + $0x20] sm:$0xff] %vm1535_vm9, %v1546_v44  ;;  %2192 = vmatpush.bf16.msra.mxu1 %v4470_v54  ;;  %2084 = vmatpush.bf16.msrb.mxu0 %v4460_v56  ;;  %v4493_v54 = vld [vmem:[#allocation14 + $0x120] sm:$0xff]  ;;  %v4519_v56 = vld [vmem:[#allocation14 + $0x1f0] sm:$0xff] }
 0x3a0   : > { %1603 = vst.msk [vmem:[#allocation4 + $0x20] sm:$0xff] %vm1590_vm10, %v1601_v10  ;;  %v4482_v10 = vld [vmem:[#allocation14 + $0xc8] sm:$0xff] }
 0x3a3   : > { %v1668_v57 = vpop.permute.xlu2 %1667 }
 0x3a4   : > { %1670 = vst.msk [vmem:[#allocation4 + $0x20] sm:$0xff] %vm1657_vm11, %v1668_v57  ;;  %v1805_v58 = vpop.permute.xlu1 %1804  ;;  %v1765_v59 = vpop.permute.xlu0 %1764  ;;  %v4478_v57 = vld [vmem:[#allocation14 + $0xa8] sm:$0xff] }
 0x3a5   : > { %1808 = vst.msk [vmem:[#allocation4 + $0x28] sm:$0xff] %vm1793_vm15, %v1805_v58 }
 0x3a6   : > { %1767 = vst.msk [vmem:[#allocation4 + $0x50] sm:$0xff] %vm1730_vm13, %v1765_v59  ;;  %v4469_v59 = vld [vmem:[#allocation14 + $0x60] sm:$0xff] }
 0x3a7   : > { %1828 = vst.msk [vmem:[#allocation4 + $0x50] sm:$0xff] %vm1791_vm14, %v1826_v41  ;;  %2193 = vmatpush.bf16.msra.mxu1 %v4469_v59  ;;  %v4505_v59 = vld [vmem:[#allocation14 + $0x180] sm:$0xff] }
 0x3ab   : > { %v1747_v18 = vpop.permute.xlu2 %1746 }
 0x3ac   : > { %1749 = vst.msk [vmem:[#allocation4 + $0x20] sm:$0xff] %vm1730_vm13, %v1747_v18  ;;  %v1540_v60 = vpop.permute.xlu1 %1539  ;;  %v1313_v61 = vpop.permute.xlu0 %1312  ;;  %v4459_v18 = vld [vmem:[#allocation14 + $0x10] sm:$0xff] }
 0x3ad   : > { %1807 = vst.msk [vmem:[#allocation4 + $0x20] sm:$0xff] %vm1791_vm14, %v1805_v58  ;;  %v4491_v58 = vld [vmem:[#allocation14 + $0x110] sm:$0xff]  ;;  %2085 = vmatpush.bf16.msrb.mxu0 %v4459_v18  ;;  %v4536_v18 = vld [vmem:[#allocation14 + $0x278] sm:$0xff] }
 0x3ae   : > { %1542 = vst.msk [vmem:[#allocation4 + $0x10] sm:$0xff] %vm1535_vm9, %v1540_v60  ;;  %v1918_v63 = vld [vmem:[#allocation4 + $0x50] sm:$0xff] }
 0x3af   : > { %1316 = vst.msk [vmem:[#allocation4] sm:$0xff] %vm1315_vm5, %v1313_v61  ;;  %v1930_v0 = vpack.c.bf16 %v1918_v63, %v1916_v62  ;;  %vm1727_vm5 = vcmask 900096   ;;  %v4477_v60 = vld [vmem:[#allocation14 + $0xa0] sm:$0xff]  ;;  %v4490_v61 = vld [vmem:[#allocation14 + $0x108] sm:$0xff]  ;;  %v4468_v62 = vld [vmem:[#allocation14 + $0x58] sm:$0xff] }
 0x3b0   : > { %v4458_v63 = vld [vmem:[#allocation14 + $0x8] sm:$0xff]  ;;  %2194 = vmatpush.bf16.msra.mxu1 %v4468_v62 }
 0x3b1   : > { %1968 = vmatpush.bf16.msra.mxu2 %v1930_v0  ;;  %2086 = vmatpush.bf16.msrb.mxu0 %v4458_v63  ;;  %v4476_v0 = vld [vmem:[#allocation14 + $0x98] sm:$0xff]  ;;  %v4537_v63 = vld [vmem:[#allocation14 + $0x280] sm:$0xff] }
 0x3b3   : > { %v1812_v1 = vpop.permute.xlu2 %1811 }
 0x3b4   : > { %1815 = vst.msk [vmem:[#allocation4 + $0x38] sm:$0xff] %vm1793_vm15, %v1812_v1  ;;  %v1588_v2 = vpop.permute.xlu1 %1587  ;;  %v1552_v3 = vpop.permute.xlu0 %1551  ;;  %v1912_v21 = vld [vmem:[#allocation4 + $0x20] sm:$0xff] }
 0x3b5   : > { %1554 = vst.msk [vmem:[#allocation4 + $0x30] sm:$0xff] %vm1535_vm9, %v1552_v3  ;;  %v4457_v3 = vld [vmem:[#allocation14] sm:$0xff] }
 0x3b6   : > { %2087 = vmatpush.bf16.msrb.mxu0 %v4457_v3 }
 0x3bb   : > { %v1867_v4 = vpop.permute.xlu2 %1866 }
 0x3bc   : > { %1869 = vst.msk [vmem:[#allocation4 + $0x28] sm:$0xff] %vm1856_vm0, %v1867_v4  ;;  %v1662_v5 = vpop.permute.xlu1 %1661  ;;  %v1368_v6 = vpop.permute.xlu0 %1367  ;;  %v4475_v4 = vld [vmem:[#allocation14 + $0x90] sm:$0xff] }
 0x3bd   : > { %1371 = vst.msk [vmem:[#allocation4] sm:$0xff] %vm1370_vm6, %v1368_v6  ;;  %vm1953_vm6 = vcmask 588800   ;;  %v4466_v6 = vld [vmem:[#allocation14 + $0x48] sm:$0xff] }
 0x3c3   : > { %v1595_v7 = vpop.permute.xlu2 %1594  ;;  %v1913_v26 = vld [vmem:[#allocation4 + $0x28] sm:$0xff] }
 0x3c4   : > { %1597 = vst.msk [vmem:[#allocation4 + $0x10] sm:$0xff] %vm1590_vm10, %v1595_v7  ;;  %v1737_v8 = vpop.permute.xlu1 %1736  ;;  %v1607_v9 = vpop.permute.xlu0 %1606  ;;  %v4501_v7 = vld [vmem:[#allocation14 + $0x160] sm:$0xff] }
 0x3c5   : > { %1664 = vst.msk [vmem:[#allocation4 + $0x10] sm:$0xff] %vm1657_vm11, %v1662_v5  ;;  %v4488_v5 = vld [vmem:[#allocation14 + $0xf8] sm:$0xff] }
 0x3c6   : > { %1609 = vst.msk [vmem:[#allocation4 + $0x30] sm:$0xff] %vm1590_vm10, %v1607_v9  ;;  %v4483_v9 = vld [vmem:[#allocation14 + $0xd0] sm:$0xff] }
 0x3c7   : > { %1682 = vst.msk [vmem:[#allocation4 + $0x30] sm:$0xff] %vm1657_vm11, %v1680_v11  ;;  %v4486_v11 = vld [vmem:[#allocation14 + $0xe8] sm:$0xff]  ;;  %2315 = vmatpush.bf16.msra.mxu0 %v4483_v9 }
 0x3cb   : > { %v1724_v12 = vpop.permute.xlu2 %1723 }
 0x3cc   : > { %v1798_v13 = vpop.permute.xlu1 %1797  ;;  %v1423_v14 = vpop.permute.xlu0 %1422 }
 0x3cd   : > { %1801 = vst.msk [vmem:[#allocation4 + $0x18] sm:$0xff] %vm1793_vm15, %v1798_v13 }
 0x3ce   : > { %1426 = vst.msk [vmem:[#allocation4] sm:$0xff] %vm1425_vm7, %v1423_v14  ;;  %vm2076_vm7 = vcmask 130048  }
 0x3d3   : > { %v1739_v15 = vpop.permute.xlu2 %1738 }
 0x3d4   : > { %v1741_v16 = vsel %vm1740_vm4, %v1737_v8, %v1739_v15  ;;  %v1478_v17 = vpop.permute.xlu0 %1477  ;;  %v4487_v8 = vld [vmem:[#allocation14 + $0xf0] sm:$0xff] }
 0x3d5   : > { %1743 = vst.msk [vmem:[#allocation4 + $0x10] sm:$0xff] %vm1730_vm13, %v1741_v16 }
 0x3d6   : > { %1800 = vst.msk [vmem:[#allocation4 + $0x10] sm:$0xff] %vm1791_vm14, %v1798_v13  ;;  %v4484_v13 = vld [vmem:[#allocation14 + $0xd8] sm:$0xff] }
 0x3d7   : > { %1481 = vst.msk [vmem:[#allocation4] sm:$0xff] %vm1480_vm8, %v1478_v17  ;;  %vm3706_vm8 = vcmask 73728  }
 0x3d9   : > { %v1941_v14 = vpop.permute.xlu1 %1940 }
 0x3db   : > { %v1854_v41 = vpop.permute.xlu2 %1853 }
 0x3dc   : > { %v1753_v19 = vpop.permute.xlu0 %1752 }
 0x3dd   : > { %1755 = vst.msk [vmem:[#allocation4 + $0x30] sm:$0xff] %vm1730_vm13, %v1753_v19  ;;  %v1910_v44 = vld [vmem:[#allocation4 + $0x10] sm:$0xff] }
 0x3de   : > { %1814 = vst.msk [vmem:[#allocation4 + $0x30] sm:$0xff] %vm1791_vm14, %v1812_v1  ;;  %v4489_v1 = vld [vmem:[#allocation14 + $0x100] sm:$0xff] }
 0x3e4   : > { %v1533_v20 = vpop.permute.xlu0 %1532 }
 0x3e5   : > { %1536 = vst.msk [vmem:[#allocation4] sm:$0xff] %vm1535_vm9, %v1533_v20  ;;  %v1914_v22 = vld [vmem:[#allocation4 + $0x30] sm:$0xff] }
 0x3e6   : > { %1591 = vst.msk [vmem:[#allocation4] sm:$0xff] %vm1590_vm10, %v1588_v2  ;;  %v1928_v23 = vpack.c.bf16 %v1914_v22, %v1912_v21  ;;  %v4467_v2 = vld [vmem:[#allocation14 + $0x50] sm:$0xff] }
 0x3e7   : > { %2195 = vmatpush.bf16.msra.mxu1 %v4467_v2 }
 0x3e8   : > { %1969 = vmatpush.bf16.msra.mxu2 %v1928_v23 }
 0x3eb   : > { %2196 = vmatpush.bf16.msra.mxu1 %v4466_v6 }
 0x3ec   : > { %v1873_v24 = vpop.permute.xlu0 %1872 }
 0x3ed   : > { %1875 = vst.msk [vmem:[#allocation4 + $0x38] sm:$0xff] %vm1856_vm0, %v1873_v24 }
 0x3f4   : > { %v1655_v25 = vpop.permute.xlu0 %1654  ;;  %v1915_v27 = vld [vmem:[#allocation4 + $0x38] sm:$0xff] }
 0x3f5   : > { %1658 = vst.msk [vmem:[#allocation4] sm:$0xff] %vm1657_vm11, %v1655_v25  ;;  %v1929_v28 = vpack.c.bf16 %v1915_v27, %v1913_v26  ;;  %v4500_v25 = vld [vmem:[#allocation14 + $0x158] sm:$0xff] }
 0x3f6   : > { %v4492_v26 = vld [vmem:[#allocation14 + $0x118] sm:$0xff] }
 0x3f7   : > { %1983 = vmatpush.bf16.msra.mxu3 %v1929_v28 }
 0x3fc   : > { %v1726_v34 = vpop.permute.xlu0 %1725 }
 0x3fd   : > { %v1728_v36 = vsel %vm1727_vm5, %v1724_v12, %v1726_v34  ;;  %v4485_v12 = vld [vmem:[#allocation14 + $0xe0] sm:$0xff] }
 0x3fe   : > { %1731 = vst.msk [vmem:[#allocation4] sm:$0xff] %vm1730_vm13, %v1728_v36  ;;  %v4517_v34 = vld [vmem:[#allocation14 + $0x1e0] sm:$0xff]  ;;  %v4516_v36 = vld [vmem:[#allocation14 + $0x1d8] sm:$0xff] }
 0x404   : > { %v1789_v40 = vpop.permute.xlu0 %1788 }
 0x405   : > { %1792 = vst.msk [vmem:[#allocation4] sm:$0xff] %vm1791_vm14, %v1789_v40 }
 0x406   : > { %1794 = vst.msk [vmem:[#allocation4 + $0x8] sm:$0xff] %vm1793_vm15, %v1789_v40  ;;  %v4496_v40 = vld [vmem:[#allocation14 + $0x138] sm:$0xff] }
 0x407   : > { %1857 = vst.msk [vmem:[#allocation4 + $0x8] sm:$0xff] %vm1856_vm0, %v1854_v41  ;;  %v4509_v41 = vld [vmem:[#allocation14 + $0x1a0] sm:$0xff] }
 0x40c   : > { %v1861_v42 = vpop.permute.xlu0 %1860  ;;  %v1908_v43 = vld [vmem:[#allocation4] sm:$0xff] }
 0x40d   : > { %1863 = vst.msk [vmem:[#allocation4 + $0x18] sm:$0xff] %vm1856_vm0, %v1861_v42  ;;  %v1926_v45 = vpack.c.bf16 %v1910_v44, %v1908_v43  ;;  %v4514_v43 = vld [vmem:[#allocation14 + $0x1c8] sm:$0xff]  ;;  %v4527_v44 = vld [vmem:[#allocation14 + $0x230] sm:$0xff] }
 0x40e   : > { %v1909_v47 = vld [vmem:[#allocation4 + $0x8] sm:$0xff] }
 0x40f   : > { %1970 = vmatpush.bf16.msra.mxu2 %v1926_v45 }
 0x412   : > { %3859 = vmatmul.msk.bf16.vlgmr.msra.gmra.mxu2 %vm1953_vm6, %v4456_v46 }
 0x413   : > { %2209 = vmatpush.bf16.msrb.mxu2 %v4474_v55  ;;  %v4506_v55 = vld [vmem:[#allocation14 + $0x188] sm:$0xff] }
 0x414   : > { %v1911_v48 = vld [vmem:[#allocation4 + $0x18] sm:$0xff] }
 0x415   : > { %v1927_v49 = vpack.c.bf16 %v1911_v48, %v1909_v47  ;;  %v4495_v47 = vld [vmem:[#allocation14 + $0x130] sm:$0xff]  ;;  %v4508_v48 = vld [vmem:[#allocation14 + $0x198] sm:$0xff] }
 0x417   : > { %1984 = vmatpush.bf16.msra.mxu3 %v1927_v49  ;;  %2401 = vmatpush.bf16.msra.mxu2 %v4491_v58  ;;  %v4526_v49 = vld [vmem:[#allocation14 + $0x228] sm:$0xff]  ;;  %v4524_v58 = vld [vmem:[#allocation14 + $0x218] sm:$0xff] }
 0x41a   : > { %3860 = vmatmul.msk.bf16.vlgmr.msra.gmra.mxu3 %vm1953_vm6, %v4456_v46 }
 0x41b   : > { %2295 = vmatpush.bf16.msrb.mxu3 %v4482_v10  ;;  %2402 = vmatpush.bf16.msra.mxu2 %v4490_v61  ;;  %v4513_v10 = vld [vmem:[#allocation14 + $0x1c0] sm:$0xff] }
 0x41f   : > { %2296 = vmatpush.bf16.msrb.mxu3 %v4481_v50  ;;  %2403 = vmatpush.bf16.msra.mxu2 %v4489_v1  ;;  %v4494_v50 = vld [vmem:[#allocation14 + $0x128] sm:$0xff]  ;;  %v1946_v1 = vpop.permute.xlu2 %1945 }
 0x423   : > { %2297 = vmatpush.bf16.msrb.mxu3 %v4480_v51  ;;  %2404 = vmatpush.bf16.msra.mxu2 %v4488_v5  ;;  %v4507_v51 = vld [vmem:[#allocation14 + $0x190] sm:$0xff]  ;;  %v4554_v5 = vld [vmem:[#allocation14 + $0x308] sm:$0xff] }
 0x427   : > { %2298 = vmatpush.bf16.msrb.mxu3 %v4479_v53  ;;  %2405 = vmatpush.bf16.msra.mxu2 %v4487_v8  ;;  %v4525_v53 = vld [vmem:[#allocation14 + $0x220] sm:$0xff]  ;;  %v4535_v8 = vld [vmem:[#allocation14 + $0x270] sm:$0xff] }
 0x42b   : > { %2299 = vmatpush.bf16.msrb.mxu3 %v4478_v57  ;;  %2406 = vmatpush.bf16.msra.mxu2 %v4486_v11  ;;  %v4511_v57 = vld [vmem:[#allocation14 + $0x1b0] sm:$0xff]  ;;  %v4522_v11 = vld [vmem:[#allocation14 + $0x208] sm:$0xff] }
 0x42f   : > { %2300 = vmatpush.bf16.msrb.mxu3 %v4477_v60  ;;  %2407 = vmatpush.bf16.msra.mxu2 %v4485_v12  ;;  %v4553_v12 = vld [vmem:[#allocation14 + $0x300] sm:$0xff] }
 0x433   : > { %2301 = vmatpush.bf16.msrb.mxu3 %v4476_v0  ;;  %2408 = vmatpush.bf16.msra.mxu2 %v4484_v13  ;;  %v4523_v0 = vld [vmem:[#allocation14 + $0x210] sm:$0xff] }
 0x437   : > { %2302 = vmatpush.bf16.msrb.mxu3 %v4475_v4 }
 0x43b   : > { %2527 = vmatpush.bf16.msra.mxu3 %v4501_v7  ;;  %v4504_v7 = vld [vmem:[#allocation14 + $0x178] sm:$0xff] }
 0x495   : > { %v1972_v15 = vpop.f32.mrf.mxu2 }
 0x496   : > { %v1973_v16 = vadd.f32 %v1972_v15, %v1941_v14  ;;  %v4534_v15 = vld [vmem:[#allocation14 + $0x268] sm:$0xff] }
 0x498   : > { %v1991_v19 = vmax.f32 %v1973_v16, 0.0 }
 0x49d   : > { %v1986_v17 = vpop.f32.mrf.mxu3  ;;  %v1974_v2 = vpop.f32.mrf.mxu2 }
 0x49e   : > { %v1987_v20 = vadd.f32 %v1986_v17, %v1941_v14  ;;  %v1975_v9 = vadd.f32 %v1974_v2, %v1946_v1  ;;  %v4503_v14 = vld [vmem:[#allocation14 + $0x170] sm:$0xff]  ;;  %v4521_v17 = vld [vmem:[#allocation14 + $0x200] sm:$0xff] }
 0x49f   : > { %v4569_v2 = vld [vmem:[#allocation14 + $0x380] sm:$0xff] }
 0x4a0   : > { %v1992_v21 = vmax.f32 %v1987_v20, 0.0  ;;  %v1993_v16 = vmax.f32 %v1975_v9, 0.0 }
 0x4a2   : > { %v1995_v22 = vpack.c.bf16 %v1992_v21, %v1991_v19  ;;  %v4552_v19 = vld [vmem:[#allocation14 + $0x2f8] sm:$0xff]  ;;  %v4502_v21 = vld [vmem:[#allocation14 + $0x168] sm:$0xff] }
 0x4a4   : > { %v2017_v23 = vunpack.c.l.b16 %v1995_v22  ;;  %v2018_v24 = vunpack.c.h.b16 %v1995_v22  ;;  %v4533_v22 = vld [vmem:[#allocation14 + $0x260] sm:$0xff] }
 0x4a5   : > { %v1988_v60 = vpop.f32.mrf.mxu3 }
 0x4a6   : > { %v6000_v27 = vpack.c.b16 %v2017_v23, %v2017_v23  ;;  %v6002_v28 = vpack.c.b16 %v2018_v24, %v2018_v24  ;;  %v1989_v6 = vadd.f32 %v1988_v60, %v1946_v1  ;;  %v4528_v23 = vld [vmem:[#allocation14 + $0x238] sm:$0xff]  ;;  %v4589_v60 = vld [vmem:[#allocation14 + $0x420] sm:$0xff]  ;;  %v4538_v1 = vld [vmem:[#allocation14 + $0x288] sm:$0xff] }
 0x4a7   : > { %v4520_v24 = vld [vmem:[#allocation14 + $0x1f8] sm:$0xff] }
 0x4a8   : > { %2088 = vmatmul.bf16.vlgmr.msrb.gmra.mxu0 %v6000_v27  ;;  %3897 = vmatmul.msk.bf16.vlgmr.msrb.gmra.mxu1 %vm2076_vm7, %v6002_v28  ;;  %v6008_v31 = vshrl.u32 %v6002_v28, 16  ;;  %v2235_v32 = vrot.slane %v6000_v27, 1  ;;  %v6014_v39 = vshrl.u32 %v6000_v27, 16  ;;  %v2236_v42 = vrot.slane %v6002_v28, 1 }
 0x4a9   : > { %2507 = vmatpush.bf16.msrb.mxu1 %v4500_v25  ;;  %2421 = vmatpush.bf16.msrb.mxu0 %v4492_v26  ;;  %v2448_v46 = vrot.slane %v6002_v28, 2  ;;  %v2447_v62 = vrot.slane %v6000_v27, 2  ;;  %v2659_v4 = vrot.slane %v6000_v27, 3  ;;  %v1994_v13 = vmax.f32 %v1989_v6, 0.0  ;;  %v4551_v25 = vld [vmem:[#allocation14 + $0x2f0] sm:$0xff]  ;;  %v4545_v27 = vld [vmem:[#allocation14 + $0x2c0] sm:$0xff] }
 0x4aa   : > { %3934 = vmatmul.msk.bf16.vlgmr.msrb.gmra.mxu2 %vm2076_vm7, %v6008_v31  ;;  %2303 = vmatmul.bf16.vlgmr.msrb.gmra.mxu3 %v2235_v32  ;;  %v2341_v45 = vrot.slane %v6014_v39, 1  ;;  %v2342_v61 = vrot.slane %v6008_v31, 1  ;;  %v2554_v3 = vrot.slane %v6008_v31, 2  ;;  %v2660_v32 = vrot.slane %v6002_v28, 3  ;;  %v4549_v28 = vld [vmem:[#allocation14 + $0x2e0] sm:$0xff] }
 0x4ab   : > { %2719 = vmatpush.bf16.msrb.mxu3 %v4518_v29  ;;  %2633 = vmatpush.bf16.msrb.mxu2 %v4510_v30  ;;  %v1996_v20 = vpack.c.bf16 %v1994_v13, %v1993_v16  ;;  %v2553_v29 = vrot.slane %v6014_v39, 2  ;;  %v4532_v30 = vld [vmem:[#allocation14 + $0x258] sm:$0xff]  ;;  %v4586_v13 = vld [vmem:[#allocation14 + $0x408] sm:$0xff] }
 0x4ac   : > { %v4580_v16 = vld [vmem:[#allocation14 + $0x3d8] sm:$0xff] }
 0x4ad   : > { %2508 = vmatpush.bf16.msrb.mxu1 %v4499_v33  ;;  %v2873_v26 = vunpack.c.h.b16 %v1996_v20  ;;  %v4546_v33 = vld [vmem:[#allocation14 + $0x2c8] sm:$0xff] }
 0x4af   : > { %2720 = vmatpush.bf16.msrb.mxu3 %v4517_v34  ;;  %v2765_v34 = vrot.slane %v6014_v39, 3 }
 0x4b1   : > { %2509 = vmatpush.bf16.msrb.mxu1 %v4498_v35  ;;  %v4550_v35 = vld [vmem:[#allocation14 + $0x2e8] sm:$0xff] }
 0x4b3   : > { %2721 = vmatpush.bf16.msrb.mxu3 %v4516_v36  ;;  %v4563_v36 = vld [vmem:[#allocation14 + $0x350] sm:$0xff] }
 0x4b5   : > { %2510 = vmatpush.bf16.msrb.mxu1 %v4497_v37  ;;  %v6031_v37 = vpack.c.b16 %v2873_v26, %v2873_v26  ;;  %v4565_v26 = vld [vmem:[#allocation14 + $0x360] sm:$0xff] }
 0x4b7   : > { %2722 = vmatpush.bf16.msrb.mxu3 %v4515_v38  ;;  %v4544_v38 = vld [vmem:[#allocation14 + $0x2b8] sm:$0xff]  ;;  %v3090_v9 = vrot.slane %v6031_v37, 1 }
 0x4b8   : > { %2197 = vmatmul.bf16.vlgmr.msra.gmra.mxu1 %v6014_v39  ;;  %3971 = vmatmul.msk.bf16.vlgmr.msra.gmra.mxu0 %vm2076_vm7, %v2236_v42  ;;  %v4543_v39 = vld [vmem:[#allocation14 + $0x2b0] sm:$0xff]  ;;  %v4530_v42 = vld [vmem:[#allocation14 + $0x248] sm:$0xff] }
 0x4b9   : > { %2511 = vmatpush.bf16.msrb.mxu1 %v4496_v40  ;;  %2613 = vmatpush.bf16.msra.mxu0 %v4509_v41  ;;  %v4531_v40 = vld [vmem:[#allocation14 + $0x250] sm:$0xff]  ;;  %v4562_v41 = vld [vmem:[#allocation14 + $0x348] sm:$0xff] }
 0x4ba   : > { %2409 = vmatmul.bf16.vlgmr.msra.gmra.mxu2 %v2341_v45  ;;  %4045 = vmatmul.msk.bf16.vlgmr.msra.gmra.mxu3 %vm2076_vm7, %v2448_v46  ;;  %v2872_v45 = vunpack.c.l.b16 %v1996_v20  ;;  %v4542_v46 = vld [vmem:[#allocation14 + $0x2a8] sm:$0xff] }
 0x4bb   : > { %2723 = vmatpush.bf16.msrb.mxu3 %v4514_v43  ;;  %2825 = vmatpush.bf16.msra.mxu2 %v4527_v44  ;;  %v4548_v43 = vld [vmem:[#allocation14 + $0x2d8] sm:$0xff]  ;;  %v4561_v44 = vld [vmem:[#allocation14 + $0x340] sm:$0xff]  ;;  %v4598_v20 = vld [vmem:[#allocation14 + $0x468] sm:$0xff] }
 0x4bd   : > { %2512 = vmatpush.bf16.msrb.mxu1 %v4495_v47  ;;  %2614 = vmatpush.bf16.msra.mxu0 %v4508_v48  ;;  %v4529_v47 = vld [vmem:[#allocation14 + $0x240] sm:$0xff]  ;;  %v4555_v48 = vld [vmem:[#allocation14 + $0x310] sm:$0xff] }
 0x4bf   : > { %2724 = vmatpush.bf16.msrb.mxu3 %v4513_v10  ;;  %2826 = vmatpush.bf16.msra.mxu2 %v4526_v49  ;;  %v4547_v10 = vld [vmem:[#allocation14 + $0x2d0] sm:$0xff]  ;;  %v4560_v49 = vld [vmem:[#allocation14 + $0x338] sm:$0xff] }
 0x4c1   : > { %2513 = vmatpush.bf16.msrb.mxu1 %v4494_v50  ;;  %2615 = vmatpush.bf16.msra.mxu0 %v4507_v51  ;;  %v6036_v50 = vpack.c.b16 %v2872_v45, %v2872_v45  ;;  %v4541_v51 = vld [vmem:[#allocation14 + $0x2a0] sm:$0xff] }
 0x4c3   : > { %2725 = vmatpush.bf16.msrb.mxu3 %v4512_v52  ;;  %2827 = vmatpush.bf16.msra.mxu2 %v4525_v53  ;;  %v4572_v52 = vld [vmem:[#allocation14 + $0x398] sm:$0xff]  ;;  %v2766_v53 = vrot.slane %v6008_v31, 3  ;;  %v4558_v31 = vld [vmem:[#allocation14 + $0x328] sm:$0xff]  ;;  %v6048_v6 = vshrl.u32 %v6036_v50, 16 }
 0x4c5   : > { %2514 = vmatpush.bf16.msrb.mxu1 %v4493_v54  ;;  %2616 = vmatpush.bf16.msra.mxu0 %v4506_v55  ;;  %v4573_v54 = vld [vmem:[#allocation14 + $0x3a0] sm:$0xff]  ;;  %v4559_v55 = vld [vmem:[#allocation14 + $0x330] sm:$0xff]  ;;  %v3407_v45 = vrot.slane %v6048_v6, 2 }
 0x4c7   : > { %2726 = vmatpush.bf16.msrb.mxu3 %v4511_v57  ;;  %2828 = vmatpush.bf16.msra.mxu2 %v4524_v58  ;;  %v3089_v57 = vrot.slane %v6036_v50, 1  ;;  %v4590_v58 = vld [vmem:[#allocation14 + $0x428] sm:$0xff] }
 0x4c8   : > { %4008 = vmatmul.msk.bf16.vlgmr.msrb.gmra.mxu0 %vm2076_vm7, %v2342_v61  ;;  %2515 = vmatmul.bf16.vlgmr.msrb.gmra.mxu1 %v2447_v62  ;;  %v4539_v61 = vld [vmem:[#allocation14 + $0x290] sm:$0xff]  ;;  %v4570_v62 = vld [vmem:[#allocation14 + $0x388] sm:$0xff] }
 0x4c9   : > { %2739 = vmatpush.bf16.msra.mxu1 %v4519_v56  ;;  %2617 = vmatpush.bf16.msra.mxu0 %v4505_v59  ;;  %v6042_v56 = vshrl.u32 %v6031_v37, 16  ;;  %v4540_v59 = vld [vmem:[#allocation14 + $0x298] sm:$0xff] }
 0x4ca   : > { %4082 = vmatmul.msk.bf16.vlgmr.msrb.gmra.mxu2 %vm2076_vm7, %v2554_v3  ;;  %2727 = vmatmul.bf16.vlgmr.msrb.gmra.mxu3 %v2659_v4  ;;  %v4564_v3 = vld [vmem:[#allocation14 + $0x358] sm:$0xff] }
 0x4cb   : > { %2954 = vmatpush.bf16.msra.mxu3 %v4537_v63  ;;  %2829 = vmatpush.bf16.msra.mxu2 %v4523_v0  ;;  %v4557_v63 = vld [vmem:[#allocation14 + $0x320] sm:$0xff]  ;;  %v4588_v0 = vld [vmem:[#allocation14 + $0x418] sm:$0xff] }
 0x4cc   : > { %v4556_v4 = vld [vmem:[#allocation14 + $0x318] sm:$0xff] }
 0x4cd   : > { %2934 = vmatpush.bf16.msrb.mxu1 %v4536_v18  ;;  %2618 = vmatpush.bf16.msra.mxu0 %v4504_v7  ;;  %v4571_v18 = vld [vmem:[#allocation14 + $0x390] sm:$0xff]  ;;  %v4581_v7 = vld [vmem:[#allocation14 + $0x3e0] sm:$0xff] }
 0x4cf   : > { %3149 = vmatpush.bf16.msrb.mxu3 %v4554_v5  ;;  %2830 = vmatpush.bf16.msra.mxu2 %v4522_v11  ;;  %v4587_v5 = vld [vmem:[#allocation14 + $0x410] sm:$0xff]  ;;  %v4582_v11 = vld [vmem:[#allocation14 + $0x3e8] sm:$0xff] }
 0x4d1   : > { %2935 = vmatpush.bf16.msrb.mxu1 %v4535_v8  ;;  %2619 = vmatpush.bf16.msra.mxu0 %v4503_v14  ;;  %v4568_v8 = vld [vmem:[#allocation14 + $0x378] sm:$0xff]  ;;  %v4599_v14 = vld [vmem:[#allocation14 + $0x470] sm:$0xff] }
 0x4d3   : > { %3150 = vmatpush.bf16.msrb.mxu3 %v4553_v12  ;;  %2831 = vmatpush.bf16.msra.mxu2 %v4521_v17  ;;  %v3195_v12 = vrot.slane %v6048_v6, 1  ;;  %v4567_v17 = vld [vmem:[#allocation14 + $0x370] sm:$0xff] }
 0x4d5   : > { %2936 = vmatpush.bf16.msrb.mxu1 %v4534_v15  ;;  %2620 = vmatpush.bf16.msra.mxu0 %v4502_v21  ;;  %v3302_v15 = vrot.slane %v6031_v37, 2  ;;  %v4579_v21 = vld [vmem:[#allocation14 + $0x3d0] sm:$0xff] }
 0x4d7   : > { %3151 = vmatpush.bf16.msrb.mxu3 %v4552_v19  ;;  %2832 = vmatpush.bf16.msra.mxu2 %v4520_v24  ;;  %v4585_v19 = vld [vmem:[#allocation14 + $0x400] sm:$0xff] }
 0x4d8   : > { %2621 = vmatmul.bf16.vlgmr.msra.gmra.mxu0 %v2553_v29  ;;  %4119 = vmatmul.msk.bf16.vlgmr.msra.gmra.mxu1 %vm2076_vm7, %v2660_v32  ;;  %v4597_v24 = vld [vmem:[#allocation14 + $0x460] sm:$0xff]  ;;  %v4583_v29 = vld [vmem:[#allocation14 + $0x3f0] sm:$0xff] }
 0x4d9   : > { %2937 = vmatpush.bf16.msrb.mxu1 %v4533_v22  ;;  %2845 = vmatpush.bf16.msrb.mxu0 %v4528_v23  ;;  %v4566_v22 = vld [vmem:[#allocation14 + $0x368] sm:$0xff]  ;;  %v4584_v23 = vld [vmem:[#allocation14 + $0x3f8] sm:$0xff]  ;;  %v4577_v32 = vld [vmem:[#allocation14 + $0x3c0] sm:$0xff] }
 0x4da   : > { %2833 = vmatmul.bf16.vlgmr.msra.gmra.mxu2 %v2765_v34  ;;  %4193 = vmatmul.msk.bf16.vlgmr.msra.gmra.mxu3 %vm2076_vm7, %v6031_v37  ;;  %v3301_v34 = vrot.slane %v6036_v50, 2 }
 0x4db   : > { %3152 = vmatpush.bf16.msrb.mxu3 %v4551_v25  ;;  %3063 = vmatpush.bf16.msrb.mxu2 %v4546_v33  ;;  %v4578_v25 = vld [vmem:[#allocation14 + $0x3c8] sm:$0xff]  ;;  %v3196_v33 = vrot.slane %v6042_v56, 1 }
 0x4dd   : > { %3043 = vmatpush.bf16.msra.mxu0 %v4545_v27  ;;  %2938 = vmatpush.bf16.msrb.mxu1 %v4532_v30  ;;  %v4591_v27 = vld [vmem:[#allocation14 + $0x430] sm:$0xff]  ;;  %v4596_v30 = vld [vmem:[#allocation14 + $0x458] sm:$0xff] }
 0x4df   : > { %3153 = vmatpush.bf16.msrb.mxu3 %v4550_v35  ;;  %3255 = vmatpush.bf16.msra.mxu2 %v4563_v36  ;;  %v3408_v35 = vrot.slane %v6042_v56, 2  ;;  %v4595_v36 = vld [vmem:[#allocation14 + $0x450] sm:$0xff] }
 0x4e1   : > { %3044 = vmatpush.bf16.msra.mxu0 %v4544_v38  ;;  %2939 = vmatpush.bf16.msrb.mxu1 %v4531_v40  ;;  %v3513_v38 = vrot.slane %v6036_v50, 3  ;;  %v4576_v40 = vld [vmem:[#allocation14 + $0x3b8] sm:$0xff] }
 0x4e3   : > { %3154 = vmatpush.bf16.msrb.mxu3 %v4549_v28  ;;  %3256 = vmatpush.bf16.msra.mxu2 %v4562_v41  ;;  %v4594_v28 = vld [vmem:[#allocation14 + $0x448] sm:$0xff]  ;;  %v4575_v41 = vld [vmem:[#allocation14 + $0x3b0] sm:$0xff] }
 0x4e5   : > { %3045 = vmatpush.bf16.msra.mxu0 %v4543_v39  ;;  %2940 = vmatpush.bf16.msrb.mxu1 %v4530_v42  ;;  %v4593_v39 = vld [vmem:[#allocation14 + $0x440] sm:$0xff]  ;;  %v4574_v42 = vld [vmem:[#allocation14 + $0x3a8] sm:$0xff] }
 0x4e7   : > { %3155 = vmatpush.bf16.msrb.mxu3 %v4548_v43  ;;  %3257 = vmatpush.bf16.msra.mxu2 %v4561_v44  ;;  %v4600_v43 = vld [vmem:[#allocation14 + $0x478] sm:$0xff] }
 0x4e8   : > { %4156 = vmatmul.msk.bf16.vlgmr.msrb.gmra.mxu0 %vm2076_vm7, %v2766_v53  ;;  %v4592_v44 = vld [vmem:[#allocation14 + $0x438] sm:$0xff] }
 0x4e9   : > { %3046 = vmatpush.bf16.msra.mxu0 %v4542_v46  ;;  %2941 = vmatpush.bf16.msrb.mxu1 %v4529_v47  ;;  %v3514_v46 = vrot.slane %v6031_v37, 3  ;;  %v3619_v47 = vrot.slane %v6048_v6, 3  ;;  %v1997_v37 = vld [vmem:[%s6111_s6] sm:$0x1] }
 0x4ea   : > { %4230 = vmatmul.msk.bf16.vlgmr.msrb.gmra.mxu2 %vm2076_vm7, %v6042_v56 }
 0x4eb   : > { %3156 = vmatpush.bf16.msrb.mxu3 %v4547_v10  ;;  %3258 = vmatpush.bf16.msra.mxu2 %v4560_v49 }
 0x4ec   : > { %2942 = vmatmul.bf16.vlgmr.msrb.gmra.mxu1 %v6036_v50  ;;  %v3620_v50 = vrot.slane %v6042_v56, 3 }
 0x4ed   : > { %3169 = vmatpush.bf16.msra.mxu1 %v4555_v48  ;;  %3047 = vmatpush.bf16.msra.mxu0 %v4541_v51 }
 0x4ee   : > { %3157 = vmatmul.bf16.vlgmr.msrb.gmra.mxu3 %v3089_v57 }
 0x4ef   : > { %3381 = vmatpush.bf16.msra.mxu3 %v4573_v54  ;;  %3259 = vmatpush.bf16.msra.mxu2 %v4559_v55 }
 0x4f1   : > { %3361 = vmatpush.bf16.msrb.mxu1 %v4572_v52  ;;  %3048 = vmatpush.bf16.msra.mxu0 %v4540_v59 }
 0x4f3   : > { %3573 = vmatpush.bf16.msrb.mxu3 %v4590_v58  ;;  %3260 = vmatpush.bf16.msra.mxu2 %v4558_v31 }
 0x4f5   : > { %3362 = vmatpush.bf16.msrb.mxu1 %v4571_v18  ;;  %3049 = vmatpush.bf16.msra.mxu0 %v4539_v61 }
 0x4f7   : > { %3574 = vmatpush.bf16.msrb.mxu3 %v4589_v60  ;;  %3261 = vmatpush.bf16.msra.mxu2 %v4557_v63 }
 0x4f9   : > { %3363 = vmatpush.bf16.msrb.mxu1 %v4570_v62  ;;  %3050 = vmatpush.bf16.msra.mxu0 %v4538_v1 }
 0x4fb   : > { %3575 = vmatpush.bf16.msrb.mxu3 %v4588_v0  ;;  %3262 = vmatpush.bf16.msra.mxu2 %v4556_v4 }
 0x4fc   : > { %3051 = vmatmul.bf16.vlgmr.msra.gmra.mxu0 %v6048_v6  ;;  %4267 = vmatmul.msk.bf16.vlgmr.msra.gmra.mxu1 %vm2076_vm7, %v3090_v9 }
 0x4fd   : > { %3364 = vmatpush.bf16.msrb.mxu1 %v4569_v2  ;;  %3275 = vmatpush.bf16.msrb.mxu0 %v4564_v3 }
 0x4fe   : > { %3263 = vmatmul.bf16.vlgmr.msra.gmra.mxu2 %v3195_v12  ;;  %4341 = vmatmul.msk.bf16.vlgmr.msra.gmra.mxu3 %vm2076_vm7, %v3302_v15 }
 0x4ff   : > { %3576 = vmatpush.bf16.msrb.mxu3 %v4587_v5  ;;  %3487 = vmatpush.bf16.msrb.mxu2 %v4582_v11 }
 0x501   : > { %3467 = vmatpush.bf16.msra.mxu0 %v4581_v7  ;;  %3365 = vmatpush.bf16.msrb.mxu1 %v4568_v8 }
 0x503   : > { %3577 = vmatpush.bf16.msrb.mxu3 %v4586_v13  ;;  %3679 = vmatpush.bf16.msra.mxu2 %v4599_v14 }
 0x505   : > { %3468 = vmatpush.bf16.msra.mxu0 %v4580_v16  ;;  %3366 = vmatpush.bf16.msrb.mxu1 %v4567_v17 }
 0x507   : > { %3578 = vmatpush.bf16.msrb.mxu3 %v4585_v19  ;;  %3680 = vmatpush.bf16.msra.mxu2 %v4598_v20 }
 0x509   : > { %3469 = vmatpush.bf16.msra.mxu0 %v4579_v21  ;;  %3367 = vmatpush.bf16.msrb.mxu1 %v4566_v22 }
 0x50b   : > { %3579 = vmatpush.bf16.msrb.mxu3 %v4584_v23  ;;  %3681 = vmatpush.bf16.msra.mxu2 %v4597_v24 }
 0x50c   : > { %4304 = vmatmul.msk.bf16.vlgmr.msrb.gmra.mxu0 %vm2076_vm7, %v3196_v33 }
 0x50d   : > { %3470 = vmatpush.bf16.msra.mxu0 %v4578_v25  ;;  %3368 = vmatpush.bf16.msrb.mxu1 %v4565_v26 }
 0x50e   : > { %4378 = vmatmul.msk.bf16.vlgmr.msrb.gmra.mxu2 %vm2076_vm7, %v3408_v35 }
 0x50f   : > { %3580 = vmatpush.bf16.msrb.mxu3 %v4583_v29  ;;  %3682 = vmatpush.bf16.msra.mxu2 %v4596_v30 }
 0x510   : > { %3369 = vmatmul.bf16.vlgmr.msrb.gmra.mxu1 %v3301_v34 }
 0x511   : > { %3593 = vmatpush.bf16.msra.mxu1 %v4591_v27  ;;  %3471 = vmatpush.bf16.msra.mxu0 %v4577_v32 }
 0x512   : > { %3581 = vmatmul.bf16.vlgmr.msrb.gmra.mxu3 %v3513_v38 }
 0x513   : > { %3683 = vmatpush.bf16.msra.mxu2 %v4595_v36 }
 0x515   : > { %3472 = vmatpush.bf16.msra.mxu0 %v4576_v40 }
 0x517   : > { %3684 = vmatpush.bf16.msra.mxu2 %v4594_v28 }
 0x519   : > { %3473 = vmatpush.bf16.msra.mxu0 %v4575_v41 }
 0x51b   : > { %3685 = vmatpush.bf16.msra.mxu2 %v4593_v39 }
 0x51d   : > { %3474 = vmatpush.bf16.msra.mxu0 %v4574_v42 }
 0x51f   : > { %3686 = vmatpush.bf16.msra.mxu2 %v4592_v44 }
 0x520   : > { %3475 = vmatmul.bf16.vlgmr.msra.gmra.mxu0 %v3407_v45  ;;  %4415 = vmatmul.msk.bf16.vlgmr.msra.gmra.mxu1 %vm2076_vm7, %v3514_v46 }
 0x521   : > { %3699 = vmatpush.bf16.msrb.mxu0 %v4600_v43 }
 0x522   : > { %3687 = vmatmul.bf16.vlgmr.msra.gmra.mxu2 %v3619_v47 }
 0x525   : > { %v2089_v48 = vpop.f32.mrf.mxu0  ;;  %v2102_v10 = vpop.f32.mrf.mxu1 }
 0x526   : > { %v2103_v49 = vadd.f32 %v2102_v10, %v2089_v48 }
 0x528   : > { %v2106_v58 = vadd.f32 %v2103_v49, %v1997_v37 }
 0x52d   : > { %v2091_v51 = vpop.f32.mrf.mxu0  ;;  %v2104_v52 = vpop.f32.mrf.mxu1 }
 0x52e   : > { %v2211_v53 = vpop.f32.mrf.mxu2  ;;  %v2304_v54 = vpop.f32.mrf.mxu3 }
 0x530   : > { %4452 = vmatmul.msk.bf16.vlgmr.msrb.gmra.mxu0 %vm2076_vm7, %v3620_v50 }
 0x535   : > { %v2198_v55 = vpop.f32.mrf.mxu1  ;;  %v2317_v57 = vpop.f32.mrf.mxu0 }
 0x536   : > { %v2212_v59 = vadd.f32 %v2211_v53, %v2198_v55  ;;  %v2213_v18 = vpop.f32.mrf.mxu2  ;;  %v2306_v31 = vpop.f32.mrf.mxu3  ;;  %v2318_v60 = vadd.f32 %v2317_v57, %v2304_v54 }
 0x538   : > { %v2215_v61 = vadd.f32 %v2212_v59, %v2106_v58 }
 0x53a   : > { %v2321_v62 = vadd.f32 %v2318_v60, %v2215_v61 }
 0x53d   : > { %v2200_v56 = vpop.f32.mrf.mxu1  ;;  %v2319_v63 = vpop.f32.mrf.mxu0 }
 0x53e   : > { %v2410_v0 = vpop.f32.mrf.mxu2  ;;  %v2529_v1 = vpop.f32.mrf.mxu3 }
 0x545   : > { %v2423_v2 = vpop.f32.mrf.mxu0  ;;  %v2516_v3 = vpop.f32.mrf.mxu1 }
 0x546   : > { %v2412_v4 = vpop.f32.mrf.mxu2  ;;  %v2424_v5 = vadd.f32 %v2423_v2, %v2410_v0  ;;  %v2530_v6 = vadd.f32 %v2529_v1, %v2516_v3  ;;  %v2531_v7 = vpop.f32.mrf.mxu3 }
 0x548   : > { %v2427_v8 = vadd.f32 %v2424_v5, %v2321_v62 }
 0x54a   : > { %v2533_v9 = vadd.f32 %v2530_v6, %v2427_v8 }
 0x54d   : > { %v2425_v11 = vpop.f32.mrf.mxu0  ;;  %v2518_v12 = vpop.f32.mrf.mxu1 }
 0x54e   : > { %v2635_v13 = vpop.f32.mrf.mxu2  ;;  %v2728_v14 = vpop.f32.mrf.mxu3 }
 0x555   : > { %v2622_v15 = vpop.f32.mrf.mxu0  ;;  %v2741_v20 = vpop.f32.mrf.mxu1 }
 0x556   : > { %v2636_v16 = vadd.f32 %v2635_v13, %v2622_v15  ;;  %v2637_v17 = vpop.f32.mrf.mxu2  ;;  %v2730_v19 = vpop.f32.mrf.mxu3  ;;  %v2742_v22 = vadd.f32 %v2741_v20, %v2728_v14 }
 0x558   : > { %v2639_v21 = vadd.f32 %v2636_v16, %v2533_v9 }
 0x55a   : > { %v2745_v23 = vadd.f32 %v2742_v22, %v2639_v21 }
 0x55d   : > { %v2624_v24 = vpop.f32.mrf.mxu0  ;;  %v2743_v27 = vpop.f32.mrf.mxu1 }
 0x55e   : > { %v2834_v25 = vpop.f32.mrf.mxu2  ;;  %v2956_v26 = vpop.f32.mrf.mxu3 }
 0x565   : > { %v2847_v30 = vpop.f32.mrf.mxu0 }
 0x566   : > { %v2836_v29 = vpop.f32.mrf.mxu2  ;;  %v2958_v33 = vpop.f32.mrf.mxu3  ;;  %v2848_v49 = vadd.f32 %v2847_v30, %v2834_v25 }
 0x568   : > { %v2851_v54 = vadd.f32 %v2848_v49, %v2745_v23 }
 0x569   : > { %v2943_v32 = vpop.f32.mrf.mxu1 }
 0x56a   : > { %v2957_v37 = vadd.f32 %v2956_v26, %v2943_v32 }
 0x56c   : > { %v2960_v57 = vadd.f32 %v2957_v37, %v2851_v54 }
 0x56d   : > { %v2849_v34 = vpop.f32.mrf.mxu0 }
 0x56e   : > { %v3065_v35 = vpop.f32.mrf.mxu2 }
 0x571   : > { %v2945_v36 = vpop.f32.mrf.mxu1  ;;  %v3158_v38 = vpop.f32.mrf.mxu3 }
 0x576   : > { %v3067_v28 = vpop.f32.mrf.mxu2 }
 0x579   : > { %v3052_v40 = vpop.f32.mrf.mxu0  ;;  %v3160_v41 = vpop.f32.mrf.mxu3 }
 0x57a   : > { %v3171_v39 = vpop.f32.mrf.mxu1  ;;  %v3066_v55 = vadd.f32 %v3065_v35, %v3052_v40 }
 0x57b   : > { %v3172_v61 = vadd.f32 %v3171_v39, %v3158_v38 }
 0x57c   : > { %v3069_v31 = vadd.f32 %v3066_v55, %v2960_v57 }
 0x57e   : > { %v3175_v56 = vadd.f32 %v3172_v61, %v3069_v31 }
 0x581   : > { %v3054_v42 = vpop.f32.mrf.mxu0  ;;  %v3264_v43 = vpop.f32.mrf.mxu2 }
 0x582   : > { %v3173_v44 = vpop.f32.mrf.mxu1  ;;  %v3383_v45 = vpop.f32.mrf.mxu3 }
 0x589   : > { %v3266_v46 = vpop.f32.mrf.mxu2  ;;  %v3277_v47 = vpop.f32.mrf.mxu0 }
 0x58a   : > { %v3385_v10 = vpop.f32.mrf.mxu3  ;;  %v3278_v62 = vadd.f32 %v3277_v47, %v3264_v43 }
 0x58c   : > { %v3281_v63 = vadd.f32 %v3278_v62, %v3175_v56 }
 0x58d   : > { %v3370_v48 = vpop.f32.mrf.mxu1 }
 0x58e   : > { %v3384_v2 = vadd.f32 %v3383_v45, %v3370_v48 }
 0x590   : > { %v3387_v5 = vadd.f32 %v3384_v2, %v3281_v63 }
 0x591   : > { %v3489_v50 = vpop.f32.mrf.mxu2  ;;  %v3279_v51 = vpop.f32.mrf.mxu0 }
 0x595   : > { %v3372_v52 = vpop.f32.mrf.mxu1  ;;  %v3582_v53 = vpop.f32.mrf.mxu3 }
 0x599   : > { %v3491_v58 = vpop.f32.mrf.mxu2 }
 0x59d   : > { %v3476_v59 = vpop.f32.mrf.mxu0  ;;  %v3595_v18 = vpop.f32.mrf.mxu1 }
 0x59e   : > { %v3584_v60 = vpop.f32.mrf.mxu3  ;;  %v3490_v3 = vadd.f32 %v3489_v50, %v3476_v59  ;;  %v3596_v7 = vadd.f32 %v3595_v18, %v3582_v53 }
 0x5a0   : > { %v3493_v6 = vadd.f32 %v3490_v3, %v3387_v5 }
 0x5a2   : > { %v3599_v9 = vadd.f32 %v3596_v7, %v3493_v6 }
 0x5a5   : > { %v3478_v0 = vpop.f32.mrf.mxu0  ;;  %v3597_v1 = vpop.f32.mrf.mxu1 }
 0x5a6   : > { %v3688_v4 = vpop.f32.mrf.mxu2 }
 0x5ad   : > { %v3701_v8 = vpop.f32.mrf.mxu0 }
 0x5ae   : > { %v3690_v11 = vpop.f32.mrf.mxu2  ;;  %v3702_v12 = vadd.f32 %v3701_v8, %v3688_v4 }
 0x5b0   : > { %v3705_v13 = vadd.f32 %v3702_v12, %v3599_v9 }
 0x5b2   : > { %3707 = vst.msk [vmem:[%s376_s14] sm:$0x1] %vm3706_vm8, %v3705_v13 }
 0x5b3   : > { %4989 = shalt.err (!%p4986_p9)
}
 0x5b4   : > { %4623 = dma.vmem_to_hbm [thread:$0]  (%p5257_p13), %s3720_s20, 16, %s3722_s29, %s3709_s13  }
 0x5b5   : > { %v3703_v14 = vpop.f32.mrf.mxu0 }
 0x5b6 PF: > { %s3733_s16 = sand.u32 1, %s5028_s24   ;;  %p6194_p10 = scmp.ge.s32.totalorder %s5040_s27, 2 }
 0x5b7   : > { %s3734_s23 = scalar_lea.sflag [#allocation7], %s3733_s16 }
 0x5b8   : > { %p4646_p11 = pnand %p6194_p10, %p5262_p5 }
 0x5ba   : > { %p4647_p0 = pneg %p4646_p11 }
 0x5bc   : > { %5023 = dma.done.wait (%p4647_p0), %s3734_s23, 16  }
 0x5bd   : > { %5025 = vsyncadd (%p4647_p0), %s3734_s23, 4294967280  ;;  %p23_p2 = scmp.ge.s32.totalorder %s5237_s28, 4   ;;  %s6195_s24 = smov %s5032_s25 }
 0x5be   : > { %s6196_s25 = smov %s5036_s26  ;;  %s6197_s26 = smov %s5249_s12 }
 0x5bf   : > { %s6198_s27 = smov %s5237_s28  ;;  %25 = sbr.rel (!%p23_p2) target bundleno = 10 (0xa), region = 128 }
 0x5c4   :  { %3739 = vsyncpa [#allocation6], 1 }
 0x5c5   :  { %3741 = vsyncpa [#allocation6 + $0x1], 1 }
 0x5c6   :  { %3742 = vsyncpa [#allocation9], 1 }
 0x5c7   :  { %3743 = vsyncpa [#allocation12], 1 }
 0x5c8   :  { %3744 = vsyncpa [#allocation15], 1 }
 0x5c9   :  { %3745 = vsyncpa [#allocation7], 1 }
 0x5ca   :  { %3747 = vsyncpa [#allocation7 + $0x1], 1 }

</bundles_post_ra>
